<compile_context>
chip_gen: v7x
topology: tpu7x:2x2x1
jax: 0.10.0
libtpu: 0.0.40
codegen_flags: <defaults>
</compile_context>

<pallas_src>
import functools
import math

import jax
import jax.numpy as jnp
from jax.experimental import pallas as pl
from jax.experimental.pallas import tpu as pltpu

BN_EPS = 1e-5
VMEM_LIMIT = 32 * 1024 * 1024          # safe on v7x (64 MiB physical) and below
INPUT_BLOCK_BUDGET = 8 * 1024 * 1024   # per-buffer target for the halo-input DMA


def _conv_acc(x_ref, w_ref, *, nb, H, W, Cin, Cout):
    """3x3 'same' conv on a padded NHWC tile as 9 accumulating MXU dots (f32 acc).

    x_ref: (nb, H+2, W+2, Cin) halo tile (compute dtype)
    w_ref: (9, Cin, Cout) tap weights (compute dtype)
    returns (nb*H*W, Cout) float32, rows ordered (n, h, w) row-major.
    """
    m = nb * H * W
    acc = jnp.zeros((m, Cout), dtype=jnp.float32)
    for dy in range(3):
        for dx in range(3):
            tap = x_ref[:, dy:dy + H, dx:dx + W, :]          # (nb, H, W, Cin) static slice
            tap = tap.reshape(m, Cin)
            acc = acc + jnp.dot(tap, w_ref[dy * 3 + dx],
                                preferred_element_type=jnp.float32)
    return acc


def stats_kernel(x_ref, w_ref, stat_ref, *, nb, H, W, Cin, Cout):
    # Per-block partial BN statistics (sum, sum of squares) of the conv output.
    # (no conv-bias add: a per-channel constant is removed by BN mean subtraction)
    acc = _conv_acc(x_ref, w_ref, nb=nb, H=H, W=W, Cin=Cin, Cout=Cout)
    stat_ref[0, 0:1, :] = jnp.sum(acc, axis=0, keepdims=True)
    stat_ref[0, 1:2, :] = jnp.sum(acc * acc, axis=0, keepdims=True)


def norm_kernel(x_ref, w_ref, scale_ref, shift_ref, out_ref, *, nb, H, W, Cin, Cout):
    # Conv (recomputed) + folded BN + ReLU + MaxPool2d(2) + lane-dense store.
    acc = _conv_acc(x_ref, w_ref, nb=nb, H=H, W=W, Cin=Cin, Cout=Cout)
    y = jnp.maximum(acc * scale_ref[...] + shift_ref[...], 0.0)   # BN+ReLU as one FMA+max

    m = nb * H * W
    hw = (W // 2) * Cout
    # rows of y are (n, h, w) row-major -> W-neighbours are adjacent rows:
    y = y.reshape(m // 2, 2 * Cout)
    y = jnp.maximum(y[:, :Cout], y[:, Cout:])                     # pool W -> (m/2, Cout)
    # rows are now (n, h, w2); fold each h-pair into lanes [even-h | odd-h]:
    y = y.reshape(nb * (H // 2), W * Cout)
    y = jnp.maximum(y[:, :hw], y[:, hw:])                         # pool H -> (nb*H/2, (W/2)*Cout)

    out_ref[...] = y.reshape(nb, H // 2, hw).astype(out_ref.dtype)


def conv_block_forward(x_nchw, w_oihw, bias, gamma, beta, *,
                       compute_dtype=jnp.float32, batch_block=None):
    """ConvBlock forward (pool=True, padding=1). Input/output are NCHW like PyTorch.

    `bias` is accepted for API parity but unused: under training-mode BatchNorm a
    per-channel conv bias is mathematically a no-op.
    `compute_dtype=jnp.bfloat16` is recommended on v6e/v7x (f32 accumulation kept).
    """
    del bias
    N, Cin, H, W = x_nchw.shape
    Cout = w_oihw.shape[0]
    assert H % 2 == 0 and W % 2 == 0

    # ---- one cheap pad in NHWC (replaces the 9x im2col HBM blowup) ----
    x_nhwc = jnp.transpose(x_nchw, (0, 2, 3, 1))
    xp = jnp.pad(x_nhwc, ((0, 0), (1, 1), (1, 1), (0, 0))).astype(compute_dtype)

    # (Cout, Cin, 3, 3) -> (3, 3, Cin, Cout) -> (9, Cin, Cout), matching the tap loop
    w_taps = jnp.transpose(w_oihw, (2, 3, 1, 0)).reshape(9, Cin, Cout).astype(compute_dtype)

    # ---- batch blocking: biggest divisor of N whose halo block fits the budget ----
    if batch_block is None:
        per_image = (H + 2) * (W + 2) * Cin * jnp.dtype(compute_dtype).itemsize
        batch_block = max(1, min(N, INPUT_BLOCK_BUDGET // max(per_image, 1)))
        while N % batch_block:
            batch_block -= 1
    nb = batch_block
    assert N % nb == 0
    G = N // nb

    kern_kw = dict(nb=nb, H=H, W=W, Cin=Cin, Cout=Cout)
    x_spec = pl.BlockSpec((nb, H + 2, W + 2, Cin), lambda g: (g, 0, 0, 0))
    w_spec = pl.BlockSpec((9, Cin, Cout), lambda g: (0, 0, 0))
    cparams = pltpu.CompilerParams(dimension_semantics=("parallel",),
                                   vmem_limit_bytes=VMEM_LIMIT)

    # ---- call 1: conv + per-block partial BN stats (parallel, tiny output) ----
    partial = pl.pallas_call(
        functools.partial(stats_kernel, **kern_kw),
        out_shape=jax.ShapeDtypeStruct((G, 2, Cout), jnp.float32),
        grid=(G,),
        in_specs=[x_spec, w_spec],
        out_specs=pl.BlockSpec((1, 2, Cout), lambda g: (g, 0, 0)),
        compiler_params=cparams,
    )(xp, w_taps)

    # ---- fold train-mode BN (biased variance) into per-channel scale/shift (plain JAX) ----
    count = float(N * H * W)
    sums = jnp.sum(partial, axis=0)                          # (2, Cout) f32
    mean = sums[0] / count
    var = jnp.maximum(sums[1] / count - mean * mean, 0.0)    # clamp one-pass cancellation
    scale = gamma.astype(jnp.float32) * jax.lax.rsqrt(var + BN_EPS)
    shift = beta.astype(jnp.float32) - mean * scale

    # ---- call 2: conv + BN + ReLU + MaxPool2d(2), parallel grid, lane-dense store ----
    out = pl.pallas_call(
        functools.partial(norm_kernel, **kern_kw),
        out_shape=jax.ShapeDtypeStruct((N, H // 2, (W // 2) * Cout), x_nchw.dtype),
        grid=(G,),
        in_specs=[x_spec, w_spec,
                  pl.BlockSpec((1, Cout), lambda g: (0, 0)),
                  pl.BlockSpec((1, Cout), lambda g: (0, 0))],
        out_specs=pl.BlockSpec((nb, H // 2, (W // 2) * Cout), lambda g: (g, 0, 0)),
        compiler_params=cparams,
    )(xp, w_taps, scale.reshape(1, Cout), shift.reshape(1, Cout))

    # layout plumbing back to PyTorch's NCHW (outside the kernel, cheap)
    out = out.reshape(N, H // 2, W // 2, Cout)
    return jnp.transpose(out, (0, 3, 1, 2))


def reference_forward(x_nchw, w_oihw, bias, gamma, beta):
    """Pure-JAX reference mirroring the PyTorch forward (training-mode BN)."""
    out = jax.lax.conv_general_dilated(
        x_nchw, w_oihw, window_strides=(1, 1), padding=((1, 1), (1, 1)),
        dimension_numbers=("NCHW", "OIHW", "NCHW"),
        precision=jax.lax.Precision.HIGHEST,
        preferred_element_type=jnp.float32)
    out = out + bias[None, :, None, None]
    mean = jnp.mean(out, axis=(0, 2, 3), keepdims=True)
    var = jnp.mean((out - mean) ** 2, axis=(0, 2, 3), keepdims=True)
    out = (out - mean) * jax.lax.rsqrt(var + BN_EPS)
    out = out * gamma[None, :, None, None] + beta[None, :, None, None]
    out = jnp.maximum(out, 0.0)
    out = jax.lax.reduce_window(out, -jnp.inf, jax.lax.max,
                                (1, 1, 2, 2), (1, 1, 2, 2), "VALID")
    return out.astype(x_nchw.dtype)


if __name__ == "__main__":
    # ConvBlock(indim=4, outdim=8, pool=True, padding=1), small shapes.
    N, Cin, H, W = 2, 4, 16, 16
    Cout = 8

    key = jax.random.PRNGKey(0)
    kx, kw, kb = jax.random.split(key, 3)

    x = jax.random.normal(kx, (N, Cin, H, W), dtype=jnp.float32)

    # init_layer(Conv2d): weight ~ N(0, sqrt(2 / (k*k*out_channels)))
    w_std = math.sqrt(2.0 / float(3 * 3 * Cout))
    w = jax.random.normal(kw, (Cout, Cin, 3, 3), dtype=jnp.float32) * w_std
    # Conv2d default bias init: uniform(-1/sqrt(fan_in), 1/sqrt(fan_in))
    fan_in = Cin * 3 * 3
    bound = 1.0 / math.sqrt(fan_in)
    bias = jax.random.uniform(kb, (Cout,), minval=-bound, maxval=bound,
                              dtype=jnp.float32)
    # init_layer(BatchNorm2d): weight=1, bias=0
    gamma = jnp.ones((Cout,), dtype=jnp.float32)
    beta = jnp.zeros((Cout,), dtype=jnp.float32)

    ref = jax.block_until_ready(reference_forward(x, w, bias, gamma, beta))

    # f32 path (exact PyTorch semantics)
    out = jax.block_until_ready(conv_block_forward(x, w, bias, gamma, beta))
    assert out.shape == (N, Cout, H // 2, W // 2), out.shape
    assert jnp.allclose(out, ref, atol=1e-3, rtol=1e-3), float(jnp.max(jnp.abs(out - ref)))

    # bf16 MXU path (recommended on v6e/v7x): same kernels, looser tolerance
    out_bf16 = jax.block_until_ready(
        conv_block_forward(x, w, bias, gamma, beta, compute_dtype=jnp.bfloat16))
    assert out_bf16.shape == (N, Cout, H // 2, W // 2), out_bf16.shape
    assert jnp.allclose(out_bf16, ref, atol=5e-2, rtol=5e-2), \
        float(jnp.max(jnp.abs(out_bf16 - ref)))

    print("KERNEL_OK")
</pallas_src>

<mosaic_0001>
module attributes {stable_mosaic.version = 11 : i64} {
  func.func @stats_kernel(%arg0: i32, %arg1: memref<2x18x18x4xf32, #tpu.memory_space<vmem>>, %arg2: memref<9x4x8xf32, #tpu.memory_space<vmem>>, %arg3: memref<1x2x8xf32, #tpu.memory_space<vmem>>) attributes {dimension_semantics = [#tpu.dimension_semantics<parallel>], iteration_bounds = array<i64: 1>, scalar_prefetch = 0 : i64, scratch_operands = 0 : i64, tpu.core_type = #tpu.core_type<tc>, window_params = [{transform_indices = @transform_0, window_bounds = array<i64: 2, 18, 18, 4>}, {pipeline_mode = #tpu.pipeline_mode<synchronous>, transform_indices = @transform_1, window_bounds = array<i64: 9, 4, 8>}, {transform_indices = @transform_2, window_bounds = array<i64: 1, 2, 8>}]} {
    %cst = arith.constant 0.000000e+00 : f32
    %0 = vector.broadcast %cst : f32 to vector<512x8xf32>
    %c0 = arith.constant 0 : index
    %c0_0 = arith.constant 0 : index
    %c0_1 = arith.constant 0 : index
    %c0_2 = arith.constant 0 : index
    %1 = vector.load %arg1[%c0, %c0_0, %c0_1, %c0_2] : memref<2x18x18x4xf32, #tpu.memory_space<vmem>>, vector<2x16x16x4xf32>
    %2 = vector.shape_cast %1 : vector<2x16x16x4xf32> to vector<512x4xf32>
    %c0_3 = arith.constant 0 : index
    %c0_4 = arith.constant 0 : index
    %c0_5 = arith.constant 0 : index
    %3 = vector.load %arg2[%c0_3, %c0_4, %c0_5] : memref<9x4x8xf32, #tpu.memory_space<vmem>>, vector<1x4x8xf32>
    %4 = vector.shape_cast %3 : vector<1x4x8xf32> to vector<4x8xf32>
    %cst_6 = arith.constant dense<0.000000e+00> : vector<512x8xf32>
    %5 = tpu.matmul %2, %4, %cst_6 {dimension_numbers = #tpu.dot_dimension_numbers<[1], [0], [0], [1], [0, 0, 1, 1], [], []>} : vector<512x4xf32>, vector<4x8xf32>, vector<512x8xf32> -> vector<512x8xf32>
    %6 = arith.addf %0, %5 : vector<512x8xf32>
    %c0_7 = arith.constant 0 : index
    %c0_8 = arith.constant 0 : index
    %c1 = arith.constant 1 : index
    %c0_9 = arith.constant 0 : index
    %7 = vector.load %arg1[%c0_7, %c0_8, %c1, %c0_9] : memref<2x18x18x4xf32, #tpu.memory_space<vmem>>, vector<2x16x16x4xf32>
    %8 = vector.shape_cast %7 : vector<2x16x16x4xf32> to vector<512x4xf32>
    %c1_10 = arith.constant 1 : index
    %c0_11 = arith.constant 0 : index
    %c0_12 = arith.constant 0 : index
    %9 = vector.load %arg2[%c1_10, %c0_11, %c0_12] : memref<9x4x8xf32, #tpu.memory_space<vmem>>, vector<1x4x8xf32>
    %10 = vector.shape_cast %9 : vector<1x4x8xf32> to vector<4x8xf32>
    %cst_13 = arith.constant dense<0.000000e+00> : vector<512x8xf32>
    %11 = tpu.matmul %8, %10, %cst_13 {dimension_numbers = #tpu.dot_dimension_numbers<[1], [0], [0], [1], [0, 0, 1, 1], [], []>} : vector<512x4xf32>, vector<4x8xf32>, vector<512x8xf32> -> vector<512x8xf32>
    %12 = arith.addf %6, %11 : vector<512x8xf32>
    %c0_14 = arith.constant 0 : index
    %c0_15 = arith.constant 0 : index
    %c2 = arith.constant 2 : index
    %c0_16 = arith.constant 0 : index
    %13 = vector.load %arg1[%c0_14, %c0_15, %c2, %c0_16] : memref<2x18x18x4xf32, #tpu.memory_space<vmem>>, vector<2x16x16x4xf32>
    %14 = vector.shape_cast %13 : vector<2x16x16x4xf32> to vector<512x4xf32>
    %c2_17 = arith.constant 2 : index
    %c0_18 = arith.constant 0 : index
    %c0_19 = arith.constant 0 : index
    %15 = vector.load %arg2[%c2_17, %c0_18, %c0_19] : memref<9x4x8xf32, #tpu.memory_space<vmem>>, vector<1x4x8xf32>
    %16 = vector.shape_cast %15 : vector<1x4x8xf32> to vector<4x8xf32>
    %cst_20 = arith.constant dense<0.000000e+00> : vector<512x8xf32>
    %17 = tpu.matmul %14, %16, %cst_20 {dimension_numbers = #tpu.dot_dimension_numbers<[1], [0], [0], [1], [0, 0, 1, 1], [], []>} : vector<512x4xf32>, vector<4x8xf32>, vector<512x8xf32> -> vector<512x8xf32>
    %18 = arith.addf %12, %17 : vector<512x8xf32>
    %c0_21 = arith.constant 0 : index
    %c1_22 = arith.constant 1 : index
    %c0_23 = arith.constant 0 : index
    %c0_24 = arith.constant 0 : index
    %19 = vector.load %arg1[%c0_21, %c1_22, %c0_23, %c0_24] : memref<2x18x18x4xf32, #tpu.memory_space<vmem>>, vector<2x16x16x4xf32>
    %20 = vector.shape_cast %19 : vector<2x16x16x4xf32> to vector<512x4xf32>
    %c3 = arith.constant 3 : index
    %c0_25 = arith.constant 0 : index
    %c0_26 = arith.constant 0 : index
    %21 = vector.load %arg2[%c3, %c0_25, %c0_26] : memref<9x4x8xf32, #tpu.memory_space<vmem>>, vector<1x4x8xf32>
    %22 = vector.shape_cast %21 : vector<1x4x8xf32> to vector<4x8xf32>
    %cst_27 = arith.constant dense<0.000000e+00> : vector<512x8xf32>
    %23 = tpu.matmul %20, %22, %cst_27 {dimension_numbers = #tpu.dot_dimension_numbers<[1], [0], [0], [1], [0, 0, 1, 1], [], []>} : vector<512x4xf32>, vector<4x8xf32>, vector<512x8xf32> -> vector<512x8xf32>
    %24 = arith.addf %18, %23 : vector<512x8xf32>
    %c0_28 = arith.constant 0 : index
    %c1_29 = arith.constant 1 : index
    %c1_30 = arith.constant 1 : index
    %c0_31 = arith.constant 0 : index
    %25 = vector.load %arg1[%c0_28, %c1_29, %c1_30, %c0_31] : memref<2x18x18x4xf32, #tpu.memory_space<vmem>>, vector<2x16x16x4xf32>
    %26 = vector.shape_cast %25 : vector<2x16x16x4xf32> to vector<512x4xf32>
    %c4 = arith.constant 4 : index
    %c0_32 = arith.constant 0 : index
    %c0_33 = arith.constant 0 : index
    %27 = vector.load %arg2[%c4, %c0_32, %c0_33] : memref<9x4x8xf32, #tpu.memory_space<vmem>>, vector<1x4x8xf32>
    %28 = vector.shape_cast %27 : vector<1x4x8xf32> to vector<4x8xf32>
    %cst_34 = arith.constant dense<0.000000e+00> : vector<512x8xf32>
    %29 = tpu.matmul %26, %28, %cst_34 {dimension_numbers = #tpu.dot_dimension_numbers<[1], [0], [0], [1], [0, 0, 1, 1], [], []>} : vector<512x4xf32>, vector<4x8xf32>, vector<512x8xf32> -> vector<512x8xf32>
    %30 = arith.addf %24, %29 : vector<512x8xf32>
    %c0_35 = arith.constant 0 : index
    %c1_36 = arith.constant 1 : index
    %c2_37 = arith.constant 2 : index
    %c0_38 = arith.constant 0 : index
    %31 = vector.load %arg1[%c0_35, %c1_36, %c2_37, %c0_38] : memref<2x18x18x4xf32, #tpu.memory_space<vmem>>, vector<2x16x16x4xf32>
    %32 = vector.shape_cast %31 : vector<2x16x16x4xf32> to vector<512x4xf32>
    %c5 = arith.constant 5 : index
    %c0_39 = arith.constant 0 : index
    %c0_40 = arith.constant 0 : index
    %33 = vector.load %arg2[%c5, %c0_39, %c0_40] : memref<9x4x8xf32, #tpu.memory_space<vmem>>, vector<1x4x8xf32>
    %34 = vector.shape_cast %33 : vector<1x4x8xf32> to vector<4x8xf32>
    %cst_41 = arith.constant dense<0.000000e+00> : vector<512x8xf32>
    %35 = tpu.matmul %32, %34, %cst_41 {dimension_numbers = #tpu.dot_dimension_numbers<[1], [0], [0], [1], [0, 0, 1, 1], [], []>} : vector<512x4xf32>, vector<4x8xf32>, vector<512x8xf32> -> vector<512x8xf32>
    %36 = arith.addf %30, %35 : vector<512x8xf32>
    %c0_42 = arith.constant 0 : index
    %c2_43 = arith.constant 2 : index
    %c0_44 = arith.constant 0 : index
    %c0_45 = arith.constant 0 : index
    %37 = vector.load %arg1[%c0_42, %c2_43, %c0_44, %c0_45] : memref<2x18x18x4xf32, #tpu.memory_space<vmem>>, vector<2x16x16x4xf32>
    %38 = vector.shape_cast %37 : vector<2x16x16x4xf32> to vector<512x4xf32>
    %c6 = arith.constant 6 : index
    %c0_46 = arith.constant 0 : index
    %c0_47 = arith.constant 0 : index
    %39 = vector.load %arg2[%c6, %c0_46, %c0_47] : memref<9x4x8xf32, #tpu.memory_space<vmem>>, vector<1x4x8xf32>
    %40 = vector.shape_cast %39 : vector<1x4x8xf32> to vector<4x8xf32>
    %cst_48 = arith.constant dense<0.000000e+00> : vector<512x8xf32>
    %41 = tpu.matmul %38, %40, %cst_48 {dimension_numbers = #tpu.dot_dimension_numbers<[1], [0], [0], [1], [0, 0, 1, 1], [], []>} : vector<512x4xf32>, vector<4x8xf32>, vector<512x8xf32> -> vector<512x8xf32>
    %42 = arith.addf %36, %41 : vector<512x8xf32>
    %c0_49 = arith.constant 0 : index
    %c2_50 = arith.constant 2 : index
    %c1_51 = arith.constant 1 : index
    %c0_52 = arith.constant 0 : index
    %43 = vector.load %arg1[%c0_49, %c2_50, %c1_51, %c0_52] : memref<2x18x18x4xf32, #tpu.memory_space<vmem>>, vector<2x16x16x4xf32>
    %44 = vector.shape_cast %43 : vector<2x16x16x4xf32> to vector<512x4xf32>
    %c7 = arith.constant 7 : index
    %c0_53 = arith.constant 0 : index
    %c0_54 = arith.constant 0 : index
    %45 = vector.load %arg2[%c7, %c0_53, %c0_54] : memref<9x4x8xf32, #tpu.memory_space<vmem>>, vector<1x4x8xf32>
    %46 = vector.shape_cast %45 : vector<1x4x8xf32> to vector<4x8xf32>
    %cst_55 = arith.constant dense<0.000000e+00> : vector<512x8xf32>
    %47 = tpu.matmul %44, %46, %cst_55 {dimension_numbers = #tpu.dot_dimension_numbers<[1], [0], [0], [1], [0, 0, 1, 1], [], []>} : vector<512x4xf32>, vector<4x8xf32>, vector<512x8xf32> -> vector<512x8xf32>
    %48 = arith.addf %42, %47 : vector<512x8xf32>
    %c0_56 = arith.constant 0 : index
    %c2_57 = arith.constant 2 : index
    %c2_58 = arith.constant 2 : index
    %c0_59 = arith.constant 0 : index
    %49 = vector.load %arg1[%c0_56, %c2_57, %c2_58, %c0_59] : memref<2x18x18x4xf32, #tpu.memory_space<vmem>>, vector<2x16x16x4xf32>
    %50 = vector.shape_cast %49 : vector<2x16x16x4xf32> to vector<512x4xf32>
    %c8 = arith.constant 8 : index
    %c0_60 = arith.constant 0 : index
    %c0_61 = arith.constant 0 : index
    %51 = vector.load %arg2[%c8, %c0_60, %c0_61] : memref<9x4x8xf32, #tpu.memory_space<vmem>>, vector<1x4x8xf32>
    %52 = vector.shape_cast %51 : vector<1x4x8xf32> to vector<4x8xf32>
    %cst_62 = arith.constant dense<0.000000e+00> : vector<512x8xf32>
    %53 = tpu.matmul %50, %52, %cst_62 {dimension_numbers = #tpu.dot_dimension_numbers<[1], [0], [0], [1], [0, 0, 1, 1], [], []>} : vector<512x4xf32>, vector<4x8xf32>, vector<512x8xf32> -> vector<512x8xf32>
    %54 = arith.addf %48, %53 : vector<512x8xf32>
    %cst_63 = arith.constant dense<0.000000e+00> : vector<8xf32>
    %55 = vector.multi_reduction <add>, %54, %cst_63 [0] : vector<512x8xf32> to vector<8xf32>
    %56 = vector.shape_cast %55 : vector<8xf32> to vector<1x8xf32>
    %c0_64 = arith.constant 0 : index
    %c0_65 = arith.constant 0 : index
    %c0_66 = arith.constant 0 : index
    %57 = vector.load %arg3[%c0_64, %c0_65, %c0_66] : memref<1x2x8xf32, #tpu.memory_space<vmem>>, vector<1x1x8xf32>
    %58 = vector.shape_cast %57 : vector<1x1x8xf32> to vector<1x8xf32>
    %59 = vector.shape_cast %56 : vector<1x8xf32> to vector<1x1x8xf32>
    tpu.vector_store %arg3[%c0_64, %c0_65, %c0_66], %59 {strides = array<i32>} : memref<1x2x8xf32, #tpu.memory_space<vmem>>, vector<1x1x8xf32>,
    %60 = arith.mulf %54, %54 : vector<512x8xf32>
    %cst_67 = arith.constant dense<0.000000e+00> : vector<8xf32>
    %61 = vector.multi_reduction <add>, %60, %cst_67 [0] : vector<512x8xf32> to vector<8xf32>
    %62 = vector.shape_cast %61 : vector<8xf32> to vector<1x8xf32>
    %c0_68 = arith.constant 0 : index
    %c1_69 = arith.constant 1 : index
    %c0_70 = arith.constant 0 : index
    %63 = vector.load %arg3[%c0_68, %c1_69, %c0_70] : memref<1x2x8xf32, #tpu.memory_space<vmem>>, vector<1x1x8xf32>
    %64 = vector.shape_cast %63 : vector<1x1x8xf32> to vector<1x8xf32>
    %65 = vector.shape_cast %62 : vector<1x8xf32> to vector<1x1x8xf32>
    tpu.vector_store %arg3[%c0_68, %c1_69, %c0_70], %65 {strides = array<i32>} : memref<1x2x8xf32, #tpu.memory_space<vmem>>, vector<1x1x8xf32>,
    return
  }
  func.func @transform_0(%arg0: i32) -> (i32, i32, i32, i32) {
    %c0_i32 = arith.constant 0 : i32
    %c0_i32_0 = arith.constant 0 : i32
    %c0_i32_1 = arith.constant 0 : i32
    %c0_i32_2 = arith.constant 0 : i32
    return %arg0, %c0_i32, %c0_i32_0, %c0_i32_1 : i32, i32, i32, i32
  }
  func.func @transform_1(%arg0: i32) -> (i32, i32, i32) {
    %c0_i32 = arith.constant 0 : i32
    %c0_i32_0 = arith.constant 0 : i32
    %c0_i32_1 = arith.constant 0 : i32
    %c0_i32_2 = arith.constant 0 : i32
    return %c0_i32, %c0_i32_0, %c0_i32_1 : i32, i32, i32
  }
  func.func @transform_2(%arg0: i32) -> (i32, i32, i32) {
    %c0_i32 = arith.constant 0 : i32
    %c0_i32_0 = arith.constant 0 : i32
    %c0_i32_1 = arith.constant 0 : i32
    return %arg0, %c0_i32, %c0_i32_0 : i32, i32, i32
  }
}

</mosaic_0001>

<bundles_post_ra>
// kernel: tpu_custom_call.1
= control target key start
LH: loop header
LB: loop body
LE: loop exit
PB: predicated region body
PF: predicated region fallthrough
CT: control target
= control target key end

     0   :  { %vm336_vm0 = vcmask 1043456   ;;  %vm143_vm1 = vcmask 31744   ;;  %s12225_s0 = inlined_call_operand.vmem [shape: f32[2,18,18,4], index: 0, kind: input, shape index: {}]   ;;  %s12226_s1 = inlined_call_operand.vmem [shape: f32[9,4,8], index: 1, kind: input, shape index: {}]   ;;  %s12227_s2 = inlined_call_operand.hbm [shape: f32[1,2,8], index: 2, kind: output, shape index: {}]  }
   0x1   :  { %v6625_v0 = vld [vmem:[%s12226_s1 + $0x4] sm:$0xf]  ;;  %v9631_v1 = vld [vmem:[%s12226_s1 + $0x10] sm:$0xf]  ;;  %v6952_v3 = vld [vmem:[%s12225_s0 + $0x19] sm:$0xff] }
   0x2   :  { %v77_v2 = vld [vmem:[%s12225_s0 + $0x1] sm:$0xff]  ;;  %8187 = vmatprep.subr.msk.mxu1 %vm336_vm0, %v6625_v0  ;;  %8579 = vmatprep.subr.msk.mxu0 %vm336_vm0, %v9631_v1  ;;  %v78_v4 = vld [vmem:[%s12225_s0 + $0x9] sm:$0xff]  ;;  %v7146_v7 = vld [vmem:[%s12226_s1 + $0x14] sm:$0xf] }
   0x3   :  { %v76_v5 = vld [vmem:[%s12226_s1] sm:$0xf]  ;;  %8188 = vmatpush3.msk.msra.mxu1 %vm336_vm0, %v6625_v0  ;;  %8189 = vmatprep.mubr.msk.f32.mxu1 %vm143_vm1, %v77_v2  ;;  %v6954_v8 = vld [vmem:[%s12225_s0 + $0x31] sm:$0xff]  ;;  %v6956_v10 = vld [vmem:[%s12225_s0 + $0x49] sm:$0xff] }
   0x4   :  { %v6953_v6 = vld [vmem:[%s12225_s0 + $0x21] sm:$0xff]  ;;  %8580 = vmatpush3.msk.msra.mxu0 %vm336_vm0, %v9631_v1  ;;  %8581 = vmatprep.mubr.msk.f32.mxu0 %vm143_vm1, %v6952_v3  ;;  %v6955_v9 = vld [vmem:[%s12225_s0 + $0x39] sm:$0xff]  ;;  %v6957_v11 = vld [vmem:[%s12225_s0 + $0x51] sm:$0xff] }
   0x5   :  { %8190 = vmatmul.mubr.msk.f32.vlgmr.msra.gmra.mrb[0].mxu1 %vm143_vm1, %v78_v4  ;;  %8285 = vmatprep.subr.msk.mxu1 %vm336_vm0, %v76_v5  ;;  %v6958_v12 = vld [vmem:[%s12225_s0 + $0x61] sm:$0xff]  ;;  %v6959_v13 = vld [vmem:[%s12225_s0 + $0x69] sm:$0xff]  ;;  %v9696_v14 = vld [vmem:[%s12226_s1 + $0x18] sm:$0xf] }
   0x6   :  { %8582 = vmatmul.mubr.msk.f32.vlgmr.msra.gmra.mrb[0].mxu0 %vm143_vm1, %v6953_v6  ;;  %8677 = vmatprep.subr.msk.mxu0 %vm336_vm0, %v7146_v7  ;;  %v6960_v15 = vld [vmem:[%s12225_s0 + $0x79] sm:$0xff]  ;;  %v6961_v16 = vld [vmem:[%s12225_s0 + $0x81] sm:$0xff]  ;;  %v6962_v17 = vld [vmem:[%s12225_s0 + $0x91] sm:$0xff] }
   0x7   :  { %8286 = vmatpush3.msk.msra.mxu1 %vm336_vm0, %v76_v5  ;;  %8678 = vmatpush3.msk.msra.mxu0 %vm336_vm0, %v7146_v7  ;;  %v6963_v18 = vld [vmem:[%s12225_s0 + $0x99] sm:$0xff]  ;;  %v6964_v19 = vld [vmem:[%s12225_s0 + $0xa9] sm:$0xff]  ;;  %v6965_v20 = vld [vmem:[%s12225_s0 + $0xb1] sm:$0xff] }
   0x8   :  { %8192 = vmatprep.mubr.msk.f32.mxu1 %vm143_vm1, %v6952_v3  ;;  %8584 = vmatprep.mubr.msk.f32.mxu0 %vm143_vm1, %v6954_v8  ;;  %v6966_v21 = vld [vmem:[%s12225_s0 + $0xc1] sm:$0xff]  ;;  %v6967_v22 = vld [vmem:[%s12225_s0 + $0xc9] sm:$0xff]  ;;  %v6968_v23 = vld [vmem:[%s12225_s0 + $0xd9] sm:$0xff] }
   0x9   :  { %8193 = vmatmul.mubr.msk.f32.gmra.mrb[2].mxu1 %vm143_vm1, %v6953_v6  ;;  %8775 = vmatprep.subr.msk.mxu0 %vm336_vm0, %v9696_v14  ;;  %v6969_v24 = vld [vmem:[%s12225_s0 + $0xe1] sm:$0xff]  ;;  %v6970_v25 = vld [vmem:[%s12225_s0 + $0xf1] sm:$0xff]  ;;  %v6971_v27 = vld [vmem:[%s12225_s0 + $0xf9] sm:$0xff] }
   0xa   :  { %8585 = vmatmul.mubr.msk.f32.gmra.mrb[2].mxu0 %vm143_vm1, %v6955_v9  ;;  %8195 = vmatprep.mubr.msk.f32.mxu1 %vm143_vm1, %v6954_v8  ;;  %v9756_v26 = vld [vmem:[%s12226_s1 + $0x8] sm:$0xf]  ;;  %v6973_v29 = vld [vmem:[%s12225_s0 + $0x111] sm:$0xff]  ;;  %v6976_v32 = vld [vmem:[%s12225_s0 + $0x139] sm:$0xff] }
   0xb   :  { %8587 = vmatprep.mubr.msk.f32.mxu0 %vm143_vm1, %v6956_v10  ;;  %8383 = vmatprep.subr.msk.mxu1 %vm336_vm0, %v9756_v26  ;;  %v6972_v28 = vld [vmem:[%s12225_s0 + $0x109] sm:$0xff]  ;;  %v6974_v30 = vld [vmem:[%s12225_s0 + $0x121] sm:$0xff]  ;;  %v6978_v34 = vld [vmem:[%s12225_s0 + $0x151] sm:$0xff] }
   0xc   :  { %v6975_v31 = vld [vmem:[%s12225_s0 + $0x129] sm:$0xff]  ;;  %v6977_v33 = vld [vmem:[%s12225_s0 + $0x141] sm:$0xff] }
   0xd   :  { %8196 = vmatmul.mubr.msk.f32.gmra.mrb[4].mxu1 %vm143_vm1, %v6955_v9 }
   0xe   :  { %8588 = vmatmul.mubr.msk.f32.gmra.mrb[4].mxu0 %vm143_vm1, %v6957_v11  ;;  %8198 = vmatprep.mubr.msk.f32.mxu1 %vm143_vm1, %v6956_v10 }
   0xf   :  { %8590 = vmatprep.mubr.msk.f32.mxu0 %vm143_vm1, %v6958_v12 }
  0x11   :  { %8199 = vmatmul.mubr.msk.f32.gmra.mrb[6].mxu1 %vm143_vm1, %v6957_v11 }
  0x12   :  { %8591 = vmatmul.mubr.msk.f32.gmra.mrb[6].mxu0 %vm143_vm1, %v6959_v13  ;;  %8201 = vmatprep.mubr.msk.f32.mxu1 %vm143_vm1, %v6958_v12 }
  0x13   :  { %8593 = vmatprep.mubr.msk.f32.mxu0 %vm143_vm1, %v6960_v15 }
  0x15   :  { %8202 = vmatmul.mubr.msk.f32.gmra.mrb[8].mxu1 %vm143_vm1, %v6959_v13 }
  0x16   :  { %8594 = vmatmul.mubr.msk.f32.gmra.mrb[8].mxu0 %vm143_vm1, %v6961_v16  ;;  %8204 = vmatprep.mubr.msk.f32.mxu1 %vm143_vm1, %v6960_v15 }
  0x17   :  { %8596 = vmatprep.mubr.msk.f32.mxu0 %vm143_vm1, %v6962_v17 }
  0x19   :  { %8205 = vmatmul.mubr.msk.f32.gmra.mrb[10].mxu1 %vm143_vm1, %v6961_v16 }
  0x1a   :  { %8597 = vmatmul.mubr.msk.f32.gmra.mrb[10].mxu0 %vm143_vm1, %v6963_v18  ;;  %8207 = vmatprep.mubr.msk.f32.mxu1 %vm143_vm1, %v6962_v17 }
  0x1b   :  { %8599 = vmatprep.mubr.msk.f32.mxu0 %vm143_vm1, %v6964_v19 }
  0x1d   :  { %8208 = vmatmul.mubr.msk.f32.gmra.mrb[12].mxu1 %vm143_vm1, %v6963_v18 }
  0x1e   :  { %8600 = vmatmul.mubr.msk.f32.gmra.mrb[12].mxu0 %vm143_vm1, %v6965_v20  ;;  %8210 = vmatprep.mubr.msk.f32.mxu1 %vm143_vm1, %v6964_v19 }
  0x1f   :  { %8602 = vmatprep.mubr.msk.f32.mxu0 %vm143_vm1, %v6966_v21 }
  0x21   :  { %8211 = vmatmul.mubr.msk.f32.gmra.mrb[14].mxu1 %vm143_vm1, %v6965_v20 }
  0x22   :  { %8603 = vmatmul.mubr.msk.f32.gmra.mrb[14].mxu0 %vm143_vm1, %v6967_v22  ;;  %8213 = vmatprep.mubr.msk.f32.mxu1 %vm143_vm1, %v6966_v21 }
  0x23   :  { %8605 = vmatprep.mubr.msk.f32.mxu0 %vm143_vm1, %v6968_v23 }
  0x25   :  { %8214 = vmatmul.mubr.msk.f32.gmra.mrb[16].mxu1 %vm143_vm1, %v6967_v22 }
  0x26   :  { %8606 = vmatmul.mubr.msk.f32.gmra.mrb[16].mxu0 %vm143_vm1, %v6969_v24  ;;  %8216 = vmatprep.mubr.msk.f32.mxu1 %vm143_vm1, %v6968_v23 }
  0x27   :  { %8608 = vmatprep.mubr.msk.f32.mxu0 %vm143_vm1, %v6970_v25 }
  0x29   :  { %8217 = vmatmul.mubr.msk.f32.gmra.mrb[18].mxu1 %vm143_vm1, %v6969_v24 }
  0x2a   :  { %8609 = vmatmul.mubr.msk.f32.gmra.mrb[18].mxu0 %vm143_vm1, %v6971_v27  ;;  %8219 = vmatprep.mubr.msk.f32.mxu1 %vm143_vm1, %v6970_v25 }
  0x2b   :  { %8611 = vmatprep.mubr.msk.f32.mxu0 %vm143_vm1, %v6972_v28 }
  0x2d   :  { %8220 = vmatmul.mubr.msk.f32.gmra.mrb[20].mxu1 %vm143_vm1, %v6971_v27 }
  0x2e   :  { %8612 = vmatmul.mubr.msk.f32.gmra.mrb[20].mxu0 %vm143_vm1, %v6973_v29  ;;  %8222 = vmatprep.mubr.msk.f32.mxu1 %vm143_vm1, %v6972_v28 }
  0x2f   :  { %8614 = vmatprep.mubr.msk.f32.mxu0 %vm143_vm1, %v6974_v30 }
  0x31   :  { %8223 = vmatmul.mubr.msk.f32.gmra.mrb[22].mxu1 %vm143_vm1, %v6973_v29 }
  0x32   :  { %8615 = vmatmul.mubr.msk.f32.gmra.mrb[22].mxu0 %vm143_vm1, %v6975_v31  ;;  %8225 = vmatprep.mubr.msk.f32.mxu1 %vm143_vm1, %v6974_v30 }
  0x33   :  { %8617 = vmatprep.mubr.msk.f32.mxu0 %vm143_vm1, %v6976_v32 }
  0x34   :  { %7 = vsyncpa [#allocation3], 0  ;;  %v6979_v35 = vld [vmem:[%s12225_s0 + $0x159] sm:$0xff]  ;;  %v6980_v36 = vld [vmem:[%s12225_s0 + $0x169] sm:$0xff]  ;;  %vm6277_vm2 = vcmask 64512   ;;  %vm6411_vm3 = vcmask 57344  }
  0x35   :  { %8226 = vmatmul.mubr.msk.f32.gmra.mrb[24].mxu1 %vm143_vm1, %v6975_v31  ;;  %v6981_v37 = vld [vmem:[%s12225_s0 + $0x171] sm:$0xff]  ;;  %v6982_v38 = vld [vmem:[%s12225_s0 + $0x181] sm:$0xff]  ;;  %v6983_v39 = vld [vmem:[%s12225_s0 + $0x189] sm:$0xff] }
  0x36   :  { %8618 = vmatmul.mubr.msk.f32.gmra.mrb[24].mxu0 %vm143_vm1, %v6977_v33  ;;  %8228 = vmatprep.mubr.msk.f32.mxu1 %vm143_vm1, %v6976_v32  ;;  %v109_v40 = vld [vmem:[%s12225_s0 + $0x1b1] sm:$0xff]  ;;  %v9833_v41 = vld [vmem:[%s12225_s0 + $0x1a] sm:$0xff]  ;;  %v9846_v43 = vld [vmem:[%s12225_s0 + $0x22] sm:$0xff] }
  0x37   :  { %8620 = vmatprep.mubr.msk.f32.mxu0 %vm143_vm1, %v6978_v34  ;;  %v110_v42 = vld [vmem:[%s12225_s0 + $0x1b9] sm:$0xff]  ;;  %v111_v44 = vld [vmem:[%s12225_s0 + $0x1c9] sm:$0xff]  ;;  %v112_v46 = vld [vmem:[%s12225_s0 + $0x1d1] sm:$0xff] }
  0x38   :  { %v9854_v45 = vld [vmem:[%s12225_s0 + $0x32] sm:$0xff]  ;;  %v9866_v47 = vld [vmem:[%s12226_s1 + $0x1c] sm:$0xf]  ;;  %v113_v49 = vld [vmem:[%s12225_s0 + $0x1e1] sm:$0xff] }
  0x39   :  { %8229 = vmatmul.mubr.msk.f32.gmra.mrb[26].mxu1 %vm143_vm1, %v6977_v33  ;;  %v9875_v48 = vld [vmem:[%s12225_s0 + $0x3a] sm:$0xff]  ;;  %v9883_v50 = vld [vmem:[%s12225_s0 + $0x4a] sm:$0xff]  ;;  %v9899_v52 = vld [vmem:[%s12225_s0 + $0x52] sm:$0xff] }
  0x3a   :  { %8621 = vmatmul.mubr.msk.f32.gmra.mrb[26].mxu0 %vm143_vm1, %v6979_v35  ;;  %8231 = vmatprep.mubr.msk.f32.mxu1 %vm143_vm1, %v6978_v34  ;;  %v114_v51 = vld [vmem:[%s12225_s0 + $0x1e9] sm:$0xff]  ;;  %v115_v53 = vld [vmem:[%s12225_s0 + $0x1f9] sm:$0xff]  ;;  %v116_v55 = vld [vmem:[%s12225_s0 + $0x201] sm:$0xff] }
  0x3b   :  { %8623 = vmatprep.mubr.msk.f32.mxu0 %vm143_vm1, %v6980_v36  ;;  %v9907_v54 = vld [vmem:[%s12225_s0 + $0x62] sm:$0xff]  ;;  %v9921_v56 = vld [vmem:[%s12225_s0 + $0x6a] sm:$0xff]  ;;  %v9929_v58 = vld [vmem:[%s12225_s0 + $0x7a] sm:$0xff] }
  0x3c   :  { %v117_v57 = vld [vmem:[%s12225_s0 + $0x211] sm:$0xff]  ;;  %v118_v59 = vld [vmem:[%s12225_s0 + $0x219] sm:$0xff]  ;;  %v9943_v60 = vld [vmem:[%s12225_s0 + $0x82] sm:$0xff] }
  0x3d   :  { %8232 = vmatmul.mubr.msk.f32.gmra.mrb[28].mxu1 %vm143_vm1, %v6979_v35  ;;  %v119_v61 = vld [vmem:[%s12225_s0 + $0x229] sm:$0xff]  ;;  %v9951_v62 = vld [vmem:[%s12225_s0 + $0x92] sm:$0xff]  ;;  %v9965_v0 = vld [vmem:[%s12225_s0 + $0x9a] sm:$0xff] }
  0x3e   :  { %8624 = vmatmul.mubr.msk.f32.gmra.mrb[28].mxu0 %vm143_vm1, %v6981_v37  ;;  %8234 = vmatprep.mubr.msk.f32.mxu1 %vm143_vm1, %v6980_v36  ;;  %v120_v63 = vld [vmem:[%s12225_s0 + $0x231] sm:$0xff]  ;;  %v121_v2 = vld [vmem:[%s12225_s0 + $0x241] sm:$0xff]  ;;  %v122_v4 = vld [vmem:[%s12225_s0 + $0x249] sm:$0xff] }
  0x3f   :  { %8626 = vmatprep.mubr.msk.f32.mxu0 %vm143_vm1, %v6982_v38  ;;  %v9973_v3 = vld [vmem:[%s12225_s0 + $0xaa] sm:$0xff]  ;;  %v9987_v5 = vld [vmem:[%s12225_s0 + $0xb2] sm:$0xff]  ;;  %v9995_v7 = vld [vmem:[%s12225_s0 + $0xc2] sm:$0xff] }
  0x40   :  { %v123_v6 = vld [vmem:[%s12225_s0 + $0x259] sm:$0xff]  ;;  %v124_v8 = vld [vmem:[%s12225_s0 + $0x261] sm:$0xff]  ;;  %v10009_v9 = vld [vmem:[%s12225_s0 + $0xca] sm:$0xff] }
  0x41   :  { %8235 = vmatmul.mubr.msk.f32.gmra.mrb[30].mxu1 %vm143_vm1, %v6981_v37  ;;  %v125_v10 = vld [vmem:[%s12225_s0 + $0x271] sm:$0xff]  ;;  %v10017_v11 = vld [vmem:[%s12225_s0 + $0xda] sm:$0xff]  ;;  %v10031_v13 = vld [vmem:[%s12225_s0 + $0xe2] sm:$0xff] }
  0x42   :  { %8627 = vmatmul.mubr.msk.f32.gmra.mrb[30].mxu0 %vm143_vm1, %v6983_v39  ;;  %8237 = vmatprep.mubr.msk.f32.mxu1 %vm143_vm1, %v109_v40  ;;  %v126_v12 = vld [vmem:[%s12225_s0 + $0x279] sm:$0xff]  ;;  %v128_v16 = vld [vmem:[%s12225_s0 + $0x291] sm:$0xff]  ;;  %v129_v18 = vld [vmem:[%s12225_s0 + $0x2a1] sm:$0xff] }
  0x43   :  { %8679 = vmatprep.mubr.msk.f32.mxu0 %vm143_vm1, %v9833_v41  ;;  %v10039_v15 = vld [vmem:[%s12225_s0 + $0xf2] sm:$0xff]  ;;  %v10053_v17 = vld [vmem:[%s12225_s0 + $0xfa] sm:$0xff]  ;;  %v10061_v19 = vld [vmem:[%s12225_s0 + $0x10a] sm:$0xff] }
  0x44   :  { %v130_v20 = vld [vmem:[%s12225_s0 + $0x2a9] sm:$0xff]  ;;  %v10075_v21 = vld [vmem:[%s12225_s0 + $0x112] sm:$0xff]  ;;  %v132_v24 = vld [vmem:[%s12225_s0 + $0x2c1] sm:$0xff] }
  0x45   :  { %8238 = vmatmul.mubr.msk.f32.gmra.mrb[32].mxu1 %vm143_vm1, %v110_v42  ;;  %v131_v22 = vld [vmem:[%s12225_s0 + $0x2b9] sm:$0xff]  ;;  %v10083_v23 = vld [vmem:[%s12225_s0 + $0x122] sm:$0xff]  ;;  %v10097_v25 = vld [vmem:[%s12225_s0 + $0x12a] sm:$0xff] }
  0x46   :  { %8680 = vmatmul.mubr.msk.f32.vlgmr.msra.gmra.mrb[0].mxu0 %vm143_vm1, %v9846_v43  ;;  %8240 = vmatprep.mubr.msk.f32.mxu1 %vm143_vm1, %v111_v44  ;;  %v133_v27 = vld [vmem:[%s12225_s0 + $0x2d1] sm:$0xff]  ;;  %v10105_v28 = vld [vmem:[%s12225_s0 + $0x13a] sm:$0xff]  ;;  %v10119_v30 = vld [vmem:[%s12225_s0 + $0x142] sm:$0xff] }
  0x47   :  { %8776 = vmatpush3.msk.msra.mxu0 %vm336_vm0, %v9696_v14  ;;  %8682 = vmatprep.mubr.msk.f32.mxu0 %vm143_vm1, %v9854_v45  ;;  %v127_v14 = vld [vmem:[%s12225_s0 + $0x289] sm:$0xff]  ;;  %v134_v29 = vld [vmem:[%s12225_s0 + $0x2d9] sm:$0xff]  ;;  %v136_v33 = vld [vmem:[%s12225_s0 + $0x2f1] sm:$0xff] }
  0x48   :  { %8873 = vmatprep.subr.msk.mxu0 %vm336_vm0, %v9866_v47  ;;  %v135_v31 = vld [vmem:[%s12225_s0 + $0x2e9] sm:$0xff]  ;;  %v10127_v32 = vld [vmem:[%s12225_s0 + $0x152] sm:$0xff]  ;;  %v10141_v34 = vld [vmem:[%s12225_s0 + $0x15a] sm:$0xff] }
  0x49   :  { %8241 = vmatmul.mubr.msk.f32.gmra.mrb[34].mxu1 %vm143_vm1, %v112_v46  ;;  %v137_v35 = vld [vmem:[%s12225_s0 + $0x301] sm:$0xff]  ;;  %v10149_v36 = vld [vmem:[%s12225_s0 + $0x16a] sm:$0xff]  ;;  %v10163_v38 = vld [vmem:[%s12225_s0 + $0x172] sm:$0xff] }
  0x4a   :  { %8683 = vmatmul.mubr.msk.f32.gmra.mrb[2].mxu0 %vm143_vm1, %v9875_v48  ;;  %8243 = vmatprep.mubr.msk.f32.mxu1 %vm143_vm1, %v113_v49  ;;  %v138_v37 = vld [vmem:[%s12225_s0 + $0x309] sm:$0xff]  ;;  %12266 = vst [vmem:[#allocation5_spill] sm:$0xff] %v10163_v38  ;;  %v139_v39 = vld [vmem:[%s12225_s0 + $0x319] sm:$0xff]  ;;  %v140_v42 = vld [vmem:[%s12225_s0 + $0x321] sm:$0xff] }
  0x4b   :  { %8685 = vmatprep.mubr.msk.f32.mxu0 %vm143_vm1, %v9883_v50  ;;  %v7112_v40 = vld [vmem:[%s12225_s0 + $0x182] sm:$0xff]  ;;  %v7113_v44 = vld [vmem:[%s12225_s0 + $0x18a] sm:$0xff] }
  0x4c   :  { %v12_v46 = vld [vmem:[%s12225_s0] sm:$0xff]  ;;  %v10188_v49 = vld [vmem:[%s12225_s0 + $0x1ca] sm:$0xff] }
  0x4d   :  { %8244 = vmatmul.mubr.msk.f32.gmra.mrb[36].mxu1 %vm143_vm1, %v114_v51  ;;  %12267 = vst [vmem:[#allocation6_spill] sm:$0xff] %v10188_v49  ;;  %v13_v51 = vld [vmem:[%s12225_s0 + $0x8] sm:$0xff] }
  0x4e   :  { %8686 = vmatmul.mubr.msk.f32.gmra.mrb[4].mxu0 %vm143_vm1, %v9899_v52  ;;  %8246 = vmatprep.mubr.msk.f32.mxu1 %vm143_vm1, %v115_v53  ;;  %v10201_v53 = vld [vmem:[%s12225_s0 + $0x1d2] sm:$0xff] }
  0x4f   :  { %8688 = vmatprep.mubr.msk.f32.mxu0 %vm143_vm1, %v9907_v54  ;;  %12268 = vst [vmem:[#allocation7_spill] sm:$0xff] %v10201_v53 }
  0x51   :  { %8247 = vmatmul.mubr.msk.f32.gmra.mrb[38].mxu1 %vm143_vm1, %v116_v55  ;;  %v14_v55 = vld [vmem:[%s12225_s0 + $0x18] sm:$0xff] }
  0x52   :  { %8689 = vmatmul.mubr.msk.f32.gmra.mrb[6].mxu0 %vm143_vm1, %v9921_v56  ;;  %8249 = vmatprep.mubr.msk.f32.mxu1 %vm143_vm1, %v117_v57  ;;  %v10209_v57 = vld [vmem:[%s12225_s0 + $0x1e2] sm:$0xff] }
  0x53   :  { %8691 = vmatprep.mubr.msk.f32.mxu0 %vm143_vm1, %v9929_v58  ;;  %12269 = vst [vmem:[#allocation8_spill] sm:$0xff] %v10209_v57 }
  0x55   :  { %8250 = vmatmul.mubr.msk.f32.gmra.mrb[40].mxu1 %vm143_vm1, %v118_v59  ;;  %v10215_v59 = vld [vmem:[%s12226_s1 + $0xc] sm:$0xf] }
  0x56   :  { %8692 = vmatmul.mubr.msk.f32.gmra.mrb[8].mxu0 %vm143_vm1, %v9943_v60  ;;  %8252 = vmatprep.mubr.msk.f32.mxu1 %vm143_vm1, %v119_v61  ;;  %v15_v61 = vld [vmem:[%s12225_s0 + $0x20] sm:$0xff] }
  0x57   :  { %8694 = vmatprep.mubr.msk.f32.mxu0 %vm143_vm1, %v9951_v62 }
  0x59   :  { %8253 = vmatmul.mubr.msk.f32.gmra.mrb[42].mxu1 %vm143_vm1, %v120_v63  ;;  %v10230_v63 = vld [vmem:[%s12225_s0 + $0x1ea] sm:$0xff] }
  0x5a   :  { %8695 = vmatmul.mubr.msk.f32.gmra.mrb[10].mxu0 %vm143_vm1, %v9965_v0  ;;  %8255 = vmatprep.mubr.msk.f32.mxu1 %vm143_vm1, %v121_v2  ;;  %12270 = vst [vmem:[#allocation9_spill] sm:$0xff] %v10230_v63  ;;  %v10235_v2 = vld [vmem:[%s12225_s0 + $0x30] sm:$0xff] }
  0x5b   :  { %8697 = vmatprep.mubr.msk.f32.mxu0 %vm143_vm1, %v9973_v3 }
  0x5d   :  { %8256 = vmatmul.mubr.msk.f32.gmra.mrb[44].mxu1 %vm143_vm1, %v122_v4  ;;  %v10252_v4 = vld [vmem:[%s12225_s0 + $0x38] sm:$0xff] }
  0x5e   :  { %8698 = vmatmul.mubr.msk.f32.gmra.mrb[12].mxu0 %vm143_vm1, %v9987_v5  ;;  %8258 = vmatprep.mubr.msk.f32.mxu1 %vm143_vm1, %v123_v6  ;;  %v10259_v6 = vld [vmem:[%s12225_s0 + $0x202] sm:$0xff] }
  0x5f   :  { %8700 = vmatprep.mubr.msk.f32.mxu0 %vm143_vm1, %v9995_v7  ;;  %12272 = vst [vmem:[#allocation11_spill] sm:$0xff] %v10259_v6 }
  0x61   :  { %8259 = vmatmul.mubr.msk.f32.gmra.mrb[46].mxu1 %vm143_vm1, %v124_v8  ;;  %v10264_v8 = vld [vmem:[%s12225_s0 + $0x48] sm:$0xff] }
  0x62   :  { %8701 = vmatmul.mubr.msk.f32.gmra.mrb[14].mxu0 %vm143_vm1, %v10009_v9  ;;  %8261 = vmatprep.mubr.msk.f32.mxu1 %vm143_vm1, %v125_v10  ;;  %v10269_v10 = vld [vmem:[%s12225_s0 + $0x212] sm:$0xff] }
  0x63   :  { %8703 = vmatprep.mubr.msk.f32.mxu0 %vm143_vm1, %v10017_v11  ;;  %12273 = vst [vmem:[#allocation12_spill] sm:$0xff] %v10269_v10 }
  0x65   :  { %8262 = vmatmul.mubr.msk.f32.gmra.mrb[48].mxu1 %vm143_vm1, %v126_v12  ;;  %v10280_v12 = vld [vmem:[%s12225_s0 + $0x50] sm:$0xff] }
  0x66   :  { %8704 = vmatmul.mubr.msk.f32.gmra.mrb[16].mxu0 %vm143_vm1, %v10031_v13  ;;  %8264 = vmatprep.mubr.msk.f32.mxu1 %vm143_vm1, %v127_v14  ;;  %v10287_v14 = vld [vmem:[%s12225_s0 + $0x21a] sm:$0xff] }
  0x67   :  { %8706 = vmatprep.mubr.msk.f32.mxu0 %vm143_vm1, %v10039_v15  ;;  %12274 = vst [vmem:[#allocation13_spill] sm:$0xff] %v10287_v14 }
  0x69   :  { %8265 = vmatmul.mubr.msk.f32.gmra.mrb[50].mxu1 %vm143_vm1, %v128_v16  ;;  %v10292_v16 = vld [vmem:[%s12225_s0 + $0x60] sm:$0xff] }
  0x6a   :  { %8707 = vmatmul.mubr.msk.f32.gmra.mrb[18].mxu0 %vm143_vm1, %v10053_v17  ;;  %8267 = vmatprep.mubr.msk.f32.mxu1 %vm143_vm1, %v129_v18  ;;  %v10297_v18 = vld [vmem:[%s12225_s0 + $0x22a] sm:$0xff] }
  0x6b   :  { %8709 = vmatprep.mubr.msk.f32.mxu0 %vm143_vm1, %v10061_v19  ;;  %12275 = vst [vmem:[#allocation14_spill] sm:$0xff] %v10297_v18 }
  0x6d   :  { %8268 = vmatmul.mubr.msk.f32.gmra.mrb[52].mxu1 %vm143_vm1, %v130_v20  ;;  %v10308_v20 = vld [vmem:[%s12225_s0 + $0x68] sm:$0xff] }
  0x6e   :  { %8710 = vmatmul.mubr.msk.f32.gmra.mrb[20].mxu0 %vm143_vm1, %v10075_v21  ;;  %8270 = vmatprep.mubr.msk.f32.mxu1 %vm143_vm1, %v131_v22  ;;  %v10315_v22 = vld [vmem:[%s12225_s0 + $0x232] sm:$0xff] }
  0x6f   :  { %8712 = vmatprep.mubr.msk.f32.mxu0 %vm143_vm1, %v10083_v23  ;;  %12276 = vst [vmem:[#allocation15_spill] sm:$0xff] %v10315_v22 }
  0x71   :  { %8271 = vmatmul.mubr.msk.f32.gmra.mrb[54].mxu1 %vm143_vm1, %v132_v24  ;;  %v10320_v24 = vld [vmem:[%s12225_s0 + $0x78] sm:$0xff] }
  0x72   :  { %8713 = vmatmul.mubr.msk.f32.gmra.mrb[22].mxu0 %vm143_vm1, %v10097_v25  ;;  %8273 = vmatprep.mubr.msk.f32.mxu1 %vm143_vm1, %v133_v27  ;;  %v10325_v27 = vld [vmem:[%s12225_s0 + $0x242] sm:$0xff] }
  0x73   :  { %8715 = vmatprep.mubr.msk.f32.mxu0 %vm143_vm1, %v10105_v28  ;;  %12277 = vst [vmem:[#allocation16_spill] sm:$0xff] %v10325_v27 }
  0x75   :  { %8274 = vmatmul.mubr.msk.f32.gmra.mrb[56].mxu1 %vm143_vm1, %v134_v29  ;;  %v10336_v29 = vld [vmem:[%s12225_s0 + $0x80] sm:$0xff] }
  0x76   :  { %8716 = vmatmul.mubr.msk.f32.gmra.mrb[24].mxu0 %vm143_vm1, %v10119_v30  ;;  %8276 = vmatprep.mubr.msk.f32.mxu1 %vm143_vm1, %v135_v31  ;;  %v10343_v31 = vld [vmem:[%s12225_s0 + $0x24a] sm:$0xff] }
  0x77   :  { %8718 = vmatprep.mubr.msk.f32.mxu0 %vm143_vm1, %v10127_v32  ;;  %12278 = vst [vmem:[#allocation17_spill] sm:$0xff] %v10343_v31 }
  0x79   :  { %8277 = vmatmul.mubr.msk.f32.gmra.mrb[58].mxu1 %vm143_vm1, %v136_v33  ;;  %v10348_v33 = vld [vmem:[%s12225_s0 + $0x90] sm:$0xff] }
  0x7a   :  { %8719 = vmatmul.mubr.msk.f32.gmra.mrb[26].mxu0 %vm143_vm1, %v10141_v34  ;;  %8279 = vmatprep.mubr.msk.f32.mxu1 %vm143_vm1, %v137_v35  ;;  %v10353_v35 = vld [vmem:[%s12225_s0 + $0x25a] sm:$0xff] }
  0x7b   :  { %8721 = vmatprep.mubr.msk.f32.mxu0 %vm143_vm1, %v10149_v36  ;;  %12279 = vst [vmem:[#allocation18_spill] sm:$0xff] %v10353_v35 }
  0x7d   :  { %8280 = vmatmul.mubr.msk.f32.gmra.mrb[60].mxu1 %vm143_vm1, %v138_v37  ;;  %v10364_v37 = vld [vmem:[%s12225_s0 + $0x98] sm:$0xff] }
  0x7e   :  { %8722 = vmatmul.mubr.msk.f32.gmra.mrb[28].mxu0 %vm143_vm1, %v10163_v38  ;;  %8282 = vmatprep.mubr.msk.f32.mxu1 %vm143_vm1, %v139_v39  ;;  %v10371_v39 = vld [vmem:[%s12225_s0 + $0x262] sm:$0xff]  ;;  %v44_v38 = vld [vmem:[%s12225_s0 + $0x1b0] sm:$0xff] }
  0x7f   :  { %8724 = vmatprep.mubr.msk.f32.mxu0 %vm143_vm1, %v7112_v40  ;;  %12280 = vst [vmem:[#allocation19_spill] sm:$0xff] %v10371_v39  ;;  %v10376_v40 = vld [vmem:[%s12225_s0 + $0xa8] sm:$0xff] }
  0x81   :  { %8283 = vmatmul.mubr.msk.f32.gmra.mrb[62].mxu1 %vm143_vm1, %v140_v42  ;;  %v10381_v42 = vld [vmem:[%s12225_s0 + $0x272] sm:$0xff] }
  0x82   :  { %8725 = vmatmul.mubr.msk.f32.gmra.mrb[30].mxu0 %vm143_vm1, %v7113_v44  ;;  %8287 = vmatprep.mubr.msk.f32.mxu1 %vm143_vm1, %v12_v46  ;;  %12281 = vst [vmem:[#allocation20_spill] sm:$0xff] %v10381_v42  ;;  %v10392_v44 = vld [vmem:[%s12225_s0 + $0xb0] sm:$0xff]  ;;  %v10399_v46 = vld [vmem:[%s12225_s0 + $0x27a] sm:$0xff] }
  0x83   :  { %8727 = vmatprep.mubr.msk.f32.mxu0 %vm143_vm1, %v10188_v49  ;;  %12282 = vst [vmem:[#allocation21_spill] sm:$0xff] %v10399_v46  ;;  %v7145_v49 = vld [vmem:[%s12225_s0 + $0x33a] sm:$0xff] }
  0x85   :  { %8288 = vmatmul.mubr.msk.f32.vlgmr.msra.gmra.mrb[0].mxu1 %vm143_vm1, %v13_v51  ;;  %v10404_v51 = vld [vmem:[%s12225_s0 + $0xc0] sm:$0xff] }
  0x86   :  { %8728 = vmatmul.mubr.msk.f32.gmra.mrb[32].mxu0 %vm143_vm1, %v10201_v53  ;;  %8384 = vmatpush3.msk.msra.mxu1 %vm336_vm0, %v9756_v26  ;;  %v10240_v26 = vld [vmem:[%s12225_s0 + $0x1fa] sm:$0xff]  ;;  %v7144_v53 = vld [vmem:[%s12225_s0 + $0x332] sm:$0xff] }
  0x87   :  { %8290 = vmatprep.mubr.msk.f32.mxu1 %vm143_vm1, %v14_v55  ;;  %8730 = vmatprep.mubr.msk.f32.mxu0 %vm143_vm1, %v10209_v57  ;;  %12271 = vst [vmem:[#allocation10_spill] sm:$0xff] %v10240_v26  ;;  %v10409_v55 = vld [vmem:[%s12225_s0 + $0x28a] sm:$0xff]  ;;  %v10595_v57 = vld [vmem:[%s12225_s0 + $0x322] sm:$0xff] }
  0x88   :  { %8481 = vmatprep.subr.msk.mxu1 %vm336_vm0, %v10215_v59  ;;  %12283 = vst [vmem:[#allocation22_spill] sm:$0xff] %v10409_v55  ;;  %12296 = vst [vmem:[#allocation35_spill] sm:$0xff] %v10595_v57 }
  0x89   :  { %8291 = vmatmul.mubr.msk.f32.gmra.mrb[2].mxu1 %vm143_vm1, %v15_v61  ;;  %v10420_v61 = vld [vmem:[%s12225_s0 + $0xc8] sm:$0xff] }
  0x8a   :  { %8731 = vmatmul.mubr.msk.f32.gmra.mrb[34].mxu0 %vm143_vm1, %v10230_v63  ;;  %8293 = vmatprep.mubr.msk.f32.mxu1 %vm143_vm1, %v10235_v2  ;;  %v10577_v63 = vld [vmem:[%s12225_s0 + $0x31a] sm:$0xff] }
  0x8b   :  { %8733 = vmatprep.mubr.msk.f32.mxu0 %vm143_vm1, %v10240_v26  ;;  %v10567_v26 = vld [vmem:[%s12225_s0 + $0x30a] sm:$0xff]  ;;  %12295 = vst [vmem:[#allocation34_spill] sm:$0xff] %v10577_v63 }
  0x8c   :  { %12294 = vst [vmem:[#allocation33_spill] sm:$0xff] %v10567_v26 }
  0x8d   :  { %8294 = vmatmul.mubr.msk.f32.gmra.mrb[4].mxu1 %vm143_vm1, %v10252_v4 }
  0x8e   :  { %8734 = vmatmul.mubr.msk.f32.gmra.mrb[36].mxu0 %vm143_vm1, %v10259_v6  ;;  %8296 = vmatprep.mubr.msk.f32.mxu1 %vm143_vm1, %v10264_v8  ;;  %v10549_v6 = vld [vmem:[%s12225_s0 + $0x302] sm:$0xff] }
  0x8f   :  { %8736 = vmatprep.mubr.msk.f32.mxu0 %vm143_vm1, %v10269_v10  ;;  %v10539_v10 = vld [vmem:[%s12225_s0 + $0x2f2] sm:$0xff]  ;;  %12293 = vst [vmem:[#allocation32_spill] sm:$0xff] %v10549_v6 }
  0x90   :  { %12292 = vst [vmem:[#allocation31_spill] sm:$0xff] %v10539_v10 }
  0x91   :  { %8297 = vmatmul.mubr.msk.f32.gmra.mrb[6].mxu1 %vm143_vm1, %v10280_v12 }
  0x92   :  { %8737 = vmatmul.mubr.msk.f32.gmra.mrb[38].mxu0 %vm143_vm1, %v10287_v14  ;;  %8299 = vmatprep.mubr.msk.f32.mxu1 %vm143_vm1, %v10292_v16  ;;  %v10521_v14 = vld [vmem:[%s12225_s0 + $0x2ea] sm:$0xff] }
  0x93   :  { %8739 = vmatprep.mubr.msk.f32.mxu0 %vm143_vm1, %v10297_v18  ;;  %v10511_v18 = vld [vmem:[%s12225_s0 + $0x2da] sm:$0xff]  ;;  %12291 = vst [vmem:[#allocation30_spill] sm:$0xff] %v10521_v14 }
  0x94   :  { %12290 = vst [vmem:[#allocation29_spill] sm:$0xff] %v10511_v18 }
  0x95   :  { %8300 = vmatmul.mubr.msk.f32.gmra.mrb[8].mxu1 %vm143_vm1, %v10308_v20 }
  0x96   :  { %8740 = vmatmul.mubr.msk.f32.gmra.mrb[40].mxu0 %vm143_vm1, %v10315_v22  ;;  %8302 = vmatprep.mubr.msk.f32.mxu1 %vm143_vm1, %v10320_v24  ;;  %v10493_v22 = vld [vmem:[%s12225_s0 + $0x2d2] sm:$0xff] }
  0x97   :  { %8742 = vmatprep.mubr.msk.f32.mxu0 %vm143_vm1, %v10325_v27  ;;  %v10483_v27 = vld [vmem:[%s12225_s0 + $0x2c2] sm:$0xff]  ;;  %12289 = vst [vmem:[#allocation28_spill] sm:$0xff] %v10493_v22 }
  0x98   :  { %12288 = vst [vmem:[#allocation27_spill] sm:$0xff] %v10483_v27 }
  0x99   :  { %8303 = vmatmul.mubr.msk.f32.gmra.mrb[10].mxu1 %vm143_vm1, %v10336_v29 }
  0x9a   :  { %8743 = vmatmul.mubr.msk.f32.gmra.mrb[42].mxu0 %vm143_vm1, %v10343_v31  ;;  %8305 = vmatprep.mubr.msk.f32.mxu1 %vm143_vm1, %v10348_v33  ;;  %v10465_v31 = vld [vmem:[%s12225_s0 + $0x2ba] sm:$0xff] }
  0x9b   :  { %8745 = vmatprep.mubr.msk.f32.mxu0 %vm143_vm1, %v10353_v35  ;;  %v10455_v35 = vld [vmem:[%s12225_s0 + $0x2aa] sm:$0xff]  ;;  %12287 = vst [vmem:[#allocation26_spill] sm:$0xff] %v10465_v31 }
  0x9c   :  { %12286 = vst [vmem:[#allocation25_spill] sm:$0xff] %v10455_v35 }
  0x9d   :  { %8306 = vmatmul.mubr.msk.f32.gmra.mrb[12].mxu1 %vm143_vm1, %v10364_v37 }
  0x9e   :  { %8746 = vmatmul.mubr.msk.f32.gmra.mrb[44].mxu0 %vm143_vm1, %v10371_v39  ;;  %8308 = vmatprep.mubr.msk.f32.mxu1 %vm143_vm1, %v10376_v40  ;;  %v10437_v39 = vld [vmem:[%s12225_s0 + $0x2a2] sm:$0xff] }
  0x9f   :  { %8748 = vmatprep.mubr.msk.f32.mxu0 %vm143_vm1, %v10381_v42  ;;  %v10427_v42 = vld [vmem:[%s12225_s0 + $0x292] sm:$0xff]  ;;  %12285 = vst [vmem:[#allocation24_spill] sm:$0xff] %v10437_v39 }
  0xa0   :  { %12284 = vst [vmem:[#allocation23_spill] sm:$0xff] %v10427_v42 }
  0xa1   :  { %8309 = vmatmul.mubr.msk.f32.gmra.mrb[14].mxu1 %vm143_vm1, %v10392_v44 }
  0xa2   :  { %8749 = vmatmul.mubr.msk.f32.gmra.mrb[46].mxu0 %vm143_vm1, %v10399_v46  ;;  %8311 = vmatprep.mubr.msk.f32.mxu1 %vm143_vm1, %v10404_v51  ;;  %v10432_v46 = vld [vmem:[%s12225_s0 + $0xd8] sm:$0xff] }
  0xa3   :  { %8751 = vmatprep.mubr.msk.f32.mxu0 %vm143_vm1, %v10409_v55  ;;  %v10448_v55 = vld [vmem:[%s12225_s0 + $0xe0] sm:$0xff] }
  0xa5   :  { %8312 = vmatmul.mubr.msk.f32.gmra.mrb[16].mxu1 %vm143_vm1, %v10420_v61 }
  0xa6   :  { %8752 = vmatmul.mubr.msk.f32.gmra.mrb[48].mxu0 %vm143_vm1, %v10427_v42  ;;  %8314 = vmatprep.mubr.msk.f32.mxu1 %vm143_vm1, %v10432_v46  ;;  %v10460_v42 = vld [vmem:[%s12225_s0 + $0xf0] sm:$0xff] }
  0xa7   :  { %8754 = vmatprep.mubr.msk.f32.mxu0 %vm143_vm1, %v10437_v39  ;;  %v10476_v39 = vld [vmem:[%s12225_s0 + $0xf8] sm:$0xff] }
  0xa9   :  { %8315 = vmatmul.mubr.msk.f32.gmra.mrb[18].mxu1 %vm143_vm1, %v10448_v55 }
  0xaa   :  { %8755 = vmatmul.mubr.msk.f32.gmra.mrb[50].mxu0 %vm143_vm1, %v10455_v35  ;;  %8317 = vmatprep.mubr.msk.f32.mxu1 %vm143_vm1, %v10460_v42  ;;  %v10488_v35 = vld [vmem:[%s12225_s0 + $0x108] sm:$0xff] }
  0xab   :  { %8757 = vmatprep.mubr.msk.f32.mxu0 %vm143_vm1, %v10465_v31  ;;  %v10504_v31 = vld [vmem:[%s12225_s0 + $0x110] sm:$0xff] }
  0xad   :  { %8318 = vmatmul.mubr.msk.f32.gmra.mrb[20].mxu1 %vm143_vm1, %v10476_v39 }
  0xae   :  { %8758 = vmatmul.mubr.msk.f32.gmra.mrb[52].mxu0 %vm143_vm1, %v10483_v27  ;;  %8320 = vmatprep.mubr.msk.f32.mxu1 %vm143_vm1, %v10488_v35  ;;  %v10516_v27 = vld [vmem:[%s12225_s0 + $0x120] sm:$0xff] }
  0xaf   :  { %8760 = vmatprep.mubr.msk.f32.mxu0 %vm143_vm1, %v10493_v22  ;;  %v10532_v22 = vld [vmem:[%s12225_s0 + $0x128] sm:$0xff] }
  0xb1   :  { %8321 = vmatmul.mubr.msk.f32.gmra.mrb[22].mxu1 %vm143_vm1, %v10504_v31 }
  0xb2   :  { %8761 = vmatmul.mubr.msk.f32.gmra.mrb[54].mxu0 %vm143_vm1, %v10511_v18  ;;  %8323 = vmatprep.mubr.msk.f32.mxu1 %vm143_vm1, %v10516_v27  ;;  %v10544_v18 = vld [vmem:[%s12225_s0 + $0x138] sm:$0xff] }
  0xb3   :  { %8763 = vmatprep.mubr.msk.f32.mxu0 %vm143_vm1, %v10521_v14  ;;  %v10560_v14 = vld [vmem:[%s12225_s0 + $0x140] sm:$0xff] }
  0xb5   :  { %8324 = vmatmul.mubr.msk.f32.gmra.mrb[24].mxu1 %vm143_vm1, %v10532_v22 }
  0xb6   :  { %8764 = vmatmul.mubr.msk.f32.gmra.mrb[56].mxu0 %vm143_vm1, %v10539_v10  ;;  %8326 = vmatprep.mubr.msk.f32.mxu1 %vm143_vm1, %v10544_v18  ;;  %v10572_v10 = vld [vmem:[%s12225_s0 + $0x150] sm:$0xff] }
  0xb7   :  { %8766 = vmatprep.mubr.msk.f32.mxu0 %vm143_vm1, %v10549_v6  ;;  %v10588_v6 = vld [vmem:[%s12225_s0 + $0x158] sm:$0xff] }
  0xb9   :  { %8327 = vmatmul.mubr.msk.f32.gmra.mrb[26].mxu1 %vm143_vm1, %v10560_v14 }
  0xba   :  { %8767 = vmatmul.mubr.msk.f32.gmra.mrb[58].mxu0 %vm143_vm1, %v10567_v26  ;;  %8329 = vmatprep.mubr.msk.f32.mxu1 %vm143_vm1, %v10572_v10  ;;  %v10600_v26 = vld [vmem:[%s12225_s0 + $0x168] sm:$0xff] }
  0xbb   :  { %8769 = vmatprep.mubr.msk.f32.mxu0 %vm143_vm1, %v10577_v63  ;;  %v10614_v63 = vld [vmem:[%s12225_s0 + $0x170] sm:$0xff] }
  0xbd   :  { %8330 = vmatmul.mubr.msk.f32.gmra.mrb[28].mxu1 %vm143_vm1, %v10588_v6 }
  0xbe   :  { %8770 = vmatmul.mubr.msk.f32.gmra.mrb[60].mxu0 %vm143_vm1, %v10595_v57  ;;  %8332 = vmatprep.mubr.msk.f32.mxu1 %vm143_vm1, %v10600_v26  ;;  %v45_v57 = vld [vmem:[%s12225_s0 + $0x1b8] sm:$0xff] }
  0xbf   :  { %8772 = vmatprep.mubr.msk.f32.mxu0 %vm143_vm1, %v7144_v53  ;;  %v10635_v53 = vld [vmem:[%s12225_s0 + $0x1c8] sm:$0xff] }
  0xc0   :  { %12297 = vst [vmem:[#allocation36_spill] sm:$0xff] %v10635_v53 }
  0xc1   :  { %8333 = vmatmul.mubr.msk.f32.gmra.mrb[30].mxu1 %vm143_vm1, %v10614_v63 }
  0xc2   :  { %8773 = vmatmul.mubr.msk.f32.gmra.mrb[62].mxu0 %vm143_vm1, %v7145_v49  ;;  %8335 = vmatprep.mubr.msk.f32.mxu1 %vm143_vm1, %v44_v38  ;;  %v10645_v38 = vld [vmem:[%s12225_s0 + $0x1d0] sm:$0xff]  ;;  %v10650_v49 = vld [vmem:[%s12226_s1 + $0x20] sm:$0xf] }
  0xc3   :  { %8777 = vmatprep.mubr.msk.f32.mxu0 %vm143_vm1, %v10235_v2  ;;  %12298 = vst [vmem:[#allocation37_spill] sm:$0xff] %v10645_v38  ;;  %v10679_v2 = vld [vmem:[%s12225_s0 + $0x1f8] sm:$0xff] }
  0xc5   :  { %8336 = vmatmul.mubr.msk.f32.gmra.mrb[32].mxu1 %vm143_vm1, %v45_v57  ;;  %v10659_v57 = vld [vmem:[%s12225_s0 + $0x1e0] sm:$0xff] }
  0xc6   :  { %8778 = vmatmul.mubr.msk.f32.vlgmr.msra.gmra.mrb[0].mxu0 %vm143_vm1, %v10252_v4  ;;  %8338 = vmatprep.mubr.msk.f32.mxu1 %vm143_vm1, %v10635_v53  ;;  %v10690_v4 = vld [vmem:[%s12225_s0 + $0x200] sm:$0xff] }
  0xc7   :  { %8874 = vmatpush3.msk.msra.mxu0 %vm336_vm0, %v9866_v47  ;;  %8780 = vmatprep.mubr.msk.f32.mxu0 %vm143_vm1, %v10264_v8  ;;  %v10672_v47 = vld [vmem:[%s12225_s0 + $0x1e8] sm:$0xff]  ;;  %v10697_v8 = vld [vmem:[%s12225_s0 + $0x210] sm:$0xff]  ;;  %v7243_v53 = vld [vmem:[%s12225_s0 + $0x1a0] sm:$0xff] }
  0xc8   :  { %8971 = vmatprep.subr.msk.mxu0 %vm336_vm0, %v10650_v49 }
  0xc9   :  { %8339 = vmatmul.mubr.msk.f32.gmra.mrb[34].mxu1 %vm143_vm1, %v10645_v38  ;;  %v10919_v38 = vld [vmem:[%s12225_s0 + $0x320] sm:$0xff] }
  0xca   :  { %8781 = vmatmul.mubr.msk.f32.gmra.mrb[2].mxu0 %vm143_vm1, %v10280_v12  ;;  %8341 = vmatprep.mubr.msk.f32.mxu1 %vm143_vm1, %v10659_v57  ;;  %v10708_v12 = vld [vmem:[%s12225_s0 + $0x218] sm:$0xff] }
  0xcb   :  { %8783 = vmatprep.mubr.msk.f32.mxu0 %vm143_vm1, %v10292_v16  ;;  %v10715_v16 = vld [vmem:[%s12225_s0 + $0x228] sm:$0xff] }
  0xcd   :  { %8342 = vmatmul.mubr.msk.f32.gmra.mrb[36].mxu1 %vm143_vm1, %v10672_v47 }
  0xce   :  { %8784 = vmatmul.mubr.msk.f32.gmra.mrb[4].mxu0 %vm143_vm1, %v10308_v20  ;;  %8344 = vmatprep.mubr.msk.f32.mxu1 %vm143_vm1, %v10679_v2  ;;  %v10726_v20 = vld [vmem:[%s12225_s0 + $0x230] sm:$0xff] }
  0xcf   :  { %8786 = vmatprep.mubr.msk.f32.mxu0 %vm143_vm1, %v10320_v24  ;;  %v10733_v24 = vld [vmem:[%s12225_s0 + $0x240] sm:$0xff] }
  0xd1   :  { %8345 = vmatmul.mubr.msk.f32.gmra.mrb[38].mxu1 %vm143_vm1, %v10690_v4 }
  0xd2   :  { %8787 = vmatmul.mubr.msk.f32.gmra.mrb[6].mxu0 %vm143_vm1, %v10336_v29  ;;  %8347 = vmatprep.mubr.msk.f32.mxu1 %vm143_vm1, %v10697_v8  ;;  %v10744_v29 = vld [vmem:[%s12225_s0 + $0x248] sm:$0xff] }
  0xd3   :  { %8789 = vmatprep.mubr.msk.f32.mxu0 %vm143_vm1, %v10348_v33  ;;  %v10751_v33 = vld [vmem:[%s12225_s0 + $0x258] sm:$0xff] }
  0xd5   :  { %8348 = vmatmul.mubr.msk.f32.gmra.mrb[40].mxu1 %vm143_vm1, %v10708_v12 }
  0xd6   :  { %8790 = vmatmul.mubr.msk.f32.gmra.mrb[8].mxu0 %vm143_vm1, %v10364_v37  ;;  %8350 = vmatprep.mubr.msk.f32.mxu1 %vm143_vm1, %v10715_v16  ;;  %v10762_v37 = vld [vmem:[%s12225_s0 + $0x260] sm:$0xff] }
  0xd7   :  { %8792 = vmatprep.mubr.msk.f32.mxu0 %vm143_vm1, %v10376_v40  ;;  %v10769_v40 = vld [vmem:[%s12225_s0 + $0x270] sm:$0xff] }
  0xd9   :  { %8351 = vmatmul.mubr.msk.f32.gmra.mrb[42].mxu1 %vm143_vm1, %v10726_v20 }
  0xda   :  { %8793 = vmatmul.mubr.msk.f32.gmra.mrb[10].mxu0 %vm143_vm1, %v10392_v44  ;;  %8353 = vmatprep.mubr.msk.f32.mxu1 %vm143_vm1, %v10733_v24  ;;  %v10780_v44 = vld [vmem:[%s12225_s0 + $0x278] sm:$0xff] }
  0xdb   :  { %8795 = vmatprep.mubr.msk.f32.mxu0 %vm143_vm1, %v10404_v51  ;;  %v10798_v51 = vld [vmem:[%s12225_s0 + $0x290] sm:$0xff] }
  0xdd   :  { %8354 = vmatmul.mubr.msk.f32.gmra.mrb[44].mxu1 %vm143_vm1, %v10744_v29 }
  0xde   :  { %8796 = vmatmul.mubr.msk.f32.gmra.mrb[12].mxu0 %vm143_vm1, %v10420_v61  ;;  %8356 = vmatprep.mubr.msk.f32.mxu1 %vm143_vm1, %v10751_v33  ;;  %v7242_v61 = vld [vmem:[%s12225_s0 + $0x198] sm:$0xff] }
  0xdf   :  { %8798 = vmatprep.mubr.msk.f32.mxu0 %vm143_vm1, %v10432_v46  ;;  %v10787_v46 = vld [vmem:[%s12225_s0 + $0x288] sm:$0xff] }
  0xe1   :  { %8357 = vmatmul.mubr.msk.f32.gmra.mrb[46].mxu1 %vm143_vm1, %v10762_v37 }
  0xe2   :  { %8799 = vmatmul.mubr.msk.f32.gmra.mrb[14].mxu0 %vm143_vm1, %v10448_v55  ;;  %8359 = vmatprep.mubr.msk.f32.mxu1 %vm143_vm1, %v10769_v40  ;;  %v10900_v55 = vld [vmem:[%s12225_s0 + $0x188] sm:$0xff] }
  0xe3   :  { %8801 = vmatprep.mubr.msk.f32.mxu0 %vm143_vm1, %v10460_v42  ;;  %v10805_v42 = vld [vmem:[%s12225_s0 + $0x2a0] sm:$0xff]  ;;  %12300 = vst [vmem:[#allocation39_spill] sm:$0xff] %v10900_v55 }
  0xe5   :  { %8360 = vmatmul.mubr.msk.f32.gmra.mrb[48].mxu1 %vm143_vm1, %v10780_v44 }
  0xe6   :  { %8802 = vmatmul.mubr.msk.f32.gmra.mrb[16].mxu0 %vm143_vm1, %v10476_v39  ;;  %8362 = vmatprep.mubr.msk.f32.mxu1 %vm143_vm1, %v10787_v46  ;;  %v10816_v39 = vld [vmem:[%s12225_s0 + $0x2a8] sm:$0xff] }
  0xe7   :  { %8804 = vmatprep.mubr.msk.f32.mxu0 %vm143_vm1, %v10488_v35  ;;  %v10823_v35 = vld [vmem:[%s12225_s0 + $0x2b8] sm:$0xff] }
  0xe9   :  { %8363 = vmatmul.mubr.msk.f32.gmra.mrb[50].mxu1 %vm143_vm1, %v10798_v51 }
  0xea   :  { %8805 = vmatmul.mubr.msk.f32.gmra.mrb[18].mxu0 %vm143_vm1, %v10504_v31  ;;  %8365 = vmatprep.mubr.msk.f32.mxu1 %vm143_vm1, %v10805_v42  ;;  %v10834_v31 = vld [vmem:[%s12225_s0 + $0x2c0] sm:$0xff] }
  0xeb   :  { %8807 = vmatprep.mubr.msk.f32.mxu0 %vm143_vm1, %v10516_v27  ;;  %v10841_v27 = vld [vmem:[%s12225_s0 + $0x2d0] sm:$0xff] }
  0xed   :  { %8366 = vmatmul.mubr.msk.f32.gmra.mrb[52].mxu1 %vm143_vm1, %v10816_v39 }
  0xee   :  { %8808 = vmatmul.mubr.msk.f32.gmra.mrb[20].mxu0 %vm143_vm1, %v10532_v22  ;;  %8368 = vmatprep.mubr.msk.f32.mxu1 %vm143_vm1, %v10823_v35  ;;  %v10852_v22 = vld [vmem:[%s12225_s0 + $0x2d8] sm:$0xff] }
  0xef   :  { %8810 = vmatprep.mubr.msk.f32.mxu0 %vm143_vm1, %v10544_v18  ;;  %v10859_v18 = vld [vmem:[%s12225_s0 + $0x2e8] sm:$0xff] }
  0xf1   :  { %8369 = vmatmul.mubr.msk.f32.gmra.mrb[54].mxu1 %vm143_vm1, %v10834_v31 }
  0xf2   :  { %8811 = vmatmul.mubr.msk.f32.gmra.mrb[22].mxu0 %vm143_vm1, %v10560_v14  ;;  %8371 = vmatprep.mubr.msk.f32.mxu1 %vm143_vm1, %v10841_v27  ;;  %v10870_v14 = vld [vmem:[%s12225_s0 + $0x2f0] sm:$0xff] }
  0xf3   :  { %8813 = vmatprep.mubr.msk.f32.mxu0 %vm143_vm1, %v10572_v10  ;;  %v10877_v10 = vld [vmem:[%s12225_s0 + $0x300] sm:$0xff] }
  0xf5   :  { %8372 = vmatmul.mubr.msk.f32.gmra.mrb[56].mxu1 %vm143_vm1, %v10852_v22 }
  0xf6   :  { %8814 = vmatmul.mubr.msk.f32.gmra.mrb[24].mxu0 %vm143_vm1, %v10588_v6  ;;  %8374 = vmatprep.mubr.msk.f32.mxu1 %vm143_vm1, %v10859_v18  ;;  %v10882_v6 = vld [vmem:[%s12225_s0 + $0x180] sm:$0xff] }
  0xf7   :  { %8816 = vmatprep.mubr.msk.f32.mxu0 %vm143_vm1, %v10600_v26  ;;  %12299 = vst [vmem:[#allocation38_spill] sm:$0xff] %v10882_v6  ;;  %v10893_v26 = vld [vmem:[%s12225_s0 + $0x308] sm:$0xff] }
  0xf9   :  { %8375 = vmatmul.mubr.msk.f32.gmra.mrb[58].mxu1 %vm143_vm1, %v10870_v14 }
  0xfa   :  { %8817 = vmatmul.mubr.msk.f32.gmra.mrb[26].mxu0 %vm143_vm1, %v10614_v63  ;;  %8377 = vmatprep.mubr.msk.f32.mxu1 %vm143_vm1, %v10877_v10  ;;  %v10905_v63 = vld [vmem:[%s12225_s0 + $0x318] sm:$0xff] }
  0xfb   :  { %8819 = vmatprep.mubr.msk.f32.mxu0 %vm143_vm1, %v10882_v6  ;;  %v1305_v6 = vld [vmem:[%s12225_s0 + $0x2] sm:$0xff] }
  0xfd   :  { %8378 = vmatmul.mubr.msk.f32.gmra.mrb[60].mxu1 %vm143_vm1, %v10893_v26 }
  0xfe   :  { %8820 = vmatmul.mubr.msk.f32.gmra.mrb[28].mxu0 %vm143_vm1, %v10900_v55  ;;  %8380 = vmatprep.mubr.msk.f32.mxu1 %vm143_vm1, %v10905_v63  ;;  %v1306_v55 = vld [vmem:[%s12225_s0 + $0xa] sm:$0xff] }
  0xff   :  { %8822 = vmatprep.mubr.msk.f32.mxu0 %vm143_vm1, %v7242_v61  ;;  %v7357_v61 = vld [vmem:[%s12225_s0 + $0xe1] sm:$0xff] }
 0x101   :  { %8381 = vmatmul.mubr.msk.f32.gmra.mrb[62].mxu1 %vm143_vm1, %v10919_v38 }
 0x102   :  { %8823 = vmatmul.mubr.msk.f32.gmra.mrb[30].mxu0 %vm143_vm1, %v7243_v53  ;;  %8385 = vmatprep.mubr.msk.f32.mxu1 %vm143_vm1, %v1305_v6  ;;  %v7355_v53 = vld [vmem:[%s12225_s0 + $0xc9] sm:$0xff] }
 0x103   :  { %8825 = vmatprep.mubr.msk.f32.mxu0 %vm143_vm1, %v10659_v57  ;;  %v12313_v6 = vld [vmem:[#allocation17_spill] sm:$0xff] }
 0x105   :  { %8386 = vmatmul.mubr.msk.f32.vlgmr.msra.gmra.mrb[0].mxu1 %vm143_vm1, %v1306_v55  ;;  %v12314_v55 = vld [vmem:[#allocation18_spill] sm:$0xff] }
 0x106   :  { %8826 = vmatmul.mubr.msk.f32.gmra.mrb[32].mxu0 %vm143_vm1, %v10672_v47  ;;  %8482 = vmatpush3.msk.msra.mxu1 %vm336_vm0, %v10215_v59  ;;  %v12312_v59 = vld [vmem:[#allocation16_spill] sm:$0xff] }
 0x107   :  { %8388 = vmatprep.mubr.msk.f32.mxu1 %vm143_vm1, %v9833_v41  ;;  %8828 = vmatprep.mubr.msk.f32.mxu0 %vm143_vm1, %v10679_v2  ;;  %v11060_v41 = vld [vmem:[%s12225_s0 + $0x338] sm:$0xff] }
 0x108   :  { %9069 = vmatprep.subr.msk.mxu1 %vm336_vm0, %v9631_v1  ;;  %v11047_v1 = vld [vmem:[%s12225_s0 + $0x330] sm:$0xff] }
 0x109   :  { %8389 = vmatmul.mubr.msk.f32.gmra.mrb[2].mxu1 %vm143_vm1, %v9846_v43  ;;  %v7274_v43 = vld [vmem:[%s12225_s0 + $0x348] sm:$0xff] }
 0x10a   :  { %8829 = vmatmul.mubr.msk.f32.gmra.mrb[34].mxu0 %vm143_vm1, %v10690_v4  ;;  %8391 = vmatprep.mubr.msk.f32.mxu1 %vm143_vm1, %v9854_v45  ;;  %v7275_v45 = vld [vmem:[%s12225_s0 + $0x350] sm:$0xff] }
 0x10b   :  { %8831 = vmatprep.mubr.msk.f32.mxu0 %vm143_vm1, %v10697_v8 }
 0x10d   :  { %8392 = vmatmul.mubr.msk.f32.gmra.mrb[4].mxu1 %vm143_vm1, %v9875_v48  ;;  %v1337_v48 = vld [vmem:[%s12225_s0 + $0x1b2] sm:$0xff] }
 0x10e   :  { %8832 = vmatmul.mubr.msk.f32.gmra.mrb[36].mxu0 %vm143_vm1, %v10708_v12  ;;  %8394 = vmatprep.mubr.msk.f32.mxu1 %vm143_vm1, %v9883_v50  ;;  %v7342_v50 = vld [vmem:[%s12225_s0 + $0x31] sm:$0xff] }
 0x10f   :  { %8834 = vmatprep.mubr.msk.f32.mxu0 %vm143_vm1, %v10715_v16 }
 0x111   :  { %8395 = vmatmul.mubr.msk.f32.gmra.mrb[6].mxu1 %vm143_vm1, %v9899_v52  ;;  %v12301_v52 = vld [vmem:[#allocation5_spill] sm:$0xff] }
 0x112   :  { %8835 = vmatmul.mubr.msk.f32.gmra.mrb[38].mxu0 %vm143_vm1, %v10726_v20  ;;  %8397 = vmatprep.mubr.msk.f32.mxu1 %vm143_vm1, %v9907_v54  ;;  %v1338_v54 = vld [vmem:[%s12225_s0 + $0x1ba] sm:$0xff] }
 0x113   :  { %8837 = vmatprep.mubr.msk.f32.mxu0 %vm143_vm1, %v10733_v24 }
 0x115   :  { %8398 = vmatmul.mubr.msk.f32.gmra.mrb[8].mxu1 %vm143_vm1, %v9921_v56  ;;  %v7343_v56 = vld [vmem:[%s12225_s0 + $0x39] sm:$0xff] }
 0x116   :  { %8838 = vmatmul.mubr.msk.f32.gmra.mrb[40].mxu0 %vm143_vm1, %v10744_v29  ;;  %8400 = vmatprep.mubr.msk.f32.mxu1 %vm143_vm1, %v9929_v58  ;;  %v7344_v58 = vld [vmem:[%s12225_s0 + $0x49] sm:$0xff] }
 0x117   :  { %8840 = vmatprep.mubr.msk.f32.mxu0 %vm143_vm1, %v10751_v33 }
 0x119   :  { %8401 = vmatmul.mubr.msk.f32.gmra.mrb[10].mxu1 %vm143_vm1, %v9943_v60  ;;  %v12302_v60 = vld [vmem:[#allocation6_spill] sm:$0xff] }
 0x11a   :  { %8841 = vmatmul.mubr.msk.f32.gmra.mrb[42].mxu0 %vm143_vm1, %v10762_v37  ;;  %8403 = vmatprep.mubr.msk.f32.mxu1 %vm143_vm1, %v9951_v62  ;;  %v7345_v62 = vld [vmem:[%s12225_s0 + $0x51] sm:$0xff] }
 0x11b   :  { %8843 = vmatprep.mubr.msk.f32.mxu0 %vm143_vm1, %v10769_v40 }
 0x11d   :  { %8404 = vmatmul.mubr.msk.f32.gmra.mrb[12].mxu1 %vm143_vm1, %v9965_v0  ;;  %v7346_v0 = vld [vmem:[%s12225_s0 + $0x61] sm:$0xff] }
 0x11e   :  { %8844 = vmatmul.mubr.msk.f32.gmra.mrb[44].mxu0 %vm143_vm1, %v10780_v44  ;;  %8406 = vmatprep.mubr.msk.f32.mxu1 %vm143_vm1, %v9973_v3  ;;  %v12303_v3 = vld [vmem:[#allocation7_spill] sm:$0xff] }
 0x11f   :  { %8846 = vmatprep.mubr.msk.f32.mxu0 %vm143_vm1, %v10787_v46 }
 0x121   :  { %8407 = vmatmul.mubr.msk.f32.gmra.mrb[14].mxu1 %vm143_vm1, %v9987_v5  ;;  %v12304_v5 = vld [vmem:[#allocation8_spill] sm:$0xff] }
 0x122   :  { %8847 = vmatmul.mubr.msk.f32.gmra.mrb[46].mxu0 %vm143_vm1, %v10798_v51  ;;  %8409 = vmatprep.mubr.msk.f32.mxu1 %vm143_vm1, %v9995_v7  ;;  %v7347_v7 = vld [vmem:[%s12225_s0 + $0x69] sm:$0xff] }
 0x123   :  { %8849 = vmatprep.mubr.msk.f32.mxu0 %vm143_vm1, %v10805_v42 }
 0x125   :  { %8410 = vmatmul.mubr.msk.f32.gmra.mrb[16].mxu1 %vm143_vm1, %v10009_v9  ;;  %v7348_v9 = vld [vmem:[%s12225_s0 + $0x79] sm:$0xff] }
 0x126   :  { %8850 = vmatmul.mubr.msk.f32.gmra.mrb[48].mxu0 %vm143_vm1, %v10816_v39  ;;  %8412 = vmatprep.mubr.msk.f32.mxu1 %vm143_vm1, %v10017_v11  ;;  %v12305_v11 = vld [vmem:[#allocation9_spill] sm:$0xff] }
 0x127   :  { %8852 = vmatprep.mubr.msk.f32.mxu0 %vm143_vm1, %v10823_v35 }
 0x129   :  { %8413 = vmatmul.mubr.msk.f32.gmra.mrb[18].mxu1 %vm143_vm1, %v10031_v13  ;;  %v12306_v13 = vld [vmem:[#allocation10_spill] sm:$0xff] }
 0x12a   :  { %8853 = vmatmul.mubr.msk.f32.gmra.mrb[50].mxu0 %vm143_vm1, %v10834_v31  ;;  %8415 = vmatprep.mubr.msk.f32.mxu1 %vm143_vm1, %v10039_v15  ;;  %v7349_v15 = vld [vmem:[%s12225_s0 + $0x81] sm:$0xff] }
 0x12b   :  { %8855 = vmatprep.mubr.msk.f32.mxu0 %vm143_vm1, %v10841_v27 }
 0x12d   :  { %8416 = vmatmul.mubr.msk.f32.gmra.mrb[20].mxu1 %vm143_vm1, %v10053_v17  ;;  %v7350_v17 = vld [vmem:[%s12225_s0 + $0x91] sm:$0xff] }
 0x12e   :  { %8856 = vmatmul.mubr.msk.f32.gmra.mrb[52].mxu0 %vm143_vm1, %v10852_v22  ;;  %8418 = vmatprep.mubr.msk.f32.mxu1 %vm143_vm1, %v10061_v19  ;;  %v12307_v19 = vld [vmem:[#allocation11_spill] sm:$0xff] }
 0x12f   :  { %8858 = vmatprep.mubr.msk.f32.mxu0 %vm143_vm1, %v10859_v18 }
 0x131   :  { %8419 = vmatmul.mubr.msk.f32.gmra.mrb[22].mxu1 %vm143_vm1, %v10075_v21  ;;  %v12308_v21 = vld [vmem:[#allocation12_spill] sm:$0xff] }
 0x132   :  { %8859 = vmatmul.mubr.msk.f32.gmra.mrb[54].mxu0 %vm143_vm1, %v10870_v14  ;;  %8421 = vmatprep.mubr.msk.f32.mxu1 %vm143_vm1, %v10083_v23  ;;  %v7351_v23 = vld [vmem:[%s12225_s0 + $0x99] sm:$0xff] }
 0x133   :  { %8861 = vmatprep.mubr.msk.f32.mxu0 %vm143_vm1, %v10877_v10 }
 0x135   :  { %8422 = vmatmul.mubr.msk.f32.gmra.mrb[24].mxu1 %vm143_vm1, %v10097_v25  ;;  %v7352_v25 = vld [vmem:[%s12225_s0 + $0xa9] sm:$0xff] }
 0x136   :  { %8862 = vmatmul.mubr.msk.f32.gmra.mrb[56].mxu0 %vm143_vm1, %v10893_v26  ;;  %8424 = vmatprep.mubr.msk.f32.mxu1 %vm143_vm1, %v10105_v28  ;;  %v12309_v28 = vld [vmem:[#allocation13_spill] sm:$0xff] }
 0x137   :  { %8864 = vmatprep.mubr.msk.f32.mxu0 %vm143_vm1, %v10905_v63 }
 0x139   :  { %8425 = vmatmul.mubr.msk.f32.gmra.mrb[26].mxu1 %vm143_vm1, %v10119_v30  ;;  %v12310_v30 = vld [vmem:[#allocation14_spill] sm:$0xff] }
 0x13a   :  { %8865 = vmatmul.mubr.msk.f32.gmra.mrb[58].mxu0 %vm143_vm1, %v10919_v38  ;;  %8427 = vmatprep.mubr.msk.f32.mxu1 %vm143_vm1, %v10127_v32  ;;  %v7353_v32 = vld [vmem:[%s12225_s0 + $0xb1] sm:$0xff] }
 0x13b   :  { %8867 = vmatprep.mubr.msk.f32.mxu0 %vm143_vm1, %v11047_v1 }
 0x13d   :  { %8428 = vmatmul.mubr.msk.f32.gmra.mrb[28].mxu1 %vm143_vm1, %v10141_v34  ;;  %v7354_v34 = vld [vmem:[%s12225_s0 + $0xc1] sm:$0xff] }
 0x13e   :  { %8868 = vmatmul.mubr.msk.f32.gmra.mrb[60].mxu0 %vm143_vm1, %v11060_v41  ;;  %8430 = vmatprep.mubr.msk.f32.mxu1 %vm143_vm1, %v10149_v36  ;;  %v12311_v36 = vld [vmem:[#allocation15_spill] sm:$0xff] }
 0x13f   :  { %8870 = vmatprep.mubr.msk.f32.mxu0 %vm143_vm1, %v7274_v43  ;;  %v7358_v43 = vld [vmem:[%s12225_s0 + $0xf1] sm:$0xff] }
 0x141   :  { %8431 = vmatmul.mubr.msk.f32.gmra.mrb[30].mxu1 %vm143_vm1, %v12301_v52  ;;  %v7360_v52 = vld [vmem:[%s12225_s0 + $0x109] sm:$0xff] }
 0x142   :  { %8871 = vmatmul.mubr.msk.f32.gmra.mrb[62].mxu0 %vm143_vm1, %v7275_v45  ;;  %8433 = vmatprep.mubr.msk.f32.mxu1 %vm143_vm1, %v1337_v48  ;;  %v12315_v45 = vld [vmem:[#allocation19_spill] sm:$0xff]  ;;  %v12316_v48 = vld [vmem:[#allocation20_spill] sm:$0xff] }
 0x143   :  { %8875 = vmatprep.mubr.msk.f32.mxu0 %vm143_vm1, %v7342_v50  ;;  %v7359_v50 = vld [vmem:[%s12225_s0 + $0xf9] sm:$0xff] }
 0x145   :  { %8434 = vmatmul.mubr.msk.f32.gmra.mrb[32].mxu1 %vm143_vm1, %v1338_v54  ;;  %v12317_v54 = vld [vmem:[#allocation21_spill] sm:$0xff] }
 0x146   :  { %8876 = vmatmul.mubr.msk.f32.vlgmr.msra.gmra.mrb[0].mxu0 %vm143_vm1, %v7343_v56  ;;  %8436 = vmatprep.mubr.msk.f32.mxu1 %vm143_vm1, %v12302_v60  ;;  %v12318_v56 = vld [vmem:[#allocation22_spill] sm:$0xff]  ;;  %v7362_v60 = vld [vmem:[%s12225_s0 + $0x121] sm:$0xff] }
 0x147   :  { %8972 = vmatpush3.msk.msra.mxu0 %vm336_vm0, %v10650_v49  ;;  %8878 = vmatprep.mubr.msk.f32.mxu0 %vm143_vm1, %v7344_v58  ;;  %v7356_v49 = vld [vmem:[%s12225_s0 + $0xd9] sm:$0xff]  ;;  %v7361_v58 = vld [vmem:[%s12225_s0 + $0x111] sm:$0xff] }
 0x149   :  { %8437 = vmatmul.mubr.msk.f32.gmra.mrb[34].mxu1 %vm143_vm1, %v12303_v3  ;;  %v7363_v3 = vld [vmem:[%s12225_s0 + $0x129] sm:$0xff] }
 0x14a   :  { %8879 = vmatmul.mubr.msk.f32.gmra.mrb[2].mxu0 %vm143_vm1, %v7345_v62  ;;  %8439 = vmatprep.mubr.msk.f32.mxu1 %vm143_vm1, %v12304_v5  ;;  %v12319_v62 = vld [vmem:[#allocation23_spill] sm:$0xff] }
 0x14b   :  { %8881 = vmatprep.mubr.msk.f32.mxu0 %vm143_vm1, %v7346_v0  ;;  %v12320_v0 = vld [vmem:[#allocation24_spill] sm:$0xff] }
 0x14c   :  { %v7364_v5 = vld [vmem:[%s12225_s0 + $0x139] sm:$0xff] }
 0x14d   :  { %8440 = vmatmul.mubr.msk.f32.gmra.mrb[36].mxu1 %vm143_vm1, %v12305_v11  ;;  %v7365_v11 = vld [vmem:[%s12225_s0 + $0x141] sm:$0xff] }
 0x14e   :  { %8882 = vmatmul.mubr.msk.f32.gmra.mrb[4].mxu0 %vm143_vm1, %v7347_v7  ;;  %8442 = vmatprep.mubr.msk.f32.mxu1 %vm143_vm1, %v12306_v13  ;;  %v12321_v7 = vld [vmem:[#allocation25_spill] sm:$0xff]  ;;  %v7366_v13 = vld [vmem:[%s12225_s0 + $0x151] sm:$0xff] }
 0x14f   :  { %8884 = vmatprep.mubr.msk.f32.mxu0 %vm143_vm1, %v7348_v9  ;;  %v12322_v9 = vld [vmem:[#allocation26_spill] sm:$0xff] }
 0x151   :  { %8443 = vmatmul.mubr.msk.f32.gmra.mrb[38].mxu1 %vm143_vm1, %v12307_v19  ;;  %v7367_v19 = vld [vmem:[%s12225_s0 + $0x159] sm:$0xff] }
 0x152   :  { %8885 = vmatmul.mubr.msk.f32.gmra.mrb[6].mxu0 %vm143_vm1, %v7349_v15  ;;  %8445 = vmatprep.mubr.msk.f32.mxu1 %vm143_vm1, %v12308_v21  ;;  %v12323_v15 = vld [vmem:[#allocation27_spill] sm:$0xff]  ;;  %v7368_v21 = vld [vmem:[%s12225_s0 + $0x169] sm:$0xff] }
 0x153   :  { %8887 = vmatprep.mubr.msk.f32.mxu0 %vm143_vm1, %v7350_v17  ;;  %v12324_v17 = vld [vmem:[#allocation28_spill] sm:$0xff] }
 0x155   :  { %8446 = vmatmul.mubr.msk.f32.gmra.mrb[40].mxu1 %vm143_vm1, %v12309_v28  ;;  %v7369_v28 = vld [vmem:[%s12225_s0 + $0x171] sm:$0xff] }
 0x156   :  { %8888 = vmatmul.mubr.msk.f32.gmra.mrb[8].mxu0 %vm143_vm1, %v7351_v23  ;;  %8448 = vmatprep.mubr.msk.f32.mxu1 %vm143_vm1, %v12310_v30  ;;  %v12325_v23 = vld [vmem:[#allocation29_spill] sm:$0xff] }
 0x157   :  { %8890 = vmatprep.mubr.msk.f32.mxu0 %vm143_vm1, %v7352_v25  ;;  %v12326_v25 = vld [vmem:[#allocation30_spill] sm:$0xff]  ;;  %v7370_v30 = vld [vmem:[%s12225_s0 + $0x181] sm:$0xff] }
 0x159   :  { %8449 = vmatmul.mubr.msk.f32.gmra.mrb[42].mxu1 %vm143_vm1, %v12311_v36  ;;  %v7371_v36 = vld [vmem:[%s12225_s0 + $0x189] sm:$0xff] }
 0x15a   :  { %8891 = vmatmul.mubr.msk.f32.gmra.mrb[10].mxu0 %vm143_vm1, %v7353_v32  ;;  %8451 = vmatprep.mubr.msk.f32.mxu1 %vm143_vm1, %v12312_v59  ;;  %v12327_v32 = vld [vmem:[#allocation31_spill] sm:$0xff] }
 0x15b   :  { %8893 = vmatprep.mubr.msk.f32.mxu0 %vm143_vm1, %v7354_v34  ;;  %v12328_v34 = vld [vmem:[#allocation32_spill] sm:$0xff] }
 0x15c   :  { %v7372_v59 = vld [vmem:[%s12225_s0 + $0x199] sm:$0xff] }
 0x15d   :  { %8452 = vmatmul.mubr.msk.f32.gmra.mrb[44].mxu1 %vm143_vm1, %v12313_v6  ;;  %v7373_v6 = vld [vmem:[%s12225_s0 + $0x1a1] sm:$0xff] }
 0x15e   :  { %8894 = vmatmul.mubr.msk.f32.gmra.mrb[12].mxu0 %vm143_vm1, %v7355_v53  ;;  %8454 = vmatprep.mubr.msk.f32.mxu1 %vm143_vm1, %v12314_v55  ;;  %v12329_v53 = vld [vmem:[#allocation33_spill] sm:$0xff]  ;;  %v6822_v55 = vld [vmem:[%s12225_s0 + $0x18] sm:$0xff] }
 0x15f   :  { %8896 = vmatprep.mubr.msk.f32.mxu0 %vm143_vm1, %v7356_v49  ;;  %v12330_v49 = vld [vmem:[#allocation34_spill] sm:$0xff] }
 0x161   :  { %8455 = vmatmul.mubr.msk.f32.gmra.mrb[46].mxu1 %vm143_vm1, %v12315_v45  ;;  %v6823_v45 = vld [vmem:[%s12225_s0 + $0x20] sm:$0xff] }
 0x162   :  { %8897 = vmatmul.mubr.msk.f32.gmra.mrb[14].mxu0 %vm143_vm1, %v7357_v61  ;;  %8457 = vmatprep.mubr.msk.f32.mxu1 %vm143_vm1, %v12316_v48  ;;  %v11279_v61 = vld [vmem:[%s12225_s0 + $0x1e1] sm:$0xff]  ;;  %v11293_v48 = vld [vmem:[%s12225_s0 + $0x1e9] sm:$0xff] }
 0x163   :  { %8899 = vmatprep.mubr.msk.f32.mxu0 %vm143_vm1, %v7358_v43  ;;  %v12331_v43 = vld [vmem:[#allocation35_spill] sm:$0xff] }
 0x165   :  { %8458 = vmatmul.mubr.msk.f32.gmra.mrb[48].mxu1 %vm143_vm1, %v12317_v54  ;;  %v9584_v54 = vld [vmem:[%s12226_s1 + $0x10] sm:$0xf] }
 0x166   :  { %8900 = vmatmul.mubr.msk.f32.gmra.mrb[16].mxu0 %vm143_vm1, %v7359_v50  ;;  %8460 = vmatprep.mubr.msk.f32.mxu1 %vm143_vm1, %v12318_v56  ;;  %v6824_v50 = vld [vmem:[%s12225_s0 + $0x30] sm:$0xff]  ;;  %v6825_v56 = vld [vmem:[%s12225_s0 + $0x38] sm:$0xff] }
 0x167   :  { %8902 = vmatprep.mubr.msk.f32.mxu0 %vm143_vm1, %v7360_v52  ;;  %v11301_v52 = vld [vmem:[%s12225_s0 + $0x1f9] sm:$0xff] }
 0x169   :  { %8461 = vmatmul.mubr.msk.f32.gmra.mrb[50].mxu1 %vm143_vm1, %v12319_v62  ;;  %v11327_v62 = vld [vmem:[%s12225_s0 + $0x211] sm:$0xff] }
 0x16a   :  { %8903 = vmatmul.mubr.msk.f32.gmra.mrb[18].mxu0 %vm143_vm1, %v7361_v58  ;;  %8463 = vmatprep.mubr.msk.f32.mxu1 %vm143_vm1, %v12320_v0  ;;  %v11319_v58 = vld [vmem:[%s12225_s0 + $0x201] sm:$0xff]  ;;  %v6827_v0 = vld [vmem:[%s12225_s0 + $0x50] sm:$0xff] }
 0x16b   :  { %8905 = vmatprep.mubr.msk.f32.mxu0 %vm143_vm1, %v7362_v60  ;;  %v6826_v60 = vld [vmem:[%s12225_s0 + $0x48] sm:$0xff] }
 0x16d   :  { %8464 = vmatmul.mubr.msk.f32.gmra.mrb[52].mxu1 %vm143_vm1, %v12321_v7  ;;  %v11349_v7 = vld [vmem:[%s12225_s0 + $0x229] sm:$0xff] }
 0x16e   :  { %8906 = vmatmul.mubr.msk.f32.gmra.mrb[20].mxu0 %vm143_vm1, %v7363_v3  ;;  %8466 = vmatprep.mubr.msk.f32.mxu1 %vm143_vm1, %v12322_v9  ;;  %v11341_v3 = vld [vmem:[%s12225_s0 + $0x219] sm:$0xff]  ;;  %v6829_v9 = vld [vmem:[%s12225_s0 + $0x68] sm:$0xff] }
 0x16f   :  { %8908 = vmatprep.mubr.msk.f32.mxu0 %vm143_vm1, %v7364_v5  ;;  %v6828_v5 = vld [vmem:[%s12225_s0 + $0x60] sm:$0xff] }
 0x171   :  { %8467 = vmatmul.mubr.msk.f32.gmra.mrb[54].mxu1 %vm143_vm1, %v12323_v15  ;;  %v11371_v15 = vld [vmem:[%s12225_s0 + $0x241] sm:$0xff] }
 0x172   :  { %8909 = vmatmul.mubr.msk.f32.gmra.mrb[22].mxu0 %vm143_vm1, %v7365_v11  ;;  %8469 = vmatprep.mubr.msk.f32.mxu1 %vm143_vm1, %v12324_v17  ;;  %v11363_v11 = vld [vmem:[%s12225_s0 + $0x231] sm:$0xff]  ;;  %v6831_v17 = vld [vmem:[%s12225_s0 + $0x80] sm:$0xff] }
 0x173   :  { %8911 = vmatprep.mubr.msk.f32.mxu0 %vm143_vm1, %v7366_v13  ;;  %v6830_v13 = vld [vmem:[%s12225_s0 + $0x78] sm:$0xff] }
 0x175   :  { %8470 = vmatmul.mubr.msk.f32.gmra.mrb[56].mxu1 %vm143_vm1, %v12325_v23  ;;  %v11393_v23 = vld [vmem:[%s12225_s0 + $0x259] sm:$0xff] }
 0x176   :  { %8912 = vmatmul.mubr.msk.f32.gmra.mrb[24].mxu0 %vm143_vm1, %v7367_v19  ;;  %8472 = vmatprep.mubr.msk.f32.mxu1 %vm143_vm1, %v12326_v25  ;;  %v11385_v19 = vld [vmem:[%s12225_s0 + $0x249] sm:$0xff]  ;;  %v6833_v25 = vld [vmem:[%s12225_s0 + $0x98] sm:$0xff] }
 0x177   :  { %8914 = vmatprep.mubr.msk.f32.mxu0 %vm143_vm1, %v7368_v21  ;;  %v6832_v21 = vld [vmem:[%s12225_s0 + $0x90] sm:$0xff] }
 0x179   :  { %8473 = vmatmul.mubr.msk.f32.gmra.mrb[58].mxu1 %vm143_vm1, %v12327_v32  ;;  %v11415_v32 = vld [vmem:[%s12225_s0 + $0x271] sm:$0xff] }
 0x17a   :  { %8915 = vmatmul.mubr.msk.f32.gmra.mrb[26].mxu0 %vm143_vm1, %v7369_v28  ;;  %8475 = vmatprep.mubr.msk.f32.mxu1 %vm143_vm1, %v12328_v34  ;;  %v11407_v28 = vld [vmem:[%s12225_s0 + $0x261] sm:$0xff]  ;;  %v6835_v34 = vld [vmem:[%s12225_s0 + $0xb0] sm:$0xff] }
 0x17b   :  { %8917 = vmatprep.mubr.msk.f32.mxu0 %vm143_vm1, %v7370_v30  ;;  %v6834_v30 = vld [vmem:[%s12225_s0 + $0xa8] sm:$0xff] }
 0x17d   :  { %8476 = vmatmul.mubr.msk.f32.gmra.mrb[60].mxu1 %vm143_vm1, %v12329_v53  ;;  %v11437_v53 = vld [vmem:[%s12225_s0 + $0x289] sm:$0xff] }
 0x17e   :  { %8918 = vmatmul.mubr.msk.f32.gmra.mrb[28].mxu0 %vm143_vm1, %v7371_v36  ;;  %8478 = vmatprep.mubr.msk.f32.mxu1 %vm143_vm1, %v12330_v49  ;;  %v11429_v36 = vld [vmem:[%s12225_s0 + $0x279] sm:$0xff]  ;;  %v6837_v49 = vld [vmem:[%s12225_s0 + $0xc8] sm:$0xff] }
 0x17f   :  { %8920 = vmatprep.mubr.msk.f32.mxu0 %vm143_vm1, %v7372_v59  ;;  %v6836_v59 = vld [vmem:[%s12225_s0 + $0xc0] sm:$0xff] }
 0x181   :  { %8479 = vmatmul.mubr.msk.f32.gmra.mrb[62].mxu1 %vm143_vm1, %v12331_v43  ;;  %v11459_v43 = vld [vmem:[%s12225_s0 + $0x2a1] sm:$0xff] }
 0x182   :  { %8921 = vmatmul.mubr.msk.f32.gmra.mrb[30].mxu0 %vm143_vm1, %v7373_v6  ;;  %8483 = vmatprep.mubr.msk.f32.mxu1 %vm143_vm1, %v6822_v55  ;;  %v11451_v6 = vld [vmem:[%s12225_s0 + $0x291] sm:$0xff] }
 0x183   :  { %8923 = vmatprep.mubr.msk.f32.mxu0 %vm143_vm1, %v11279_v61  ;;  %v6838_v55 = vld [vmem:[%s12225_s0 + $0xd8] sm:$0xff] }
 0x185   :  { %8484 = vmatmul.mubr.msk.f32.vlgmr.msra.gmra.mrb[0].mxu1 %vm143_vm1, %v6823_v45  ;;  %v6839_v45 = vld [vmem:[%s12225_s0 + $0xe0] sm:$0xff] }
 0x186   :  { %8924 = vmatmul.mubr.msk.f32.gmra.mrb[32].mxu0 %vm143_vm1, %v11293_v48  ;;  %9070 = vmatpush3.msk.msra.mxu1 %vm336_vm0, %v9584_v54  ;;  %v6840_v54 = vld [vmem:[%s12225_s0 + $0xf0] sm:$0xff] }
 0x187   :  { %8486 = vmatprep.mubr.msk.f32.mxu1 %vm143_vm1, %v6824_v50  ;;  %8926 = vmatprep.mubr.msk.f32.mxu0 %vm143_vm1, %v11301_v52  ;;  %v11473_v50 = vld [vmem:[%s12225_s0 + $0x2a9] sm:$0xff] }
 0x189   :  { %8487 = vmatmul.mubr.msk.f32.gmra.mrb[2].mxu1 %vm143_vm1, %v6825_v56  ;;  %v11481_v56 = vld [vmem:[%s12225_s0 + $0x2b9] sm:$0xff] }
 0x18a   :  { %8927 = vmatmul.mubr.msk.f32.gmra.mrb[34].mxu0 %vm143_vm1, %v11319_v58  ;;  %8489 = vmatprep.mubr.msk.f32.mxu1 %vm143_vm1, %v6826_v60  ;;  %v6841_v60 = vld [vmem:[%s12225_s0 + $0xf8] sm:$0xff] }
 0x18b   :  { %8929 = vmatprep.mubr.msk.f32.mxu0 %vm143_vm1, %v11327_v62 }
 0x18d   :  { %8490 = vmatmul.mubr.msk.f32.gmra.mrb[4].mxu1 %vm143_vm1, %v6827_v0  ;;  %v11495_v0 = vld [vmem:[%s12225_s0 + $0x2c1] sm:$0xff] }
 0x18e   :  { %8930 = vmatmul.mubr.msk.f32.gmra.mrb[36].mxu0 %vm143_vm1, %v11341_v3  ;;  %8492 = vmatprep.mubr.msk.f32.mxu1 %vm143_vm1, %v6828_v5  ;;  %v6842_v5 = vld [vmem:[%s12225_s0 + $0x108] sm:$0xff] }
 0x18f   :  { %8932 = vmatprep.mubr.msk.f32.mxu0 %vm143_vm1, %v11349_v7 }
 0x191   :  { %8493 = vmatmul.mubr.msk.f32.gmra.mrb[6].mxu1 %vm143_vm1, %v6829_v9  ;;  %v11503_v9 = vld [vmem:[%s12225_s0 + $0x2d1] sm:$0xff] }
 0x192   :  { %8933 = vmatmul.mubr.msk.f32.gmra.mrb[38].mxu0 %vm143_vm1, %v11363_v11  ;;  %8495 = vmatprep.mubr.msk.f32.mxu1 %vm143_vm1, %v6830_v13  ;;  %v6843_v13 = vld [vmem:[%s12225_s0 + $0x110] sm:$0xff] }
 0x193   :  { %8935 = vmatprep.mubr.msk.f32.mxu0 %vm143_vm1, %v11371_v15 }
 0x195   :  { %8496 = vmatmul.mubr.msk.f32.gmra.mrb[8].mxu1 %vm143_vm1, %v6831_v17  ;;  %v11517_v17 = vld [vmem:[%s12225_s0 + $0x2d9] sm:$0xff] }
 0x196   :  { %8936 = vmatmul.mubr.msk.f32.gmra.mrb[40].mxu0 %vm143_vm1, %v11385_v19  ;;  %8498 = vmatprep.mubr.msk.f32.mxu1 %vm143_vm1, %v6832_v21  ;;  %v6844_v21 = vld [vmem:[%s12225_s0 + $0x120] sm:$0xff] }
 0x197   :  { %8938 = vmatprep.mubr.msk.f32.mxu0 %vm143_vm1, %v11393_v23 }
 0x199   :  { %8499 = vmatmul.mubr.msk.f32.gmra.mrb[10].mxu1 %vm143_vm1, %v6833_v25  ;;  %v11525_v25 = vld [vmem:[%s12225_s0 + $0x2e9] sm:$0xff] }
 0x19a   :  { %8939 = vmatmul.mubr.msk.f32.gmra.mrb[42].mxu0 %vm143_vm1, %v11407_v28  ;;  %8501 = vmatprep.mubr.msk.f32.mxu1 %vm143_vm1, %v6834_v30  ;;  %v6845_v30 = vld [vmem:[%s12225_s0 + $0x128] sm:$0xff] }
 0x19b   :  { %8941 = vmatprep.mubr.msk.f32.mxu0 %vm143_vm1, %v11415_v32 }
 0x19d   :  { %8502 = vmatmul.mubr.msk.f32.gmra.mrb[12].mxu1 %vm143_vm1, %v6835_v34  ;;  %v11539_v34 = vld [vmem:[%s12225_s0 + $0x2f1] sm:$0xff] }
 0x19e   :  { %8942 = vmatmul.mubr.msk.f32.gmra.mrb[44].mxu0 %vm143_vm1, %v11429_v36  ;;  %8504 = vmatprep.mubr.msk.f32.mxu1 %vm143_vm1, %v6836_v59  ;;  %v6846_v59 = vld [vmem:[%s12225_s0 + $0x138] sm:$0xff] }
 0x19f   :  { %8944 = vmatprep.mubr.msk.f32.mxu0 %vm143_vm1, %v11437_v53 }
 0x1a1   :  { %8505 = vmatmul.mubr.msk.f32.gmra.mrb[14].mxu1 %vm143_vm1, %v6837_v49  ;;  %v11547_v49 = vld [vmem:[%s12225_s0 + $0x301] sm:$0xff] }
 0x1a2   :  { %8945 = vmatmul.mubr.msk.f32.gmra.mrb[46].mxu0 %vm143_vm1, %v11451_v6  ;;  %8507 = vmatprep.mubr.msk.f32.mxu1 %vm143_vm1, %v6838_v55  ;;  %v6847_v55 = vld [vmem:[%s12225_s0 + $0x140] sm:$0xff] }
 0x1a3   :  { %8947 = vmatprep.mubr.msk.f32.mxu0 %vm143_vm1, %v11459_v43 }
 0x1a5   :  { %8508 = vmatmul.mubr.msk.f32.gmra.mrb[16].mxu1 %vm143_vm1, %v6839_v45  ;;  %v11561_v45 = vld [vmem:[%s12225_s0 + $0x309] sm:$0xff] }
 0x1a6   :  { %8948 = vmatmul.mubr.msk.f32.gmra.mrb[48].mxu0 %vm143_vm1, %v11473_v50  ;;  %8510 = vmatprep.mubr.msk.f32.mxu1 %vm143_vm1, %v6840_v54  ;;  %v6848_v54 = vld [vmem:[%s12225_s0 + $0x150] sm:$0xff] }
 0x1a7   :  { %8950 = vmatprep.mubr.msk.f32.mxu0 %vm143_vm1, %v11481_v56 }
 0x1a9   :  { %8511 = vmatmul.mubr.msk.f32.gmra.mrb[18].mxu1 %vm143_vm1, %v6841_v60  ;;  %v11569_v60 = vld [vmem:[%s12225_s0 + $0x319] sm:$0xff] }
 0x1aa   :  { %8951 = vmatmul.mubr.msk.f32.gmra.mrb[50].mxu0 %vm143_vm1, %v11495_v0  ;;  %8513 = vmatprep.mubr.msk.f32.mxu1 %vm143_vm1, %v6842_v5  ;;  %v6849_v5 = vld [vmem:[%s12225_s0 + $0x158] sm:$0xff] }
 0x1ab   :  { %8953 = vmatprep.mubr.msk.f32.mxu0 %vm143_vm1, %v11503_v9 }
 0x1ad   :  { %8514 = vmatmul.mubr.msk.f32.gmra.mrb[20].mxu1 %vm143_vm1, %v6843_v13  ;;  %v11583_v13 = vld [vmem:[%s12225_s0 + $0x321] sm:$0xff] }
 0x1ae   :  { %8954 = vmatmul.mubr.msk.f32.gmra.mrb[52].mxu0 %vm143_vm1, %v11517_v17  ;;  %8516 = vmatprep.mubr.msk.f32.mxu1 %vm143_vm1, %v6844_v21  ;;  %12332 = vst [vmem:[#allocation5_spill] sm:$0xff] %v11583_v13  ;;  %v6850_v21 = vld [vmem:[%s12225_s0 + $0x168] sm:$0xff] }
 0x1af   :  { %8956 = vmatprep.mubr.msk.f32.mxu0 %vm143_vm1, %v11525_v25 }
 0x1b1   :  { %8517 = vmatmul.mubr.msk.f32.gmra.mrb[22].mxu1 %vm143_vm1, %v6845_v30  ;;  %v11591_v30 = vld [vmem:[%s12225_s0 + $0x331] sm:$0xff] }
 0x1b2   :  { %8957 = vmatmul.mubr.msk.f32.gmra.mrb[54].mxu0 %vm143_vm1, %v11539_v34  ;;  %8519 = vmatprep.mubr.msk.f32.mxu1 %vm143_vm1, %v6846_v59  ;;  %12333 = vst [vmem:[#allocation6_spill] sm:$0xff] %v11591_v30  ;;  %v6851_v59 = vld [vmem:[%s12225_s0 + $0x170] sm:$0xff] }
 0x1b3   :  { %8959 = vmatprep.mubr.msk.f32.mxu0 %vm143_vm1, %v11547_v49 }
 0x1b5   :  { %8520 = vmatmul.mubr.msk.f32.gmra.mrb[24].mxu1 %vm143_vm1, %v6847_v55  ;;  %v11605_v55 = vld [vmem:[%s12225_s0 + $0x339] sm:$0xff] }
 0x1b6   :  { %8960 = vmatmul.mubr.msk.f32.gmra.mrb[56].mxu0 %vm143_vm1, %v11561_v45  ;;  %8522 = vmatprep.mubr.msk.f32.mxu1 %vm143_vm1, %v6848_v54  ;;  %12334 = vst [vmem:[#allocation7_spill] sm:$0xff] %v11605_v55  ;;  %v7404_v54 = vld [vmem:[%s12225_s0 + $0x349] sm:$0xff] }
 0x1b7   :  { %8962 = vmatprep.mubr.msk.f32.mxu0 %vm143_vm1, %v11569_v60 }
 0x1b9   :  { %8523 = vmatmul.mubr.msk.f32.gmra.mrb[26].mxu1 %vm143_vm1, %v6849_v5  ;;  %v12335_v5 = vld [vmem:[#allocation38_spill] sm:$0xff] }
 0x1ba   :  { %8963 = vmatmul.mubr.msk.f32.gmra.mrb[58].mxu0 %vm143_vm1, %v11583_v13  ;;  %8525 = vmatprep.mubr.msk.f32.mxu1 %vm143_vm1, %v6850_v21  ;;  %v7405_v21 = vld [vmem:[%s12225_s0 + $0x351] sm:$0xff] }
 0x1bb   :  { %8965 = vmatprep.mubr.msk.f32.mxu0 %vm143_vm1, %v11591_v30  ;;  %v7472_v30 = vld [vmem:[%s12225_s0 + $0x32] sm:$0xff] }
 0x1bc   :  { %v12336_v13 = vld [vmem:[#allocation39_spill] sm:$0xff] }
 0x1bd   :  { %8526 = vmatmul.mubr.msk.f32.gmra.mrb[28].mxu1 %vm143_vm1, %v6851_v59  ;;  %v12337_v59 = vld [vmem:[#allocation36_spill] sm:$0xff] }
 0x1be   :  { %8966 = vmatmul.mubr.msk.f32.gmra.mrb[60].mxu0 %vm143_vm1, %v11605_v55  ;;  %8528 = vmatprep.mubr.msk.f32.mxu1 %vm143_vm1, %v12335_v5  ;;  %v7474_v5 = vld [vmem:[%s12225_s0 + $0x4a] sm:$0xff]  ;;  %v12338_v55 = vld [vmem:[#allocation37_spill] sm:$0xff] }
 0x1bf   :  { %8968 = vmatprep.mubr.msk.f32.mxu0 %vm143_vm1, %v7404_v54  ;;  %v7473_v54 = vld [vmem:[%s12225_s0 + $0x3a] sm:$0xff] }
 0x1c1   :  { %8529 = vmatmul.mubr.msk.f32.gmra.mrb[30].mxu1 %vm143_vm1, %v12336_v13  ;;  %v7475_v13 = vld [vmem:[%s12225_s0 + $0x52] sm:$0xff] }
 0x1c2   :  { %8969 = vmatmul.mubr.msk.f32.gmra.mrb[62].mxu0 %vm143_vm1, %v7405_v21  ;;  %8531 = vmatprep.mubr.msk.f32.mxu1 %vm143_vm1, %v12337_v59  ;;  %v7504_v21 = vld [vmem:[%s12225_s0 + $0x1e2] sm:$0xff]  ;;  %v7506_v59 = vld [vmem:[%s12225_s0 + $0x1fa] sm:$0xff] }
 0x1c3   :  { %8973 = vmatprep.mubr.msk.f32.mxu0 %vm143_vm1, %v7472_v30  ;;  %v7476_v30 = vld [vmem:[%s12225_s0 + $0x62] sm:$0xff] }
 0x1c5   :  { %8532 = vmatmul.mubr.msk.f32.gmra.mrb[32].mxu1 %vm143_vm1, %v12338_v55  ;;  %v7478_v55 = vld [vmem:[%s12225_s0 + $0x7a] sm:$0xff] }
 0x1c6   :  { %8974 = vmatmul.mubr.msk.f32.vlgmr.msra.gmra.mrb[0].mxu0 %vm143_vm1, %v7473_v54  ;;  %8534 = vmatprep.mubr.msk.f32.mxu1 %vm143_vm1, %v10659_v57  ;;  %v7477_v57 = vld [vmem:[%s12225_s0 + $0x6a] sm:$0xff]  ;;  %v7508_v54 = vld [vmem:[%s12225_s0 + $0x212] sm:$0xff] }
 0x1c7   :  { %8976 = vmatprep.mubr.msk.f32.mxu0 %vm143_vm1, %v7474_v5  ;;  %v7510_v5 = vld [vmem:[%s12225_s0 + $0x22a] sm:$0xff] }
 0x1c9   :  { %8535 = vmatmul.mubr.msk.f32.gmra.mrb[34].mxu1 %vm143_vm1, %v10672_v47  ;;  %v7479_v47 = vld [vmem:[%s12225_s0 + $0x82] sm:$0xff] }
 0x1ca   :  { %8977 = vmatmul.mubr.msk.f32.gmra.mrb[2].mxu0 %vm143_vm1, %v7475_v13  ;;  %8537 = vmatprep.mubr.msk.f32.mxu1 %vm143_vm1, %v10679_v2  ;;  %v7480_v2 = vld [vmem:[%s12225_s0 + $0x92] sm:$0xff]  ;;  %v12339_v13 = vld [vmem:[#allocation5_spill] sm:$0xff] }
 0x1cb   :  { %8979 = vmatprep.mubr.msk.f32.mxu0 %vm143_vm1, %v7476_v30  ;;  %v12341_v30 = vld [vmem:[#allocation7_spill] sm:$0xff] }
 0x1cd   :  { %8538 = vmatmul.mubr.msk.f32.gmra.mrb[36].mxu1 %vm143_vm1, %v10690_v4  ;;  %v7481_v4 = vld [vmem:[%s12225_s0 + $0x9a] sm:$0xff] }
 0x1ce   :  { %8980 = vmatmul.mubr.msk.f32.gmra.mrb[4].mxu0 %vm143_vm1, %v7477_v57  ;;  %8540 = vmatprep.mubr.msk.f32.mxu1 %vm143_vm1, %v10697_v8  ;;  %v7482_v8 = vld [vmem:[%s12225_s0 + $0xaa] sm:$0xff] }
 0x1cf   :  { %8982 = vmatprep.mubr.msk.f32.mxu0 %vm143_vm1, %v7478_v55 }
 0x1d1   :  { %8541 = vmatmul.mubr.msk.f32.gmra.mrb[38].mxu1 %vm143_vm1, %v10708_v12  ;;  %v7483_v12 = vld [vmem:[%s12225_s0 + $0xb2] sm:$0xff] }
 0x1d2   :  { %8983 = vmatmul.mubr.msk.f32.gmra.mrb[6].mxu0 %vm143_vm1, %v7479_v47  ;;  %8543 = vmatprep.mubr.msk.f32.mxu1 %vm143_vm1, %v10715_v16  ;;  %v7484_v16 = vld [vmem:[%s12225_s0 + $0xc2] sm:$0xff] }
 0x1d3   :  { %8985 = vmatprep.mubr.msk.f32.mxu0 %vm143_vm1, %v7480_v2 }
 0x1d5   :  { %8544 = vmatmul.mubr.msk.f32.gmra.mrb[40].mxu1 %vm143_vm1, %v10726_v20  ;;  %v7485_v20 = vld [vmem:[%s12225_s0 + $0xca] sm:$0xff] }
 0x1d6   :  { %8986 = vmatmul.mubr.msk.f32.gmra.mrb[8].mxu0 %vm143_vm1, %v7481_v4  ;;  %8546 = vmatprep.mubr.msk.f32.mxu1 %vm143_vm1, %v10733_v24  ;;  %v7486_v24 = vld [vmem:[%s12225_s0 + $0xda] sm:$0xff] }
 0x1d7   :  { %8988 = vmatprep.mubr.msk.f32.mxu0 %vm143_vm1, %v7482_v8 }
 0x1d9   :  { %8547 = vmatmul.mubr.msk.f32.gmra.mrb[42].mxu1 %vm143_vm1, %v10744_v29  ;;  %v7487_v29 = vld [vmem:[%s12225_s0 + $0xe2] sm:$0xff] }
 0x1da   :  { %8989 = vmatmul.mubr.msk.f32.gmra.mrb[10].mxu0 %vm143_vm1, %v7483_v12  ;;  %8549 = vmatprep.mubr.msk.f32.mxu1 %vm143_vm1, %v10751_v33  ;;  %v7488_v33 = vld [vmem:[%s12225_s0 + $0xf2] sm:$0xff] }
 0x1db   :  { %8991 = vmatprep.mubr.msk.f32.mxu0 %vm143_vm1, %v7484_v16 }
 0x1dd   :  { %8550 = vmatmul.mubr.msk.f32.gmra.mrb[44].mxu1 %vm143_vm1, %v10762_v37  ;;  %v7489_v37 = vld [vmem:[%s12225_s0 + $0xfa] sm:$0xff] }
 0x1de   :  { %8992 = vmatmul.mubr.msk.f32.gmra.mrb[12].mxu0 %vm143_vm1, %v7485_v20  ;;  %8552 = vmatprep.mubr.msk.f32.mxu1 %vm143_vm1, %v10769_v40  ;;  %v7490_v40 = vld [vmem:[%s12225_s0 + $0x10a] sm:$0xff] }
 0x1df   :  { %8994 = vmatprep.mubr.msk.f32.mxu0 %vm143_vm1, %v7486_v24 }
 0x1e1   :  { %8553 = vmatmul.mubr.msk.f32.gmra.mrb[46].mxu1 %vm143_vm1, %v10780_v44  ;;  %v7491_v44 = vld [vmem:[%s12225_s0 + $0x112] sm:$0xff] }
 0x1e2   :  { %8995 = vmatmul.mubr.msk.f32.gmra.mrb[14].mxu0 %vm143_vm1, %v7487_v29  ;;  %8555 = vmatprep.mubr.msk.f32.mxu1 %vm143_vm1, %v10787_v46  ;;  %v7492_v46 = vld [vmem:[%s12225_s0 + $0x122] sm:$0xff] }
 0x1e3   :  { %8997 = vmatprep.mubr.msk.f32.mxu0 %vm143_vm1, %v7488_v33 }
 0x1e5   :  { %8556 = vmatmul.mubr.msk.f32.gmra.mrb[48].mxu1 %vm143_vm1, %v10798_v51  ;;  %v7493_v51 = vld [vmem:[%s12225_s0 + $0x12a] sm:$0xff] }
 0x1e6   :  { %8998 = vmatmul.mubr.msk.f32.gmra.mrb[16].mxu0 %vm143_vm1, %v7489_v37  ;;  %8558 = vmatprep.mubr.msk.f32.mxu1 %vm143_vm1, %v10805_v42  ;;  %v7494_v42 = vld [vmem:[%s12225_s0 + $0x13a] sm:$0xff] }
 0x1e7   :  { %9000 = vmatprep.mubr.msk.f32.mxu0 %vm143_vm1, %v7490_v40 }
 0x1e9   :  { %8559 = vmatmul.mubr.msk.f32.gmra.mrb[50].mxu1 %vm143_vm1, %v10816_v39  ;;  %v7495_v39 = vld [vmem:[%s12225_s0 + $0x142] sm:$0xff] }
 0x1ea   :  { %9001 = vmatmul.mubr.msk.f32.gmra.mrb[18].mxu0 %vm143_vm1, %v7491_v44  ;;  %8561 = vmatprep.mubr.msk.f32.mxu1 %vm143_vm1, %v10823_v35  ;;  %v7496_v35 = vld [vmem:[%s12225_s0 + $0x152] sm:$0xff] }
 0x1eb   :  { %9003 = vmatprep.mubr.msk.f32.mxu0 %vm143_vm1, %v7492_v46 }
 0x1ed   :  { %8562 = vmatmul.mubr.msk.f32.gmra.mrb[52].mxu1 %vm143_vm1, %v10834_v31  ;;  %v7497_v31 = vld [vmem:[%s12225_s0 + $0x15a] sm:$0xff] }
 0x1ee   :  { %9004 = vmatmul.mubr.msk.f32.gmra.mrb[20].mxu0 %vm143_vm1, %v7493_v51  ;;  %8564 = vmatprep.mubr.msk.f32.mxu1 %vm143_vm1, %v10841_v27  ;;  %v7498_v27 = vld [vmem:[%s12225_s0 + $0x16a] sm:$0xff] }
 0x1ef   :  { %9006 = vmatprep.mubr.msk.f32.mxu0 %vm143_vm1, %v7494_v42 }
 0x1f1   :  { %8565 = vmatmul.mubr.msk.f32.gmra.mrb[54].mxu1 %vm143_vm1, %v10852_v22  ;;  %v7499_v22 = vld [vmem:[%s12225_s0 + $0x172] sm:$0xff] }
 0x1f2   :  { %9007 = vmatmul.mubr.msk.f32.gmra.mrb[22].mxu0 %vm143_vm1, %v7495_v39  ;;  %8567 = vmatprep.mubr.msk.f32.mxu1 %vm143_vm1, %v10859_v18  ;;  %v7500_v18 = vld [vmem:[%s12225_s0 + $0x182] sm:$0xff] }
 0x1f3   :  { %9009 = vmatprep.mubr.msk.f32.mxu0 %vm143_vm1, %v7496_v35 }
 0x1f5   :  { %8568 = vmatmul.mubr.msk.f32.gmra.mrb[56].mxu1 %vm143_vm1, %v10870_v14  ;;  %v7501_v14 = vld [vmem:[%s12225_s0 + $0x18a] sm:$0xff] }
 0x1f6   :  { %9010 = vmatmul.mubr.msk.f32.gmra.mrb[24].mxu0 %vm143_vm1, %v7497_v31  ;;  %8570 = vmatprep.mubr.msk.f32.mxu1 %vm143_vm1, %v10877_v10  ;;  %v7502_v10 = vld [vmem:[%s12225_s0 + $0x19a] sm:$0xff] }
 0x1f7   :  { %9012 = vmatprep.mubr.msk.f32.mxu0 %vm143_vm1, %v7498_v27 }
 0x1f9   :  { %8571 = vmatmul.mubr.msk.f32.gmra.mrb[58].mxu1 %vm143_vm1, %v10893_v26  ;;  %v7503_v26 = vld [vmem:[%s12225_s0 + $0x1a2] sm:$0xff] }
 0x1fa   :  { %9013 = vmatmul.mubr.msk.f32.gmra.mrb[26].mxu0 %vm143_vm1, %v7499_v22  ;;  %8573 = vmatprep.mubr.msk.f32.mxu1 %vm143_vm1, %v10905_v63  ;;  %v6984_v63 = vld [vmem:[%s12225_s0 + $0x1c9] sm:$0xff] }
 0x1fb   :  { %9015 = vmatprep.mubr.msk.f32.mxu0 %vm143_vm1, %v7500_v18 }
 0x1fd   :  { %8574 = vmatmul.mubr.msk.f32.gmra.mrb[60].mxu1 %vm143_vm1, %v10919_v38  ;;  %v6985_v38 = vld [vmem:[%s12225_s0 + $0x1d1] sm:$0xff] }
 0x1fe   :  { %9016 = vmatmul.mubr.msk.f32.gmra.mrb[28].mxu0 %vm143_vm1, %v7501_v14  ;;  %8576 = vmatprep.mubr.msk.f32.mxu1 %vm143_vm1, %v11047_v1  ;;  %v7505_v1 = vld [vmem:[%s12225_s0 + $0x1ea] sm:$0xff] }
 0x1ff   :  { %9018 = vmatprep.mubr.msk.f32.mxu0 %vm143_vm1, %v7502_v10 }
 0x201   :  { %8577 = vmatmul.mubr.msk.f32.gmra.mrb[62].mxu1 %vm143_vm1, %v11060_v41  ;;  %v7507_v41 = vld [vmem:[%s12225_s0 + $0x202] sm:$0xff] }
 0x202   :  { %9019 = vmatmul.mubr.msk.f32.gmra.mrb[30].mxu0 %vm143_vm1, %v7503_v26  ;;  %8629 = vmatprep.mubr.msk.f32.mxu1 %vm143_vm1, %v6984_v63 }
 0x203   :  { %9021 = vmatprep.mubr.msk.f32.mxu0 %vm143_vm1, %v7504_v21 }
 0x205   :  { %8630 = vmatmul.mubr.msk.f32.vlgmr.msra.gmra.mrb[32].mxu1 %vm143_vm1, %v6985_v38 }
 0x206   :  { %9022 = vmatmul.mubr.msk.f32.gmra.mrb[32].mxu0 %vm143_vm1, %v7505_v1  ;;  %8632 = vmatprep.mubr.msk.f32.mxu1 %vm143_vm1, %v11279_v61  ;;  %v7509_v61 = vld [vmem:[%s12225_s0 + $0x21a] sm:$0xff] }
 0x207   :  { %9024 = vmatprep.mubr.msk.f32.mxu0 %vm143_vm1, %v7506_v59 }
 0x209   :  { %8633 = vmatmul.mubr.msk.f32.gmra.mrb[34].mxu1 %vm143_vm1, %v11293_v48  ;;  %v7511_v48 = vld [vmem:[%s12225_s0 + $0x232] sm:$0xff] }
 0x20a   :  { %9025 = vmatmul.mubr.msk.f32.gmra.mrb[34].mxu0 %vm143_vm1, %v7507_v41  ;;  %8635 = vmatprep.mubr.msk.f32.mxu1 %vm143_vm1, %v11301_v52  ;;  %v7512_v52 = vld [vmem:[%s12225_s0 + $0x242] sm:$0xff] }
 0x20b   :  { %9027 = vmatprep.mubr.msk.f32.mxu0 %vm143_vm1, %v7508_v54 }
 0x20d   :  { %8636 = vmatmul.mubr.msk.f32.gmra.mrb[36].mxu1 %vm143_vm1, %v11319_v58  ;;  %v7513_v58 = vld [vmem:[%s12225_s0 + $0x24a] sm:$0xff] }
 0x20e   :  { %9028 = vmatmul.mubr.msk.f32.gmra.mrb[36].mxu0 %vm143_vm1, %v7509_v61  ;;  %8638 = vmatprep.mubr.msk.f32.mxu1 %vm143_vm1, %v11327_v62  ;;  %v7514_v62 = vld [vmem:[%s12225_s0 + $0x25a] sm:$0xff] }
 0x20f   :  { %9030 = vmatprep.mubr.msk.f32.mxu0 %vm143_vm1, %v7510_v5 }
 0x211   :  { %8639 = vmatmul.mubr.msk.f32.gmra.mrb[38].mxu1 %vm143_vm1, %v11341_v3  ;;  %v7515_v3 = vld [vmem:[%s12225_s0 + $0x262] sm:$0xff] }
 0x212   :  { %9031 = vmatmul.mubr.msk.f32.gmra.mrb[38].mxu0 %vm143_vm1, %v7511_v48  ;;  %8641 = vmatprep.mubr.msk.f32.mxu1 %vm143_vm1, %v11349_v7  ;;  %v7516_v7 = vld [vmem:[%s12225_s0 + $0x272] sm:$0xff] }
 0x213   :  { %9033 = vmatprep.mubr.msk.f32.mxu0 %vm143_vm1, %v7512_v52 }
 0x215   :  { %8642 = vmatmul.mubr.msk.f32.gmra.mrb[40].mxu1 %vm143_vm1, %v11363_v11  ;;  %v7517_v11 = vld [vmem:[%s12225_s0 + $0x27a] sm:$0xff] }
 0x216   :  { %9034 = vmatmul.mubr.msk.f32.gmra.mrb[40].mxu0 %vm143_vm1, %v7513_v58  ;;  %8644 = vmatprep.mubr.msk.f32.mxu1 %vm143_vm1, %v11371_v15  ;;  %v7518_v15 = vld [vmem:[%s12225_s0 + $0x28a] sm:$0xff] }
 0x217   :  { %9036 = vmatprep.mubr.msk.f32.mxu0 %vm143_vm1, %v7514_v62 }
 0x219   :  { %8645 = vmatmul.mubr.msk.f32.gmra.mrb[42].mxu1 %vm143_vm1, %v11385_v19  ;;  %v7519_v19 = vld [vmem:[%s12225_s0 + $0x292] sm:$0xff] }
 0x21a   :  { %9037 = vmatmul.mubr.msk.f32.gmra.mrb[42].mxu0 %vm143_vm1, %v7515_v3  ;;  %8647 = vmatprep.mubr.msk.f32.mxu1 %vm143_vm1, %v11393_v23  ;;  %v7520_v23 = vld [vmem:[%s12225_s0 + $0x2a2] sm:$0xff] }
 0x21b   :  { %9039 = vmatprep.mubr.msk.f32.mxu0 %vm143_vm1, %v7516_v7 }
 0x21d   :  { %8648 = vmatmul.mubr.msk.f32.gmra.mrb[44].mxu1 %vm143_vm1, %v11407_v28  ;;  %v7521_v28 = vld [vmem:[%s12225_s0 + $0x2aa] sm:$0xff] }
 0x21e   :  { %9040 = vmatmul.mubr.msk.f32.gmra.mrb[44].mxu0 %vm143_vm1, %v7517_v11  ;;  %8650 = vmatprep.mubr.msk.f32.mxu1 %vm143_vm1, %v11415_v32  ;;  %v7522_v32 = vld [vmem:[%s12225_s0 + $0x2ba] sm:$0xff] }
 0x21f   :  { %9042 = vmatprep.mubr.msk.f32.mxu0 %vm143_vm1, %v7518_v15 }
 0x221   :  { %8651 = vmatmul.mubr.msk.f32.gmra.mrb[46].mxu1 %vm143_vm1, %v11429_v36  ;;  %v7523_v36 = vld [vmem:[%s12225_s0 + $0x2c2] sm:$0xff] }
 0x222   :  { %9043 = vmatmul.mubr.msk.f32.gmra.mrb[46].mxu0 %vm143_vm1, %v7519_v19  ;;  %8653 = vmatprep.mubr.msk.f32.mxu1 %vm143_vm1, %v11437_v53  ;;  %v7524_v53 = vld [vmem:[%s12225_s0 + $0x2d2] sm:$0xff] }
 0x223   :  { %9045 = vmatprep.mubr.msk.f32.mxu0 %vm143_vm1, %v7520_v23 }
 0x225   :  { %8654 = vmatmul.mubr.msk.f32.gmra.mrb[48].mxu1 %vm143_vm1, %v11451_v6  ;;  %v7525_v6 = vld [vmem:[%s12225_s0 + $0x2da] sm:$0xff] }
 0x226   :  { %9046 = vmatmul.mubr.msk.f32.gmra.mrb[48].mxu0 %vm143_vm1, %v7521_v28  ;;  %8656 = vmatprep.mubr.msk.f32.mxu1 %vm143_vm1, %v11459_v43  ;;  %v7526_v43 = vld [vmem:[%s12225_s0 + $0x2ea] sm:$0xff] }
 0x227   :  { %9048 = vmatprep.mubr.msk.f32.mxu0 %vm143_vm1, %v7522_v32 }
 0x229   :  { %8657 = vmatmul.mubr.msk.f32.gmra.mrb[50].mxu1 %vm143_vm1, %v11473_v50  ;;  %v7527_v50 = vld [vmem:[%s12225_s0 + $0x2f2] sm:$0xff] }
 0x22a   :  { %9049 = vmatmul.mubr.msk.f32.gmra.mrb[50].mxu0 %vm143_vm1, %v7523_v36  ;;  %8659 = vmatprep.mubr.msk.f32.mxu1 %vm143_vm1, %v11481_v56  ;;  %v7528_v56 = vld [vmem:[%s12225_s0 + $0x302] sm:$0xff] }
 0x22b   :  { %9051 = vmatprep.mubr.msk.f32.mxu0 %vm143_vm1, %v7524_v53 }
 0x22d   :  { %8660 = vmatmul.mubr.msk.f32.gmra.mrb[52].mxu1 %vm143_vm1, %v11495_v0  ;;  %v7529_v0 = vld [vmem:[%s12225_s0 + $0x30a] sm:$0xff] }
 0x22e   :  { %9052 = vmatmul.mubr.msk.f32.gmra.mrb[52].mxu0 %vm143_vm1, %v7525_v6  ;;  %8662 = vmatprep.mubr.msk.f32.mxu1 %vm143_vm1, %v11503_v9  ;;  %v7530_v9 = vld [vmem:[%s12225_s0 + $0x31a] sm:$0xff] }
 0x22f   :  { %9054 = vmatprep.mubr.msk.f32.mxu0 %vm143_vm1, %v7526_v43 }
 0x231   :  { %8663 = vmatmul.mubr.msk.f32.gmra.mrb[54].mxu1 %vm143_vm1, %v11517_v17  ;;  %v7531_v17 = vld [vmem:[%s12225_s0 + $0x322] sm:$0xff] }
 0x232   :  { %9055 = vmatmul.mubr.msk.f32.gmra.mrb[54].mxu0 %vm143_vm1, %v7527_v50  ;;  %8665 = vmatprep.mubr.msk.f32.mxu1 %vm143_vm1, %v11525_v25  ;;  %v7532_v25 = vld [vmem:[%s12225_s0 + $0x332] sm:$0xff] }
 0x233   :  { %9057 = vmatprep.mubr.msk.f32.mxu0 %vm143_vm1, %v7528_v56 }
 0x235   :  { %8666 = vmatmul.mubr.msk.f32.gmra.mrb[56].mxu1 %vm143_vm1, %v11539_v34  ;;  %v7533_v34 = vld [vmem:[%s12225_s0 + $0x33a] sm:$0xff] }
 0x236   :  { %9058 = vmatmul.mubr.msk.f32.gmra.mrb[56].mxu0 %vm143_vm1, %v7529_v0  ;;  %8668 = vmatprep.mubr.msk.f32.mxu1 %vm143_vm1, %v11547_v49  ;;  %v7534_v49 = vld [vmem:[%s12225_s0 + $0x34a] sm:$0xff] }
 0x237   :  { %9060 = vmatprep.mubr.msk.f32.mxu0 %vm143_vm1, %v7530_v9 }
 0x239   :  { %8669 = vmatmul.mubr.msk.f32.gmra.mrb[58].mxu1 %vm143_vm1, %v11561_v45  ;;  %v12340_v45 = vld [vmem:[#allocation6_spill] sm:$0xff] }
 0x23a   :  { %9061 = vmatmul.mubr.msk.f32.gmra.mrb[58].mxu0 %vm143_vm1, %v7531_v17  ;;  %8671 = vmatprep.mubr.msk.f32.mxu1 %vm143_vm1, %v11569_v60  ;;  %v7535_v60 = vld [vmem:[%s12225_s0 + $0x352] sm:$0xff]  ;;  %s9609_s0 = smov [#allocation2]  }
 0x23b   :  { %9063 = vmatprep.mubr.msk.f32.mxu0 %vm143_vm1, %v7532_v25  ;;  %s6617_s24 = sshll.u32 %s9609_s0, 4  ;;  %s6618_s24 = int_to_ptr.vmem [resolvable:$true] %s6617_s24 }
 0x23c   :  { %s9585_s25 = scalar_lea.vmem %s6618_s24, 32  ;;  %p9590_p1 = scmp.lt.s32.totalorder %s6618_s24, %s6618_s24 }
 0x23d   :  { %8672 = vmatmul.mubr.msk.f32.gmra.mrb[60].mxu1 %vm143_vm1, %v12339_v13  ;;  %p9586_p0 = scmp.ne.s32.totalorder %s6618_s24, %s9585_s25  ;;  %p9591_p2 = scmp.lt.s32.totalorder %s9585_s25, %s9585_s25 }
 0x23e   :  { %9064 = vmatmul.mubr.msk.f32.gmra.mrb[60].mxu0 %vm143_vm1, %v7533_v34  ;;  %8674 = vmatprep.mubr.msk.f32.mxu1 %vm143_vm1, %v12340_v45 }
 0x23f   :  { %9066 = vmatprep.mubr.msk.f32.mxu0 %vm143_vm1, %v7534_v49  ;;  %p9592_p3 = por %p9591_p2, %p9590_p1 }
 0x241   :  { %8675 = vmatmul.mubr.msk.f32.gmra.mrb[62].mxu1 %vm143_vm1, %v12341_v30  ;;  %p9593_p4 = pnand %p9592_p3, %p9586_p0 }
 0x242   :  { %9067 = vmatmul.mubr.msk.f32.gmra.mrb[62].mxu0 %vm143_vm1, %v7535_v60 }
 0x258   :  { %v8485_v57 = vpop.f32.mrb[0].mxu1 }
 0x259   :  { %v2343_v55 = vpop.f32.mrb[1].mxu1 }
 0x25c   :  { %v8488_v47 = vpop.f32.mrb[2].mxu1 }
 0x25d   :  { %v2353_v2 = vpop.f32.mrb[3].mxu1 }
 0x260   :  { %v8491_v4 = vpop.f32.mrb[4].mxu1 }
 0x261   :  { %v2363_v8 = vpop.f32.mrb[5].mxu1 }
 0x264   :  { %v8494_v12 = vpop.f32.mrb[6].mxu1 }
 0x265   :  { %v12010_v16 = vpop.f32.mrb[7].mxu1 }
 0x268   :  { %v12012_v20 = vpop.f32.mrb[8].mxu1 }
 0x269   :  { %v12014_v24 = vpop.f32.mrb[9].mxu1 }
 0x26c   :  { %v12016_v29 = vpop.f32.mrb[10].mxu1 }
 0x26d   :  { %v12018_v33 = vpop.f32.mrb[11].mxu1 }
 0x270   :  { %v12020_v37 = vpop.f32.mrb[12].mxu1 }
 0x271   :  { %v12022_v40 = vpop.f32.mrb[13].mxu1 }
 0x274   :  { %v12024_v44 = vpop.f32.mrb[14].mxu1 }
 0x275   :  { %v12026_v46 = vpop.f32.mrb[15].mxu1 }
 0x278   :  { %v12028_v51 = vpop.f32.mrb[16].mxu1 }
 0x279   :  { %v12030_v42 = vpop.f32.mrb[17].mxu1 }
 0x27c   :  { %v12032_v39 = vpop.f32.mrb[18].mxu1 }
 0x27d   :  { %v12034_v35 = vpop.f32.mrb[19].mxu1 }
 0x280   :  { %v12036_v31 = vpop.f32.mrb[20].mxu1 }
 0x281   :  { %v12038_v27 = vpop.f32.mrb[21].mxu1 }
 0x284   :  { %v12040_v22 = vpop.f32.mrb[22].mxu1 }
 0x285   :  { %v12042_v18 = vpop.f32.mrb[23].mxu1 }
 0x288   :  { %v12044_v14 = vpop.f32.mrb[24].mxu1 }
 0x289   :  { %v12046_v10 = vpop.f32.mrb[25].mxu1 }
 0x28c   :  { %v12048_v26 = vpop.f32.mrb[26].mxu1 }
 0x28d   :  { %v12050_v63 = vpop.f32.mrb[27].mxu1 }
 0x290   :  { %v12052_v21 = vpop.f32.mrb[28].mxu1 }
 0x291   :  { %v12054_v38 = vpop.f32.mrb[29].mxu1 }
 0x294   :  { %v12056_v1 = vpop.f32.mrb[30].mxu1 }
 0x295   :  { %v12058_v59 = vpop.f32.mrb[31].mxu1 }
 0x299   :  { %v8975_v41 = vpop.f32.mrb[0].mxu0 }
 0x29a   :  { %v9071_v54 = vadd.f32 %v8975_v41, %v8485_v57  ;;  %v5894_v61 = vpop.f32.mrb[1].mxu0 }
 0x29b   :  { %v9072_v5 = vadd.f32 %v5894_v61, %v2343_v55 }
 0x29c   :  { %v6279_v48 = vsel %vm6277_vm2, %v9071_v54, 0.0  ;;  %v6414_v52 = vmul.f32 %v9071_v54, %v9071_v54 }
 0x29d   :  { %v6278_v58 = vsel %vm6277_vm2, %v9072_v5, 0.0  ;;  %v6413_v62 = vmul.f32 %v9072_v5, %v9072_v5  ;;  %v8978_v3 = vpop.f32.mrb[2].mxu0 }
 0x29e   :  { %v6478_v7 = vsel %vm6277_vm2, %v6414_v52, 0.0  ;;  %v6280_v11 = vadd.f32 %v6279_v48, %v6278_v58  ;;  %v9073_v15 = vadd.f32 %v8978_v3, %v8488_v47  ;;  %v5904_v19 = vpop.f32.mrb[3].mxu0 }
 0x29f   :  { %v6477_v23 = vsel %vm6277_vm2, %v6413_v62, 0.0  ;;  %v9074_v28 = vadd.f32 %v5904_v19, %v2353_v2 }
 0x2a0   :  { %v6479_v32 = vadd.f32 %v6478_v7, %v6477_v23  ;;  %v6416_v36 = vmul.f32 %v9073_v15, %v9073_v15  ;;  %v6283_v9 = vsel %vm6277_vm2, %v9073_v15, 0.0 }
 0x2a1   :  { %v6281_v53 = vsel %vm6277_vm2, %v9074_v28, 0.0  ;;  %v6415_v6 = vmul.f32 %v9074_v28, %v9074_v28  ;;  %v8981_v43 = vpop.f32.mrb[4].mxu0 }
 0x2a2   :  { %v6282_v50 = vadd.f32 %v6281_v53, %v6280_v11  ;;  %v9075_v56 = vadd.f32 %v8981_v43, %v8491_v4  ;;  %v5914_v0 = vpop.f32.mrb[5].mxu0  ;;  %v6482_v13 = vsel %vm6277_vm2, %v6416_v36, 0.0 }
 0x2a3   :  { %v6480_v17 = vsel %vm6277_vm2, %v6415_v6, 0.0  ;;  %v9076_v25 = vadd.f32 %v5914_v0, %v2363_v8 }
 0x2a4   :  { %v6284_v34 = vadd.f32 %v6283_v9, %v6282_v50  ;;  %v6481_v49 = vadd.f32 %v6480_v17, %v6479_v32  ;;  %v6418_v45 = vmul.f32 %v9075_v56, %v9075_v56  ;;  %v6287_v4 = vsel %vm6277_vm2, %v9075_v56, 0.0 }
 0x2a5   :  { %v6285_v60 = vsel %vm6277_vm2, %v9076_v25, 0.0  ;;  %v6417_v30 = vmul.f32 %v9076_v25, %v9076_v25  ;;  %v8984_v57 = vpop.f32.mrb[6].mxu0 }
 0x2a6   :  { %v6483_v55 = vadd.f32 %v6482_v13, %v6481_v49  ;;  %v6286_v47 = vadd.f32 %v6285_v60, %v6284_v34  ;;  %v9077_v2 = vadd.f32 %v8984_v57, %v8494_v12  ;;  %v5924_v41 = vpop.f32.mrb[7].mxu0  ;;  %v6486_v48 = vsel %vm6277_vm2, %v6418_v45, 0.0 }
 0x2a7   :  { %v6484_v54 = vsel %vm6277_vm2, %v6417_v30, 0.0  ;;  %v9078_v61 = vadd.f32 %v5924_v41, %v12010_v16 }
 0x2a8   :  { %v6485_v8 = vadd.f32 %v6484_v54, %v6483_v55  ;;  %v6288_v5 = vadd.f32 %v6287_v4, %v6286_v47  ;;  %v6420_v52 = vmul.f32 %v9077_v2, %v9077_v2  ;;  %v6291_v19 = vsel %vm6277_vm2, %v9077_v2, 0.0 }
 0x2a9   :  { %v6289_v58 = vsel %vm6277_vm2, %v9078_v61, 0.0  ;;  %v6419_v62 = vmul.f32 %v9078_v61, %v9078_v61  ;;  %v8987_v3 = vpop.f32.mrb[8].mxu0 }
 0x2aa   :  { %v6290_v7 = vadd.f32 %v6289_v58, %v6288_v5  ;;  %v6487_v11 = vadd.f32 %v6486_v48, %v6485_v8  ;;  %v9079_v12 = vadd.f32 %v8987_v3, %v12012_v20  ;;  %v5934_v15 = vpop.f32.mrb[9].mxu0  ;;  %v6490_v36 = vsel %vm6277_vm2, %v6420_v52, 0.0 }
 0x2ab   :  { %v6488_v23 = vsel %vm6277_vm2, %v6419_v62, 0.0  ;;  %v9080_v16 = vadd.f32 %v5934_v15, %v12014_v24 }
 0x2ac   :  { %v6489_v28 = vadd.f32 %v6488_v23, %v6487_v11  ;;  %v6292_v32 = vadd.f32 %v6291_v19, %v6290_v7  ;;  %v6422_v53 = vmul.f32 %v9079_v12, %v9079_v12  ;;  %v6295_v17 = vsel %vm6277_vm2, %v9079_v12, 0.0 }
 0x2ad   :  { %v6293_v6 = vsel %vm6277_vm2, %v9080_v16, 0.0  ;;  %v6421_v43 = vmul.f32 %v9080_v16, %v9080_v16  ;;  %v8990_v50 = vpop.f32.mrb[10].mxu0 }
 0x2ae   :  { %v6294_v56 = vadd.f32 %v6293_v6, %v6292_v32  ;;  %v6491_v0 = vadd.f32 %v6490_v36, %v6489_v28  ;;  %v9081_v20 = vadd.f32 %v8990_v50, %v12016_v29  ;;  %v5944_v9 = vpop.f32.mrb[11].mxu0  ;;  %v6494_v13 = vsel %vm6277_vm2, %v6422_v53, 0.0 }
 0x2af   :  { %v6492_v25 = vsel %vm6277_vm2, %v6421_v43, 0.0  ;;  %v9082_v24 = vadd.f32 %v5944_v9, %v12018_v33 }
 0x2b0   :  { %v6493_v34 = vadd.f32 %v6492_v25, %v6491_v0  ;;  %v6296_v49 = vadd.f32 %v6295_v17, %v6294_v56  ;;  %v6424_v45 = vmul.f32 %v9081_v20, %v9081_v20  ;;  %v6299_v41 = vsel %vm6277_vm2, %v9081_v20, 0.0 }
 0x2b1   :  { %v6297_v60 = vsel %vm6277_vm2, %v9082_v24, 0.0  ;;  %v6423_v30 = vmul.f32 %v9082_v24, %v9082_v24  ;;  %v8993_v57 = vpop.f32.mrb[12].mxu0 }
 0x2b2   :  { %v6298_v55 = vadd.f32 %v6297_v60, %v6296_v49  ;;  %v6495_v47 = vadd.f32 %v6494_v13, %v6493_v34  ;;  %v9083_v29 = vadd.f32 %v8993_v57, %v12020_v37  ;;  %v5954_v2 = vpop.f32.mrb[13].mxu0  ;;  %v6498_v8 = vsel %vm6277_vm2, %v6424_v45, 0.0 }
 0x2b3   :  { %v6496_v4 = vsel %vm6277_vm2, %v6423_v30, 0.0  ;;  %v9084_v33 = vadd.f32 %v5954_v2, %v12022_v40 }
 0x2b4   :  { %v6497_v54 = vadd.f32 %v6496_v4, %v6495_v47  ;;  %v6300_v61 = vadd.f32 %v6299_v41, %v6298_v55  ;;  %v6426_v5 = vmul.f32 %v9083_v29, %v9083_v29  ;;  %v6303_v11 = vsel %vm6277_vm2, %v9083_v29, 0.0 }
 0x2b5   :  { %v6301_v48 = vsel %vm6277_vm2, %v9084_v33, 0.0  ;;  %v6425_v52 = vmul.f32 %v9084_v33, %v9084_v33  ;;  %v8996_v58 = vpop.f32.mrb[14].mxu0 }
 0x2b6   :  { %v6302_v62 = vadd.f32 %v6301_v48, %v6300_v61  ;;  %v6499_v3 = vadd.f32 %v6498_v8, %v6497_v54  ;;  %v9085_v37 = vadd.f32 %v8996_v58, %v12024_v44  ;;  %v5964_v7 = vpop.f32.mrb[15].mxu0  ;;  %v6502_v23 = vsel %vm6277_vm2, %v6426_v5, 0.0 }
 0x2b7   :  { %v6500_v12 = vsel %vm6277_vm2, %v6425_v52, 0.0  ;;  %v9086_v40 = vadd.f32 %v5964_v7, %v12026_v46 }
 0x2b8   :  { %v6501_v15 = vadd.f32 %v6500_v12, %v6499_v3  ;;  %v6304_v19 = vadd.f32 %v6303_v11, %v6302_v62  ;;  %v6428_v16 = vmul.f32 %v9085_v37, %v9085_v37  ;;  %v6307_v50 = vsel %vm6277_vm2, %v9085_v37, 0.0 }
 0x2b9   :  { %v6305_v28 = vsel %vm6277_vm2, %v9086_v40, 0.0  ;;  %v6427_v32 = vmul.f32 %v9086_v40, %v9086_v40  ;;  %v8999_v36 = vpop.f32.mrb[16].mxu0 }
 0x2ba   :  { %v6306_v53 = vadd.f32 %v6305_v28, %v6304_v19  ;;  %v6503_v6 = vadd.f32 %v6502_v23, %v6501_v15  ;;  %v9087_v44 = vadd.f32 %v8999_v36, %v12028_v51  ;;  %v5974_v43 = vpop.f32.mrb[17].mxu0  ;;  %v6506_v9 = vsel %vm6277_vm2, %v6428_v16, 0.0 }
 0x2bb   :  { %v6504_v56 = vsel %vm6277_vm2, %v6427_v32, 0.0  ;;  %v9088_v46 = vadd.f32 %v5974_v43, %v12030_v42 }
 0x2bc   :  { %v6505_v0 = vadd.f32 %v6504_v56, %v6503_v6  ;;  %v6308_v20 = vadd.f32 %v6307_v50, %v6306_v53  ;;  %v6430_v17 = vmul.f32 %v9087_v44, %v9087_v44  ;;  %v6311_v60 = vsel %vm6277_vm2, %v9087_v44, 0.0 }
 0x2bd   :  { %v6309_v25 = vsel %vm6277_vm2, %v9088_v46, 0.0  ;;  %v6429_v24 = vmul.f32 %v9088_v46, %v9088_v46  ;;  %v9002_v34 = vpop.f32.mrb[18].mxu0 }
 0x2be   :  { %v6310_v49 = vadd.f32 %v6309_v25, %v6308_v20  ;;  %v6507_v13 = vadd.f32 %v6506_v9, %v6505_v0  ;;  %v9089_v51 = vadd.f32 %v9002_v34, %v12032_v39  ;;  %v5984_v45 = vpop.f32.mrb[19].mxu0  ;;  %v6510_v47 = vsel %vm6277_vm2, %v6430_v17, 0.0 }
 0x2bf   :  { %v6508_v30 = vsel %vm6277_vm2, %v6429_v24, 0.0  ;;  %v9090_v42 = vadd.f32 %v5984_v45, %v12034_v35 }
 0x2c0   :  { %v6509_v57 = vadd.f32 %v6508_v30, %v6507_v13  ;;  %v6312_v55 = vadd.f32 %v6311_v60, %v6310_v49  ;;  %v6432_v29 = vmul.f32 %v9089_v51, %v9089_v51  ;;  %v6315_v8 = vsel %vm6277_vm2, %v9089_v51, 0.0 }
 0x2c1   :  { %v6313_v2 = vsel %vm6277_vm2, %v9090_v42, 0.0  ;;  %v6431_v41 = vmul.f32 %v9090_v42, %v9090_v42  ;;  %v9005_v4 = vpop.f32.mrb[20].mxu0 }
 0x2c2   :  { %v6314_v33 = vadd.f32 %v6313_v2, %v6312_v55  ;;  %v6511_v54 = vadd.f32 %v6510_v47, %v6509_v57  ;;  %v9091_v39 = vadd.f32 %v9005_v4, %v12036_v31  ;;  %v5994_v61 = vpop.f32.mrb[21].mxu0  ;;  %v6514_v58 = vsel %vm6277_vm2, %v6432_v29, 0.0 }
 0x2c3   :  { %v6512_v5 = vsel %vm6277_vm2, %v6431_v41, 0.0  ;;  %v9092_v35 = vadd.f32 %v5994_v61, %v12038_v27 }
 0x2c4   :  { %v6513_v48 = vadd.f32 %v6512_v5, %v6511_v54  ;;  %v6316_v52 = vadd.f32 %v6315_v8, %v6314_v33  ;;  %v6434_v62 = vmul.f32 %v9091_v39, %v9091_v39  ;;  %v6319_v15 = vsel %vm6277_vm2, %v9091_v39, 0.0 }
 0x2c5   :  { %v6317_v3 = vsel %vm6277_vm2, %v9092_v35, 0.0  ;;  %v6433_v37 = vmul.f32 %v9092_v35, %v9092_v35  ;;  %v9008_v7 = vpop.f32.mrb[22].mxu0 }
 0x2c6   :  { %v6318_v11 = vadd.f32 %v6317_v3, %v6316_v52  ;;  %v6515_v12 = vadd.f32 %v6514_v58, %v6513_v48  ;;  %v9093_v31 = vadd.f32 %v9008_v7, %v12040_v22  ;;  %v6004_v40 = vpop.f32.mrb[23].mxu0  ;;  %v6518_v28 = vsel %vm6277_vm2, %v6434_v62, 0.0 }
 0x2c7   :  { %v6516_v19 = vsel %vm6277_vm2, %v6433_v37, 0.0  ;;  %v9094_v27 = vadd.f32 %v6004_v40, %v12042_v18 }
 0x2c8   :  { %v6517_v23 = vadd.f32 %v6516_v19, %v6515_v12  ;;  %v6320_v16 = vadd.f32 %v6319_v15, %v6318_v11  ;;  %v6436_v32 = vmul.f32 %v9093_v31, %v9093_v31  ;;  %v6323_v56 = vsel %vm6277_vm2, %v9093_v31, 0.0 }
 0x2c9   :  { %v6321_v36 = vsel %vm6277_vm2, %v9094_v27, 0.0  ;;  %v6435_v53 = vmul.f32 %v9094_v27, %v9094_v27  ;;  %v9011_v6 = vpop.f32.mrb[24].mxu0 }
 0x2ca   :  { %v6322_v44 = vadd.f32 %v6321_v36, %v6320_v16  ;;  %v6519_v43 = vadd.f32 %v6518_v28, %v6517_v23  ;;  %v9095_v22 = vadd.f32 %v9011_v6, %v12044_v14  ;;  %v6014_v50 = vpop.f32.mrb[25].mxu0  ;;  %v6522_v9 = vsel %vm6277_vm2, %v6436_v32, 0.0 }
 0x2cb   :  { %v6520_v46 = vsel %vm6277_vm2, %v6435_v53, 0.0  ;;  %v9096_v18 = vadd.f32 %v6014_v50, %v12046_v10 }
 0x2cc   :  { %v6521_v0 = vadd.f32 %v6520_v46, %v6519_v43  ;;  %v6324_v20 = vadd.f32 %v6323_v56, %v6322_v44  ;;  %v6438_v17 = vmul.f32 %v9095_v22, %v9095_v22  ;;  %v6327_v45 = vsel %vm6277_vm2, %v9095_v22, 0.0 }
 0x2cd   :  { %v6325_v25 = vsel %vm6277_vm2, %v9096_v18, 0.0  ;;  %v6437_v24 = vmul.f32 %v9096_v18, %v9096_v18  ;;  %v9014_v34 = vpop.f32.mrb[26].mxu0 }
 0x2ce   :  { %v6326_v49 = vadd.f32 %v6325_v25, %v6324_v20  ;;  %v6523_v13 = vadd.f32 %v6522_v9, %v6521_v0  ;;  %v9097_v14 = vadd.f32 %v9014_v34, %v12048_v26  ;;  %v6024_v51 = vpop.f32.mrb[27].mxu0  ;;  %v6526_v57 = vsel %vm6277_vm2, %v6438_v17, 0.0 }
 0x2cf   :  { %v6524_v60 = vsel %vm6277_vm2, %v6437_v24, 0.0  ;;  %v9098_v10 = vadd.f32 %v6024_v51, %v12050_v63 }
 0x2d0   :  { %v6525_v30 = vadd.f32 %v6524_v60, %v6523_v13  ;;  %v6328_v42 = vadd.f32 %v6327_v45, %v6326_v49  ;;  %v6440_v55 = vmul.f32 %v9097_v14, %v9097_v14  ;;  %v6331_v54 = vsel %vm6277_vm2, %v9097_v14, 0.0 }
 0x2d1   :  { %v6329_v47 = vsel %vm6277_vm2, %v9098_v10, 0.0  ;;  %v6439_v29 = vmul.f32 %v9098_v10, %v9098_v10  ;;  %v9017_v2 = vpop.f32.mrb[28].mxu0 }
 0x2d2   :  { %v6330_v41 = vadd.f32 %v6329_v47, %v6328_v42  ;;  %v6527_v4 = vadd.f32 %v6526_v57, %v6525_v30  ;;  %v9099_v26 = vadd.f32 %v9017_v2, %v12052_v21  ;;  %v6034_v33 = vpop.f32.mrb[29].mxu0  ;;  %v6530_v5 = vsel %vm6277_vm2, %v6440_v55, 0.0 }
 0x2d3   :  { %v6528_v39 = vsel %vm6277_vm2, %v6439_v29, 0.0  ;;  %v9100_v63 = vadd.f32 %v6034_v33, %v12054_v38 }
 0x2d4   :  { %v6529_v61 = vadd.f32 %v6528_v39, %v6527_v4  ;;  %v6332_v8 = vadd.f32 %v6331_v54, %v6330_v41  ;;  %v6442_v35 = vmul.f32 %v9099_v26, %v9099_v26  ;;  %v6335_v7 = vsel %vm6277_vm2, %v9099_v26, 0.0 }
 0x2d5   :  { %v6333_v48 = vsel %vm6277_vm2, %v9100_v63, 0.0  ;;  %v6441_v52 = vmul.f32 %v9100_v63, %v9100_v63  ;;  %v9020_v58 = vpop.f32.mrb[30].mxu0 }
 0x2d6   :  { %v6334_v62 = vadd.f32 %v6333_v48, %v6332_v8  ;;  %v6531_v3 = vadd.f32 %v6530_v5, %v6529_v61  ;;  %v9101_v21 = vadd.f32 %v9020_v58, %v12056_v1  ;;  %v6044_v37 = vpop.f32.mrb[31].mxu0  ;;  %v6534_v15 = vsel %vm6277_vm2, %v6442_v35, 0.0 }
 0x2d7   :  { %v6532_v11 = vsel %vm6277_vm2, %v6441_v52, 0.0  ;;  %v9102_v38 = vadd.f32 %v6044_v37, %v12058_v59 }
 0x2d8   :  { %v6533_v12 = vadd.f32 %v6532_v11, %v6531_v3  ;;  %v6336_v31 = vadd.f32 %v6335_v7, %v6334_v62  ;;  %v8631_v40 = vpop.f32.mrb[32].mxu1  ;;  %v6444_v19 = vmul.f32 %v9101_v21, %v9101_v21  ;;  %v6339_v6 = vsel %vm6277_vm2, %v9101_v21, 0.0 }
 0x2d9   :  { %v6337_v27 = vsel %vm6277_vm2, %v9102_v38, 0.0  ;;  %v6443_v23 = vmul.f32 %v9102_v38, %v9102_v38  ;;  %v9023_v16 = vpop.f32.mrb[32].mxu0  ;;  %v3213_v28 = vpop.f32.mrb[33].mxu1 }
 0x2da   :  { %v6338_v32 = vadd.f32 %v6337_v27, %v6336_v31  ;;  %v6535_v1 = vadd.f32 %v6534_v15, %v6533_v12  ;;  %v9103_v36 = vadd.f32 %v9023_v16, %v8631_v40  ;;  %v6054_v53 = vpop.f32.mrb[33].mxu0  ;;  %v6538_v56 = vsel %vm6277_vm2, %v6444_v19, 0.0 }
 0x2db   :  { %v6536_v44 = vsel %vm6277_vm2, %v6443_v23, 0.0  ;;  %v9104_v59 = vadd.f32 %v6054_v53, %v3213_v28 }
 0x2dc   :  { %v6537_v43 = vadd.f32 %v6536_v44, %v6535_v1  ;;  %v6340_v22 = vadd.f32 %v6339_v6, %v6338_v32  ;;  %v8634_v50 = vpop.f32.mrb[34].mxu1  ;;  %v6446_v46 = vmul.f32 %v9103_v36, %v9103_v36  ;;  %v6343_v49 = vsel %vm6277_vm2, %v9103_v36, 0.0 }
 0x2dd   :  { %v6341_v18 = vsel %vm6277_vm2, %v9104_v59, 0.0  ;;  %v6445_v0 = vmul.f32 %v9104_v59, %v9104_v59  ;;  %v9026_v20 = vpop.f32.mrb[34].mxu0  ;;  %v3223_v9 = vpop.f32.mrb[35].mxu1 }
 0x2de   :  { %v6342_v17 = vadd.f32 %v6341_v18, %v6340_v22  ;;  %v6539_v25 = vadd.f32 %v6538_v56, %v6537_v43  ;;  %v9105_v24 = vadd.f32 %v9026_v20, %v8634_v50  ;;  %v6064_v34 = vpop.f32.mrb[35].mxu0  ;;  %v6542_v10 = vsel %vm6277_vm2, %v6446_v46, 0.0 }
 0x2df   :  { %v6540_v13 = vsel %vm6277_vm2, %v6445_v0, 0.0  ;;  %v9106_v14 = vadd.f32 %v6064_v34, %v3223_v9 }
 0x2e0   :  { %v6541_v51 = vadd.f32 %v6540_v13, %v6539_v25  ;;  %v6344_v45 = vadd.f32 %v6343_v49, %v6342_v17  ;;  %v8637_v60 = vpop.f32.mrb[36].mxu1  ;;  %v6448_v30 = vmul.f32 %v9105_v24, %v9105_v24  ;;  %v6347_v26 = vsel %vm6277_vm2, %v9105_v24, 0.0 }
 0x2e1   :  { %v6345_v42 = vsel %vm6277_vm2, %v9106_v14, 0.0  ;;  %v6447_v57 = vmul.f32 %v9106_v14, %v9106_v14  ;;  %v9029_v55 = vpop.f32.mrb[36].mxu0  ;;  %v3233_v47 = vpop.f32.mrb[37].mxu1 }
 0x2e2   :  { %v6346_v29 = vadd.f32 %v6345_v42, %v6344_v45  ;;  %v6543_v2 = vadd.f32 %v6542_v10, %v6541_v51  ;;  %v9107_v41 = vadd.f32 %v9029_v55, %v8637_v60  ;;  %v6074_v4 = vpop.f32.mrb[37].mxu0  ;;  %v6546_v8 = vsel %vm6277_vm2, %v6448_v30, 0.0 }
 0x2e3   :  { %v6544_v33 = vsel %vm6277_vm2, %v6447_v57, 0.0  ;;  %v9108_v54 = vadd.f32 %v6074_v4, %v3233_v47 }
 0x2e4   :  { %v6545_v39 = vadd.f32 %v6544_v33, %v6543_v2  ;;  %v6348_v63 = vadd.f32 %v6347_v26, %v6346_v29  ;;  %v8640_v61 = vpop.f32.mrb[38].mxu1  ;;  %v6450_v5 = vmul.f32 %v9107_v41, %v9107_v41  ;;  %v6351_v7 = vsel %vm6277_vm2, %v9107_v41, 0.0 }
 0x2e5   :  { %v6349_v35 = vsel %vm6277_vm2, %v9108_v54, 0.0  ;;  %v6449_v48 = vmul.f32 %v9108_v54, %v9108_v54  ;;  %v9032_v52 = vpop.f32.mrb[38].mxu0  ;;  %v3243_v58 = vpop.f32.mrb[39].mxu1 }
 0x2e6   :  { %v6350_v62 = vadd.f32 %v6349_v35, %v6348_v63  ;;  %v6547_v3 = vadd.f32 %v6546_v8, %v6545_v39  ;;  %v9109_v21 = vadd.f32 %v9032_v52, %v8640_v61  ;;  %v6084_v37 = vpop.f32.mrb[39].mxu0  ;;  %v6550_v15 = vsel %vm6277_vm2, %v6450_v5, 0.0 }
 0x2e7   :  { %v6548_v11 = vsel %vm6277_vm2, %v6449_v48, 0.0  ;;  %v9110_v38 = vadd.f32 %v6084_v37, %v3243_v58 }
 0x2e8   :  { %v6549_v12 = vadd.f32 %v6548_v11, %v6547_v3  ;;  %v6352_v31 = vadd.f32 %v6351_v7, %v6350_v62  ;;  %v8643_v40 = vpop.f32.mrb[40].mxu1  ;;  %v6452_v19 = vmul.f32 %v9109_v21, %v9109_v21  ;;  %v6355_v6 = vsel %vm6277_vm2, %v9109_v21, 0.0 }
 0x2e9   :  { %v6353_v27 = vsel %vm6277_vm2, %v9110_v38, 0.0  ;;  %v6451_v23 = vmul.f32 %v9110_v38, %v9110_v38  ;;  %v9035_v16 = vpop.f32.mrb[40].mxu0  ;;  %v3253_v28 = vpop.f32.mrb[41].mxu1 }
 0x2ea   :  { %v6354_v32 = vadd.f32 %v6353_v27, %v6352_v31  ;;  %v6551_v1 = vadd.f32 %v6550_v15, %v6549_v12  ;;  %v9111_v36 = vadd.f32 %v9035_v16, %v8643_v40  ;;  %v6094_v53 = vpop.f32.mrb[41].mxu0  ;;  %v6554_v56 = vsel %vm6277_vm2, %v6452_v19, 0.0 }
 0x2eb   :  { %v6552_v44 = vsel %vm6277_vm2, %v6451_v23, 0.0  ;;  %v9112_v59 = vadd.f32 %v6094_v53, %v3253_v28 }
 0x2ec   :  { %v6553_v43 = vadd.f32 %v6552_v44, %v6551_v1  ;;  %v6356_v22 = vadd.f32 %v6355_v6, %v6354_v32  ;;  %v8646_v50 = vpop.f32.mrb[42].mxu1  ;;  %v6454_v46 = vmul.f32 %v9111_v36, %v9111_v36  ;;  %v6359_v49 = vsel %vm6277_vm2, %v9111_v36, 0.0 }
 0x2ed   :  { %v6357_v18 = vsel %vm6277_vm2, %v9112_v59, 0.0  ;;  %v6453_v0 = vmul.f32 %v9112_v59, %v9112_v59  ;;  %v9038_v20 = vpop.f32.mrb[42].mxu0  ;;  %v3263_v9 = vpop.f32.mrb[43].mxu1 }
 0x2ee   :  { %v6358_v17 = vadd.f32 %v6357_v18, %v6356_v22  ;;  %v6555_v25 = vadd.f32 %v6554_v56, %v6553_v43  ;;  %v9113_v24 = vadd.f32 %v9038_v20, %v8646_v50  ;;  %v6104_v34 = vpop.f32.mrb[43].mxu0  ;;  %v6558_v10 = vsel %vm6277_vm2, %v6454_v46, 0.0 }
 0x2ef   :  { %v6556_v13 = vsel %vm6277_vm2, %v6453_v0, 0.0  ;;  %v9114_v14 = vadd.f32 %v6104_v34, %v3263_v9 }
 0x2f0   :  { %v6557_v51 = vadd.f32 %v6556_v13, %v6555_v25  ;;  %v6360_v45 = vadd.f32 %v6359_v49, %v6358_v17  ;;  %v8649_v60 = vpop.f32.mrb[44].mxu1  ;;  %v6456_v30 = vmul.f32 %v9113_v24, %v9113_v24  ;;  %v6363_v26 = vsel %vm6277_vm2, %v9113_v24, 0.0 }
 0x2f1   :  { %v6361_v42 = vsel %vm6277_vm2, %v9114_v14, 0.0  ;;  %v6455_v57 = vmul.f32 %v9114_v14, %v9114_v14  ;;  %v9041_v55 = vpop.f32.mrb[44].mxu0  ;;  %v3273_v47 = vpop.f32.mrb[45].mxu1 }
 0x2f2   :  { %v6362_v29 = vadd.f32 %v6361_v42, %v6360_v45  ;;  %v6559_v2 = vadd.f32 %v6558_v10, %v6557_v51  ;;  %v9115_v41 = vadd.f32 %v9041_v55, %v8649_v60  ;;  %v6114_v4 = vpop.f32.mrb[45].mxu0  ;;  %v6562_v8 = vsel %vm6277_vm2, %v6456_v30, 0.0 }
 0x2f3   :  { %v6560_v33 = vsel %vm6277_vm2, %v6455_v57, 0.0  ;;  %v9116_v54 = vadd.f32 %v6114_v4, %v3273_v47 }
 0x2f4   :  { %v6561_v39 = vadd.f32 %v6560_v33, %v6559_v2  ;;  %v6364_v63 = vadd.f32 %v6363_v26, %v6362_v29  ;;  %v8652_v61 = vpop.f32.mrb[46].mxu1  ;;  %v6458_v5 = vmul.f32 %v9115_v41, %v9115_v41  ;;  %v6367_v7 = vsel %vm6277_vm2, %v9115_v41, 0.0 }
 0x2f5   :  { %v6365_v35 = vsel %vm6277_vm2, %v9116_v54, 0.0  ;;  %v6457_v48 = vmul.f32 %v9116_v54, %v9116_v54  ;;  %v9044_v52 = vpop.f32.mrb[46].mxu0  ;;  %v3283_v58 = vpop.f32.mrb[47].mxu1 }
 0x2f6   :  { %v6366_v62 = vadd.f32 %v6365_v35, %v6364_v63  ;;  %v6563_v3 = vadd.f32 %v6562_v8, %v6561_v39  ;;  %v9117_v21 = vadd.f32 %v9044_v52, %v8652_v61  ;;  %v6124_v37 = vpop.f32.mrb[47].mxu0  ;;  %v6566_v15 = vsel %vm6277_vm2, %v6458_v5, 0.0 }
 0x2f7   :  { %v6564_v11 = vsel %vm6277_vm2, %v6457_v48, 0.0  ;;  %v9118_v38 = vadd.f32 %v6124_v37, %v3283_v58 }
 0x2f8   :  { %v6565_v12 = vadd.f32 %v6564_v11, %v6563_v3  ;;  %v6368_v31 = vadd.f32 %v6367_v7, %v6366_v62  ;;  %v8655_v40 = vpop.f32.mrb[48].mxu1  ;;  %v6460_v19 = vmul.f32 %v9117_v21, %v9117_v21  ;;  %v6371_v6 = vsel %vm6277_vm2, %v9117_v21, 0.0 }
 0x2f9   :  { %v6369_v27 = vsel %vm6277_vm2, %v9118_v38, 0.0  ;;  %v6459_v23 = vmul.f32 %v9118_v38, %v9118_v38  ;;  %v9047_v16 = vpop.f32.mrb[48].mxu0  ;;  %v3293_v28 = vpop.f32.mrb[49].mxu1 }
 0x2fa   :  { %v6370_v32 = vadd.f32 %v6369_v27, %v6368_v31  ;;  %v6567_v1 = vadd.f32 %v6566_v15, %v6565_v12  ;;  %v9119_v36 = vadd.f32 %v9047_v16, %v8655_v40  ;;  %v6134_v53 = vpop.f32.mrb[49].mxu0  ;;  %v6570_v56 = vsel %vm6277_vm2, %v6460_v19, 0.0 }
 0x2fb   :  { %v6568_v44 = vsel %vm6277_vm2, %v6459_v23, 0.0  ;;  %v9120_v59 = vadd.f32 %v6134_v53, %v3293_v28 }
 0x2fc   :  { %v6569_v43 = vadd.f32 %v6568_v44, %v6567_v1  ;;  %v6372_v22 = vadd.f32 %v6371_v6, %v6370_v32  ;;  %v8658_v50 = vpop.f32.mrb[50].mxu1  ;;  %v6462_v46 = vmul.f32 %v9119_v36, %v9119_v36  ;;  %v6375_v49 = vsel %vm6277_vm2, %v9119_v36, 0.0 }
 0x2fd   :  { %v6373_v18 = vsel %vm6277_vm2, %v9120_v59, 0.0  ;;  %v6461_v0 = vmul.f32 %v9120_v59, %v9120_v59  ;;  %v9050_v20 = vpop.f32.mrb[50].mxu0  ;;  %v3303_v9 = vpop.f32.mrb[51].mxu1 }
 0x2fe   :  { %v6374_v17 = vadd.f32 %v6373_v18, %v6372_v22  ;;  %v6571_v25 = vadd.f32 %v6570_v56, %v6569_v43  ;;  %v9121_v24 = vadd.f32 %v9050_v20, %v8658_v50  ;;  %v6144_v34 = vpop.f32.mrb[51].mxu0  ;;  %v6574_v10 = vsel %vm6277_vm2, %v6462_v46, 0.0 }
 0x2ff   :  { %v6572_v13 = vsel %vm6277_vm2, %v6461_v0, 0.0  ;;  %v9122_v14 = vadd.f32 %v6144_v34, %v3303_v9 }
 0x300   :  { %v6573_v51 = vadd.f32 %v6572_v13, %v6571_v25  ;;  %v6376_v45 = vadd.f32 %v6375_v49, %v6374_v17  ;;  %v8661_v60 = vpop.f32.mrb[52].mxu1  ;;  %v6464_v30 = vmul.f32 %v9121_v24, %v9121_v24  ;;  %v6379_v26 = vsel %vm6277_vm2, %v9121_v24, 0.0 }
 0x301   :  { %v6377_v42 = vsel %vm6277_vm2, %v9122_v14, 0.0  ;;  %v6463_v57 = vmul.f32 %v9122_v14, %v9122_v14  ;;  %v9053_v55 = vpop.f32.mrb[52].mxu0  ;;  %v3313_v47 = vpop.f32.mrb[53].mxu1 }
 0x302   :  { %v6378_v29 = vadd.f32 %v6377_v42, %v6376_v45  ;;  %v6575_v2 = vadd.f32 %v6574_v10, %v6573_v51  ;;  %v9123_v41 = vadd.f32 %v9053_v55, %v8661_v60  ;;  %v6154_v4 = vpop.f32.mrb[53].mxu0  ;;  %v6578_v8 = vsel %vm6277_vm2, %v6464_v30, 0.0 }
 0x303   :  { %v6576_v33 = vsel %vm6277_vm2, %v6463_v57, 0.0  ;;  %v9124_v54 = vadd.f32 %v6154_v4, %v3313_v47 }
 0x304   :  { %v6577_v39 = vadd.f32 %v6576_v33, %v6575_v2  ;;  %v6380_v63 = vadd.f32 %v6379_v26, %v6378_v29  ;;  %v8664_v61 = vpop.f32.mrb[54].mxu1  ;;  %v6466_v5 = vmul.f32 %v9123_v41, %v9123_v41  ;;  %v6383_v7 = vsel %vm6277_vm2, %v9123_v41, 0.0 }
 0x305   :  { %v6381_v35 = vsel %vm6277_vm2, %v9124_v54, 0.0  ;;  %v6465_v48 = vmul.f32 %v9124_v54, %v9124_v54  ;;  %v9056_v52 = vpop.f32.mrb[54].mxu0  ;;  %v3323_v58 = vpop.f32.mrb[55].mxu1 }
 0x306   :  { %v6382_v62 = vadd.f32 %v6381_v35, %v6380_v63  ;;  %v6579_v3 = vadd.f32 %v6578_v8, %v6577_v39  ;;  %v9125_v21 = vadd.f32 %v9056_v52, %v8664_v61  ;;  %v6164_v37 = vpop.f32.mrb[55].mxu0  ;;  %v6582_v15 = vsel %vm6277_vm2, %v6466_v5, 0.0 }
 0x307   :  { %v6580_v11 = vsel %vm6277_vm2, %v6465_v48, 0.0  ;;  %v9126_v38 = vadd.f32 %v6164_v37, %v3323_v58 }
 0x308   :  { %v6581_v12 = vadd.f32 %v6580_v11, %v6579_v3  ;;  %v6384_v31 = vadd.f32 %v6383_v7, %v6382_v62  ;;  %v8667_v40 = vpop.f32.mrb[56].mxu1  ;;  %v6468_v19 = vmul.f32 %v9125_v21, %v9125_v21  ;;  %v6387_v6 = vsel %vm6277_vm2, %v9125_v21, 0.0 }
 0x309   :  { %v6385_v27 = vsel %vm6277_vm2, %v9126_v38, 0.0  ;;  %v6467_v23 = vmul.f32 %v9126_v38, %v9126_v38  ;;  %v9059_v16 = vpop.f32.mrb[56].mxu0  ;;  %v3333_v28 = vpop.f32.mrb[57].mxu1 }
 0x30a   :  { %v6386_v32 = vadd.f32 %v6385_v27, %v6384_v31  ;;  %v6583_v1 = vadd.f32 %v6582_v15, %v6581_v12  ;;  %v9127_v36 = vadd.f32 %v9059_v16, %v8667_v40  ;;  %v6174_v53 = vpop.f32.mrb[57].mxu0  ;;  %v6586_v56 = vsel %vm6277_vm2, %v6468_v19, 0.0 }
 0x30b   :  { %v6584_v44 = vsel %vm6277_vm2, %v6467_v23, 0.0  ;;  %v9128_v59 = vadd.f32 %v6174_v53, %v3333_v28 }
 0x30c   :  { %v6585_v43 = vadd.f32 %v6584_v44, %v6583_v1  ;;  %v6388_v22 = vadd.f32 %v6387_v6, %v6386_v32  ;;  %v8670_v50 = vpop.f32.mrb[58].mxu1  ;;  %v6470_v46 = vmul.f32 %v9127_v36, %v9127_v36  ;;  %v6391_v49 = vsel %vm6277_vm2, %v9127_v36, 0.0 }
 0x30d   :  { %v6389_v18 = vsel %vm6277_vm2, %v9128_v59, 0.0  ;;  %v6469_v0 = vmul.f32 %v9128_v59, %v9128_v59  ;;  %v9062_v20 = vpop.f32.mrb[58].mxu0  ;;  %v3343_v9 = vpop.f32.mrb[59].mxu1 }
 0x30e   :  { %v6390_v17 = vadd.f32 %v6389_v18, %v6388_v22  ;;  %v6587_v25 = vadd.f32 %v6586_v56, %v6585_v43  ;;  %v9129_v24 = vadd.f32 %v9062_v20, %v8670_v50  ;;  %v6184_v34 = vpop.f32.mrb[59].mxu0  ;;  %v6590_v10 = vsel %vm6277_vm2, %v6470_v46, 0.0 }
 0x30f   :  { %v6588_v13 = vsel %vm6277_vm2, %v6469_v0, 0.0  ;;  %v9130_v14 = vadd.f32 %v6184_v34, %v3343_v9 }
 0x310   :  { %v6589_v51 = vadd.f32 %v6588_v13, %v6587_v25  ;;  %v6392_v45 = vadd.f32 %v6391_v49, %v6390_v17  ;;  %v8673_v60 = vpop.f32.mrb[60].mxu1  ;;  %v6472_v30 = vmul.f32 %v9129_v24, %v9129_v24  ;;  %v6395_v26 = vsel %vm6277_vm2, %v9129_v24, 0.0 }
 0x311   :  { %v6393_v42 = vsel %vm6277_vm2, %v9130_v14, 0.0  ;;  %v6471_v57 = vmul.f32 %v9130_v14, %v9130_v14  ;;  %v9065_v55 = vpop.f32.mrb[60].mxu0  ;;  %v3353_v47 = vpop.f32.mrb[61].mxu1 }
 0x312   :  { %v6394_v29 = vadd.f32 %v6393_v42, %v6392_v45  ;;  %v6591_v2 = vadd.f32 %v6590_v10, %v6589_v51  ;;  %v9131_v41 = vadd.f32 %v9065_v55, %v8673_v60  ;;  %v6194_v4 = vpop.f32.mrb[61].mxu0  ;;  %v6594_v8 = vsel %vm6277_vm2, %v6472_v30, 0.0 }
 0x313   :  { %v6592_v33 = vsel %vm6277_vm2, %v6471_v57, 0.0  ;;  %v9132_v54 = vadd.f32 %v6194_v4, %v3353_v47 }
 0x314   :  { %v6593_v39 = vadd.f32 %v6592_v33, %v6591_v2  ;;  %v6396_v63 = vadd.f32 %v6395_v26, %v6394_v29  ;;  %v8676_v61 = vpop.f32.mrb[62].mxu1  ;;  %v6474_v5 = vmul.f32 %v9131_v41, %v9131_v41  ;;  %v6399_v7 = vsel %vm6277_vm2, %v9131_v41, 0.0 }
 0x315   :  { %v6397_v35 = vsel %vm6277_vm2, %v9132_v54, 0.0  ;;  %v6473_v48 = vmul.f32 %v9132_v54, %v9132_v54  ;;  %v9068_v52 = vpop.f32.mrb[62].mxu0  ;;  %v3363_v58 = vpop.f32.mrb[63].mxu1 }
 0x316   :  { %v6398_v62 = vadd.f32 %v6397_v35, %v6396_v63  ;;  %v6595_v3 = vadd.f32 %v6594_v8, %v6593_v39  ;;  %v9133_v21 = vadd.f32 %v9068_v52, %v8676_v61  ;;  %v6204_v37 = vpop.f32.mrb[63].mxu0  ;;  %v6598_v40 = vsel %vm6277_vm2, %v6474_v5, 0.0 }
 0x317   :  { %v6596_v11 = vsel %vm6277_vm2, %v6473_v48, 0.0  ;;  %v9134_v38 = vadd.f32 %v6204_v37, %v3363_v58 }
 0x318   :  { %v6597_v12 = vadd.f32 %v6596_v11, %v6595_v3  ;;  %v6400_v31 = vadd.f32 %v6399_v7, %v6398_v62  ;;  %v6476_v15 = vmul.f32 %v9133_v21, %v9133_v21  ;;  %v6403_v28 = vsel %vm6277_vm2, %v9133_v21, 0.0 }
 0x319   :  { %v6401_v19 = vsel %vm6277_vm2, %v9134_v38, 0.0  ;;  %v6475_v27 = vmul.f32 %v9134_v38, %v9134_v38 }
 0x31a   :  { %v6402_v23 = vadd.f32 %v6401_v19, %v6400_v31  ;;  %v6599_v16 = vadd.f32 %v6598_v40, %v6597_v12  ;;  %v6602_v53 = vsel %vm6277_vm2, %v6476_v15, 0.0 }
 0x31b   :  { %v6600_v32 = vsel %vm6277_vm2, %v6475_v27, 0.0 }
 0x31c   :  { %v6404_v1 = vadd.f32 %v6403_v28, %v6402_v23  ;;  %v6601_v36 = vadd.f32 %v6600_v32, %v6599_v16 }
 0x31e   :  { %v6405_v6 = vrot.slane %v6404_v1, 4  ;;  %v6603_v44 = vadd.f32 %v6602_v53, %v6601_v36 }
 0x320   :  { %v6406_v59 = vadd.f32 %v6405_v6, %v6404_v1  ;;  %v6604_v43 = vrot.slane %v6603_v44, 4 }
 0x322   :  { %v6407_v22 = vrot.slane %v6406_v59, 2  ;;  %v6605_v50 = vadd.f32 %v6604_v43, %v6603_v44 }
 0x324   :  { %v6408_v56 = vadd.f32 %v6407_v22, %v6406_v59  ;;  %v6606_v46 = vrot.slane %v6605_v50, 2 }
 0x326   :  { %v6409_v18 = vrot.slane %v6408_v56, 1  ;;  %v6607_v0 = vadd.f32 %v6606_v46, %v6605_v50 }
 0x328   :  { %v6410_v20 = vadd.f32 %v6409_v18, %v6408_v56  ;;  %v6608_v9 = vrot.slane %v6607_v0, 1 }
 0x32a   :  { %6412 = vst.msk [vmem:[#allocation2] sm:$0x1] %vm6411_vm3, %v6410_v20  ;;  %v6609_v17 = vadd.f32 %v6608_v9, %v6607_v0 }
 0x32c   :  { %6610 = vst.msk [vmem:[#allocation2 + $0x1] sm:$0x1] %vm6411_vm3, %v6609_v17 }
 0x32d   :  { %9596 = shalt.err (!%p9593_p4)
}
 0x32e   :  { %s9597_s28 = scalar_lea.hbm %s12227_s2, 32 }
 0x32f   :  { %p9598_p5 = scmp.ne.s32.totalorder %s12227_s2, %s9597_s28  ;;  %p9601_p6 = scmp.lt.u32.totalorder %s9597_s28, %s12227_s2 }
 0x331   :  { %p9603_p7 = pnand %p9601_p6, %p9598_p5 }
 0x333   :  { %9606 = shalt.err (!%p9603_p7)
}
 0x334   :  { %6620 = dma.vmem_to_hbm [thread:$0]  %s6618_s24, 32, %s12227_s2, [#allocation3]  }
 0x335   :  { %9607 = dma.done.wait [#allocation3], 32  }
 0x336   :  { %9608 = vsyncadd [#allocation3], 4294967264 }
 0x337   :  { %6624 = vsyncpa [#allocation3], 1 }

</bundles_post_ra>
